<compile_context>
chip_gen: v6e
topology: v6e:2x2x1
jax: 0.10.0
libtpu: 0.0.40
codegen_flags: <defaults>
</compile_context>

<pallas_src>
import jax
import jax.numpy as jnp
import numpy as np
from jax.experimental import pallas as pl
from jax.experimental.pallas import tpu as pltpu


def _sine_layer_kernel(x_ref, w_ref, b_ref, o_ref):
    # x_ref: (TM, K)  w_ref: (K, TN)  b_ref: (1, TN)  o_ref: (TM, TN)
    # Weight/bias already carry the omega_0 scale; accumulate in f32 on the
    # MXU, do the bias add and sin in f32, cast once on store.
    pre = jnp.dot(x_ref[...], w_ref[...], preferred_element_type=jnp.float32)
    pre = pre + b_ref[...]
    o_ref[...] = jnp.sin(pre).astype(o_ref.dtype)


def _round_up(a, b):
    return (a + b - 1) // b * b


def _vmem_capacity_bytes():
    # Per-TensorCore VMEM: 128 MiB on v5e/v6e, 64 MiB on v7x.
    try:
        return int(pltpu.get_tpu_info().vmem_capacity_bytes)
    except Exception:
        return 64 * 1024 * 1024  # conservative, safe on every chip


def sine_layer(x, weight, bias, omega_0, *, tile_m=None, tile_n=None,
               out_dtype=None):
    """SIREN SineLayer forward: sin(omega_0 * (x @ W^T + b)).

    x:      (..., in_features)
    weight: (out_features, in_features)   (PyTorch nn.Linear layout)
    bias:   (out_features,)
    out_dtype: optional output dtype (e.g. bf16 on v5e to halve store bytes);
               defaults to x.dtype.  MXU accumulate, bias add and sin stay f32.

    Note: omega_0 is folded into the weight (cast to x.dtype), which changes
    rounding slightly vs the reference f32 path when x is low precision.
    """
    orig_shape = x.shape
    in_features = orig_shape[-1]
    out_features = weight.shape[0]

    x2 = x.reshape(-1, in_features)
    N = x2.shape[0]
    dtype = x2.dtype
    itemsize = jnp.dtype(dtype).itemsize
    if out_dtype is None:
        out_dtype = dtype
    out_itemsize = jnp.dtype(out_dtype).itemsize
    # Native sublane packing: 8 rows for f32, 16 for bf16, 32 for int8/fp8.
    sublane = max(8, 32 // itemsize)

    # Fold omega_0 into weight/bias and pre-transpose weight to (K, out)
    # so the kernel never transposes and never multiplies by omega_0.
    w_kn = (omega_0 * weight.T).astype(dtype)               # (K, out)
    b_row = (omega_0 * bias).astype(jnp.float32)[None, :]   # (1, out), f32

    # Lane-dense output: pad out_features up to a multiple of 128 (weight-sized
    # host op, negligible; the column slice at the end is skipped when already
    # aligned).
    out_p = _round_up(out_features, 128)
    if out_p != out_features:
        w_kn = jnp.pad(w_kn, ((0, 0), (0, out_p - out_features)))
        b_row = jnp.pad(b_row, ((0, 0), (0, out_p - out_features)))

    # ---- VMEM-budget-driven tile selection ---------------------------------
    vmem_cap = _vmem_capacity_bytes()
    vmem_limit = int(0.75 * vmem_cap)     # leave headroom for Mosaic scratch
    tile_budget = int(0.50 * vmem_cap)    # what we plan to spend on tiles

    k_lanes = _round_up(in_features, 128)      # lane footprint of an x row
    k_sub = _round_up(in_features, sublane)    # sublane footprint of the weight

    # tile_n bounds the resident weight tile (important for wide layers on v7x).
    if tile_n is None:
        tile_n = min(out_p, 2048)
    tile_n = _round_up(min(tile_n, out_p), 128)

    def _resident_bytes(tn):
        # Weight + bias tiles; conservatively assume the pipeliner keeps two
        # buffers of each (we don't rely on pl.Buffered(1) support).
        return 2 * (k_sub * tn * itemsize + 8 * tn * 4)

    while tile_n > 128 and _resident_bytes(tile_n) > tile_budget // 2:
        tile_n = _round_up(tile_n // 2, 128)

    if tile_m is None:
        # Double-buffered x tile + double-buffered out tile per grid step,
        # on top of the resident weight/bias buffers.
        per_row = 2 * (k_lanes * itemsize + tile_n * out_itemsize)
        tile_m = 2048
        while tile_m > sublane and (
                tile_m * per_row + _resident_bytes(tile_n) > tile_budget):
            tile_m //= 2

    # Don't tile past the actual row count (tiny N -> one small block; the
    # ragged tail block is masked by Pallas, no host padding needed).
    tile_m = min(tile_m, _round_up(N, sublane))
    # Target ~8 row-steps so DMA overlaps compute on every chip (and both v7x
    # TensorCores get several steps each), but keep blocks >= 512 rows when N
    # allows — big tiles reach ~85% of the HBM roofline.
    if N > 512:
        tile_m = min(tile_m, max(_round_up(pl.cdiv(N, 8), sublane), 512))
    tile_m = max(sublane, _round_up(tile_m, sublane))

    grid_m = pl.cdiv(N, tile_m)
    grid_n = pl.cdiv(out_p, tile_n)

    out = pl.pallas_call(
        _sine_layer_kernel,
        out_shape=jax.ShapeDtypeStruct((N, out_p), out_dtype),
        grid_spec=pltpu.PrefetchScalarGridSpec(
            num_scalar_prefetch=0,
            grid=(grid_m, grid_n),
            in_specs=[
                # x: tiled over rows; block index constant over the inner j
                # axis, so it is not re-fetched while sweeping output columns.
                pl.BlockSpec((tile_m, in_features), lambda i, j: (i, 0)),
                # pre-transposed, omega-scaled weight: tiled over out columns.
                pl.BlockSpec((in_features, tile_n), lambda i, j: (0, j)),
                # omega-scaled bias row.
                pl.BlockSpec((1, tile_n), lambda i, j: (0, j)),
            ],
            out_specs=pl.BlockSpec((tile_m, tile_n), lambda i, j: (i, j)),
        ),
        compiler_params=pltpu.CompilerParams(
            dimension_semantics=("parallel", "parallel"),
            vmem_limit_bytes=vmem_limit,
        ),
    )(x2, w_kn, b_row)

    if out_p != out_features:
        out = out[:, :out_features]
    return out.reshape(*orig_shape[:-1], out_features)


def sine_layer_ref(x, weight, bias, omega_0):
    return jnp.sin(omega_0 * (x @ weight.T + bias[None, :]))


def _siren_weight(key, in_features, out_features, omega_0, is_first):
    if is_first:
        bound = 1.0 / in_features
    else:
        bound = np.sqrt(6.0 / in_features) / omega_0
    return jax.random.uniform(key, (out_features, in_features), jnp.float32,
                              -bound, bound)


if __name__ == "__main__":
    key = jax.random.PRNGKey(0)
    k1, k2, k3, k4, k5, k6 = jax.random.split(key, 6)
    omega_0 = 30.0

    # Case 1: first SIREN layer (2-D coords in), small demo shapes.
    in_f, out_f, N = 2, 32, 256
    w1 = _siren_weight(k1, in_f, out_f, omega_0, is_first=True)
    bbound = 1.0 / np.sqrt(in_f)
    b1 = jax.random.uniform(k2, (out_f,), jnp.float32, -bbound, bbound)
    x1 = jax.random.uniform(k3, (N, in_f), jnp.float32, -1.0, 1.0)

    out1 = jax.block_until_ready(sine_layer(x1, w1, b1, omega_0))
    ref1 = sine_layer_ref(x1, w1, b1, omega_0)
    np.testing.assert_allclose(np.asarray(out1), np.asarray(ref1),
                               atol=3e-5, rtol=3e-5)

    # Case 2: hidden SIREN layer, ragged N (not a multiple of the tile).
    in_f2, out_f2, N2 = 32, 64, 1000
    w2 = _siren_weight(k4, in_f2, out_f2, omega_0, is_first=False)
    bbound2 = 1.0 / np.sqrt(in_f2)
    b2 = jax.random.uniform(k5, (out_f2,), jnp.float32, -bbound2, bbound2)
    x2 = jax.random.uniform(k6, (N2, in_f2), jnp.float32, -1.0, 1.0)

    out2 = jax.block_until_ready(sine_layer(x2, w2, b2, omega_0))
    ref2 = sine_layer_ref(x2, w2, b2, omega_0)
    np.testing.assert_allclose(np.asarray(out2), np.asarray(ref2),
                               atol=3e-5, rtol=3e-5)

    print("KERNEL_OK")
</pallas_src>

<mosaic_0001>
module attributes {stable_mosaic.version = 11 : i64} {
  func.func @_sine_layer_kernel(%arg0: i32, %arg1: i32, %arg2: memref<256x2xf32, #tpu.memory_space<vmem>>, %arg3: memref<2x128xf32, #tpu.memory_space<vmem>>, %arg4: memref<1x128xf32, #tpu.memory_space<vmem>>, %arg5: memref<256x128xf32, #tpu.memory_space<vmem>>) attributes {dimension_semantics = [#tpu.dimension_semantics<parallel>, #tpu.dimension_semantics<parallel>], iteration_bounds = array<i64: 1, 1>, scalar_prefetch = 0 : i64, scratch_operands = 0 : i64, tpu.core_type = #tpu.core_type<tc>, window_params = [{transform_indices = @transform_0, window_bounds = array<i64: 256, 2>}, {transform_indices = @transform_1, window_bounds = array<i64: 2, 128>}, {transform_indices = @transform_2, window_bounds = array<i64: 1, 128>}, {transform_indices = @transform_3, window_bounds = array<i64: 256, 128>}]} {
    %c0 = arith.constant 0 : index
    %c0_0 = arith.constant 0 : index
    %0 = vector.load %arg2[%c0, %c0_0] : memref<256x2xf32, #tpu.memory_space<vmem>>, vector<256x2xf32>
    %c0_1 = arith.constant 0 : index
    %c0_2 = arith.constant 0 : index
    %1 = vector.load %arg3[%c0_1, %c0_2] : memref<2x128xf32, #tpu.memory_space<vmem>>, vector<2x128xf32>
    %cst = arith.constant dense<0.000000e+00> : vector<256x128xf32>
    %2 = tpu.matmul %0, %1, %cst {dimension_numbers = #tpu.dot_dimension_numbers<[1], [0], [0], [1], [0, 0, 1, 1], [], []>} : vector<256x2xf32>, vector<2x128xf32>, vector<256x128xf32> -> vector<256x128xf32>
    %c0_3 = arith.constant 0 : index
    %c0_4 = arith.constant 0 : index
    %3 = vector.load %arg4[%c0_3, %c0_4] : memref<1x128xf32, #tpu.memory_space<vmem>>, vector<1x128xf32>
    %4 = vector.broadcast %3 : vector<1x128xf32> to vector<256x128xf32>
    %5 = arith.addf %2, %4 : vector<256x128xf32>
    %6 = math.sin %5 : vector<256x128xf32>
    %c0_5 = arith.constant 0 : index
    %c0_6 = arith.constant 0 : index
    %7 = vector.load %arg5[%c0_5, %c0_6] : memref<256x128xf32, #tpu.memory_space<vmem>>, vector<256x128xf32>
    tpu.vector_store %arg5[%c0_5, %c0_6], %6 {strides = array<i32>} : memref<256x128xf32, #tpu.memory_space<vmem>>, vector<256x128xf32>,
    return
  }
  func.func @transform_0(%arg0: i32, %arg1: i32) -> (i32, i32) {
    %c0_i32 = arith.constant 0 : i32
    %c0_i32_0 = arith.constant 0 : i32
    return %arg0, %c0_i32 : i32, i32
  }
  func.func @transform_1(%arg0: i32, %arg1: i32) -> (i32, i32) {
    %c0_i32 = arith.constant 0 : i32
    %c0_i32_0 = arith.constant 0 : i32
    return %c0_i32, %arg1 : i32, i32
  }
  func.func @transform_2(%arg0: i32, %arg1: i32) -> (i32, i32) {
    %c0_i32 = arith.constant 0 : i32
    %c0_i32_0 = arith.constant 0 : i32
    return %c0_i32, %arg1 : i32, i32
  }
  func.func @transform_3(%arg0: i32, %arg1: i32) -> (i32, i32) {
    %c0_i32 = arith.constant 0 : i32
    return %arg0, %arg1 : i32, i32
  }
}

</mosaic_0001>

<bundles_post_ra>
// kernel: tpu_custom_call.1
= control target key start
LH: loop header
LB: loop body
LE: loop exit
PB: predicated region body
PF: predicated region fallthrough
CT: control target
= control target key end

     0   :  { %vm152_vm0 = vcmask 1041408   ;;  %vm55_vm1 = vcmask 15360   ;;  %s6808_s0 = inlined_call_operand.vmem [shape: f32[256,2], index: 0, kind: input, shape index: {}]   ;;  %s6809_s1 = inlined_call_operand.vmem [shape: f32[2,128], index: 1, kind: input, shape index: {}]   ;;  %s6810_s2 = inlined_call_operand.vmem [shape: f32[1,128], index: 2, kind: input, shape index: {}]   ;;  %s6811_s3 = inlined_call_operand.hbm [shape: f32[256,128], index: 3, kind: output, shape index: {}]  }
   0x1   :  { %v47_v0 = vld [vmem:[%s6809_s1] sm:$0x3]  ;;  %v16_v3 = vld [vmem:[%s6808_s0 + $0x8] sm:$0xff]  ;;  %v17_v5 = vld [vmem:[%s6808_s0 + $0x10] sm:$0xff] }
   0x2   :  { %v15_v1 = vld [vmem:[%s6808_s0] sm:$0xff]  ;;  %3952 = vmatprep.subr.msk.mxu0 %vm152_vm0, %v47_v0  ;;  %4002 = vmatprep.subr.msk.mxu1 %vm152_vm0, %v47_v0  ;;  %v32_v4 = vld [vmem:[%s6808_s0 + $0x88] sm:$0xff]  ;;  %v33_v6 = vld [vmem:[%s6808_s0 + $0x90] sm:$0xff] }
   0x3   :  { %v31_v2 = vld [vmem:[%s6808_s0 + $0x80] sm:$0xff]  ;;  %3953 = vmatpush3.msk.msra.mxu0 %vm152_vm0, %v47_v0  ;;  %4003 = vmatpush3.msk.msra.mxu1 %vm152_vm0, %v47_v0  ;;  %v18_v7 = vld [vmem:[%s6808_s0 + $0x18] sm:$0xff]  ;;  %v20_v11 = vld [vmem:[%s6808_s0 + $0x28] sm:$0xff] }
   0x4   :  { %3954 = vmatprep.mubr.msk.f32.mxu0 %vm55_vm1, %v15_v1  ;;  %3978 = vmatprep.mubr.msk.f32.mxu1 %vm55_vm1, %v31_v2  ;;  %v34_v8 = vld [vmem:[%s6808_s0 + $0x98] sm:$0xff]  ;;  %v19_v9 = vld [vmem:[%s6808_s0 + $0x20] sm:$0xff]  ;;  %v36_v12 = vld [vmem:[%s6808_s0 + $0xa8] sm:$0xff] }
   0x5   :  { %3955 = vmatmul.mubr.msk.f32.vlgmr.msra.gmra.mxu0 %vm55_vm1, %v16_v3  ;;  %3979 = vmatmul.mubr.msk.f32.vlgmr.msra.gmra.mxu1 %vm55_vm1, %v32_v4  ;;  %v35_v10 = vld [vmem:[%s6808_s0 + $0xa0] sm:$0xff]  ;;  %v21_v13 = vld [vmem:[%s6808_s0 + $0x30] sm:$0xff] }
   0x6   :  { %3957 = vmatprep.mubr.msk.f32.mxu0 %vm55_vm1, %v17_v5  ;;  %3981 = vmatprep.mubr.msk.f32.mxu1 %vm55_vm1, %v33_v6  ;;  %v37_v14 = vld [vmem:[%s6808_s0 + $0xb0] sm:$0xff] }
   0x9   :  { %3958 = vmatmul.mubr.msk.f32.gmra.mxu0 %vm55_vm1, %v18_v7  ;;  %3982 = vmatmul.mubr.msk.f32.gmra.mxu1 %vm55_vm1, %v34_v8 }
   0xa   :  { %3960 = vmatprep.mubr.msk.f32.mxu0 %vm55_vm1, %v19_v9  ;;  %3984 = vmatprep.mubr.msk.f32.mxu1 %vm55_vm1, %v35_v10 }
   0xb   :  { %8 = vsyncpa [#allocation3], 0  ;;  %v22_v15 = vld [vmem:[%s6808_s0 + $0x38] sm:$0xff]  ;;  %v23_v17 = vld [vmem:[%s6808_s0 + $0x40] sm:$0xff]  ;;  %v4296_v5 = vmov 683565275  }
   0xc   :  { %v38_v16 = vld [vmem:[%s6808_s0 + $0xb8] sm:$0xff]  ;;  %v39_v18 = vld [vmem:[%s6808_s0 + $0xc0] sm:$0xff]  ;;  %v24_v19 = vld [vmem:[%s6808_s0 + $0x48] sm:$0xff]  ;;  %v4297_v9 = vmov 2475754826  }
   0xd   :  { %3961 = vmatmul.mubr.msk.f32.gmra.mxu0 %vm55_vm1, %v20_v11  ;;  %3985 = vmatmul.mubr.msk.f32.gmra.mxu1 %vm55_vm1, %v36_v12  ;;  %v40_v20 = vld [vmem:[%s6808_s0 + $0xc8] sm:$0xff]  ;;  %v25_v21 = vld [vmem:[%s6808_s0 + $0x50] sm:$0xff]  ;;  %v26_v23 = vld [vmem:[%s6808_s0 + $0x58] sm:$0xff]  ;;  %v4298_v11 = vmov 2131351028  }
   0xe   :  { %3963 = vmatprep.mubr.msk.f32.mxu0 %vm55_vm1, %v21_v13  ;;  %3987 = vmatprep.mubr.msk.f32.mxu1 %vm55_vm1, %v37_v14  ;;  %v41_v22 = vld [vmem:[%s6808_s0 + $0xd0] sm:$0xff]  ;;  %v42_v24 = vld [vmem:[%s6808_s0 + $0xd8] sm:$0xff]  ;;  %v27_v25 = vld [vmem:[%s6808_s0 + $0x60] sm:$0xff]  ;;  %v4299_v13 = vmov 2102212464  }
   0xf   :  { %v43_v26 = vld [vmem:[%s6808_s0 + $0xe0] sm:$0xff]  ;;  %v28_v27 = vld [vmem:[%s6808_s0 + $0x68] sm:$0xff]  ;;  %v29_v29 = vld [vmem:[%s6808_s0 + $0x70] sm:$0xff] }
  0x10   :  { %v44_v28 = vld [vmem:[%s6808_s0 + $0xe8] sm:$0xff]  ;;  %v45_v30 = vld [vmem:[%s6808_s0 + $0xf0] sm:$0xff]  ;;  %v30_v31 = vld [vmem:[%s6808_s0 + $0x78] sm:$0xff] }
  0x11   :  { %3964 = vmatmul.mubr.msk.f32.gmra.mxu0 %vm55_vm1, %v22_v15  ;;  %3988 = vmatmul.mubr.msk.f32.gmra.mxu1 %vm55_vm1, %v38_v16  ;;  %v46_v32 = vld [vmem:[%s6808_s0 + $0xf8] sm:$0xff]  ;;  %v4459_v33 = vld [vmem:[%s6810_s2] ss:$0 sm:$0xff]  ;;  %v4300_v15 = vmov 920167782  }
  0x12   :  { %3966 = vmatprep.mubr.msk.f32.mxu0 %vm55_vm1, %v23_v17  ;;  %3990 = vmatprep.mubr.msk.f32.mxu1 %vm55_vm1, %v39_v18 }
  0x15   :  { %3967 = vmatmul.mubr.msk.f32.gmra.mxu0 %vm55_vm1, %v24_v19  ;;  %3991 = vmatmul.mubr.msk.f32.gmra.mxu1 %vm55_vm1, %v40_v20 }
  0x16   :  { %3969 = vmatprep.mubr.msk.f32.mxu0 %vm55_vm1, %v25_v21  ;;  %3993 = vmatprep.mubr.msk.f32.mxu1 %vm55_vm1, %v41_v22  ;;  %v4301_v22 = vmov 1326507024  }
  0x19   :  { %3970 = vmatmul.mubr.msk.f32.gmra.mxu0 %vm55_vm1, %v26_v23  ;;  %3994 = vmatmul.mubr.msk.f32.gmra.mxu1 %vm55_vm1, %v42_v24 }
  0x1a   :  { %3972 = vmatprep.mubr.msk.f32.mxu0 %vm55_vm1, %v27_v25  ;;  %3996 = vmatprep.mubr.msk.f32.mxu1 %vm55_vm1, %v43_v26 }
  0x1d   :  { %3973 = vmatmul.mubr.msk.f32.gmra.mxu0 %vm55_vm1, %v28_v27  ;;  %3997 = vmatmul.mubr.msk.f32.gmra.mxu1 %vm55_vm1, %v44_v28 }
  0x1e   :  { %3975 = vmatprep.mubr.msk.f32.mxu0 %vm55_vm1, %v29_v29  ;;  %3999 = vmatprep.mubr.msk.f32.mxu1 %vm55_vm1, %v45_v30 }
  0x21   :  { %3976 = vmatmul.mubr.msk.f32.gmra.mxu0 %vm55_vm1, %v30_v31  ;;  %4000 = vmatmul.mubr.msk.f32.gmra.mxu1 %vm55_vm1, %v46_v32 }
  0xc5   :  { %v3956_v34 = vpop.f32.mrf.mxu0  ;;  %v3980_v35 = vpop.f32.mrf.mxu1 }
  0xc6   :  { %v4462_v36 = vadd.f32 %v3956_v34, %v4459_v33  ;;  %v4465_v37 = vadd.f32 %v3980_v35, %v4459_v33 }
  0xc7   :  { %v222_v38 = vpop.f32.mrf.mxu0  ;;  %v302_v57 = vpop.f32.mrf.mxu1 }
  0xc8   :  { %v485_v39 = vand.u32 2147483647, %v4462_v36  ;;  %v488_v40 = vand.u32 2139095040, %v4462_v36  ;;  %v2149_v41 = vand.u32 2147483647, %v4465_v37  ;;  %v2152_v42 = vand.u32 2139095040, %v4465_v37 }
  0xc9   :  { %v4474_v45 = vadd.f32 %v4459_v33, %v222_v38  ;;  %v4481_v63 = vadd.f32 %v4459_v33, %v302_v57  ;;  %vm487_vm15 = vcmp.lt.s32.totalorder %v4462_v36, 0 }
  0xca   :  { %v489_v43 = vshrl.u32 %v488_v40, 23  ;;  %v492_v44 = vand.u32 8388607, %v485_v39  ;;  %v2153_v46 = vshrl.u32 %v2152_v42, 23  ;;  %v2156_v47 = vand.u32 8388607, %v2149_v41 }
  0xcb   :  { %v384_v50 = vand.u32 2139095040, %v4474_v45  ;;  %v381_v55 = vand.u32 2147483647, %v4474_v45  ;;  %vm4586_vm0 = vcmp.le.f32.partialorder %v485_v39, 0.7853982 }
  0xcc   :  { %v3795_v48 = vadd.s32 4294967169, %v489_v43  ;;  %v3859_v49 = vadd.s32 4294967169, %v2153_v46  ;;  %v493_v51 = vor.u32 8388608, %v492_v44  ;;  %v2157_v53 = vor.u32 8388608, %v2156_v47 }
  0xcd   :  { %v385_v56 = vshrl.u32 %v384_v50, 23  ;;  %v4491_v3 = vand.u32 8388607, %v381_v55 }
  0xce   :  { %v495_v52 = vadd.s32 1, %v3795_v48  ;;  %v2159_v54 = vadd.s32 1, %v3859_v49  ;;  %v4483_v0 = vshll.u32 %v493_v51, 8  ;;  %v4487_v2 = vshll.u32 %v2157_v53, 8 }
  0xcf   :  { %v3791_v59 = vadd.s32 4294967169, %v385_v56 }
  0xd0   :  { %vm496_vm2 = vcmp.gt.s32.totalorder %v495_v52, 0  ;;  %vm2160_vm3 = vcmp.gt.s32.totalorder %v2159_v54, 0 }
  0xd1   :  { %v497_v58 = vsel %vm496_vm2, %v495_v52, 0  ;;  %v2161_v62 = vsel %vm2160_vm3, %v2159_v54, 0  ;;  %v4494_v8 = vadd.s32 1, %v3791_v59 }
  0xd2   :  { %v498_v60 = vshrl.u32 %v497_v58, 5  ;;  %v499_v61 = vand.u32 31, %v497_v58  ;;  %v4485_v1 = vshrl.u32 %v2161_v62, 5  ;;  %v2163_v7 = vand.u32 31, %v2161_v62 }
  0xd3   :  { %vm392_vm13 = vcmp.gt.s32.totalorder %v4494_v8, 0 }
  0xd4   :  { %v500_v4 = vsub.s32 32, %v499_v61  ;;  %v502_v6 = vshll.u32 %v4296_v5, %v499_v61  ;;  %v505_v10 = vshll.u32 %v4297_v9, %v499_v61  ;;  %v508_v12 = vshll.u32 %v4298_v11, %v499_v61 }
  0xd5   :  { %v511_v14 = vshll.u32 %v4299_v13, %v499_v61  ;;  %v514_v16 = vshll.u32 %v4300_v15, %v499_v61  ;;  %vm517_vm4 = vcmp.lt.s32.totalorder %v498_v60, 1  ;;  %vm518_vm5 = vcmp.lt.s32.totalorder %v498_v60, 2 }
  0xd6   :  { %v503_v17 = vshrl.u32 %v4297_v9, %v500_v4  ;;  %v506_v18 = vshrl.u32 %v4298_v11, %v500_v4  ;;  %v509_v19 = vshrl.u32 %v4299_v13, %v500_v4  ;;  %v501_v20 = vshrl.u32 %v4296_v5, %v500_v4 }
  0xd7   :  { %v512_v21 = vshrl.u32 %v4300_v15, %v500_v4  ;;  %v515_v23 = vshrl.u32 %v4301_v22, %v500_v4  ;;  %v2164_v27 = vsub.s32 32, %v2163_v7  ;;  %vm519_vm6 = vcmp.lt.s32.totalorder %v498_v60, 3 }
  0xd8   :  { %v504_v24 = vor.u32 %v503_v17, %v502_v6  ;;  %v507_v25 = vor.u32 %v506_v18, %v505_v10  ;;  %v510_v26 = vor.u32 %v509_v19, %v508_v12  ;;  %vm520_vm7 = vcmp.lt.s32.totalorder %v498_v60, 4 }
  0xd9   :  { %v513_v28 = vor.u32 %v512_v21, %v511_v14  ;;  %v516_v29 = vor.u32 %v515_v23, %v514_v16  ;;  %v2166_v42 = vshll.u32 %v4296_v5, %v2163_v7  ;;  %v2167_v46 = vshrl.u32 %v4297_v9, %v2164_v27 }
  0xda   :  { %v521_v30 = vsel %vm517_vm4, %v501_v20, %v504_v24  ;;  %v522_v31 = vsel %vm520_vm7, %v510_v26, 2102212464  ;;  %v525_v32 = vsel %vm517_vm4, %v504_v24, %v507_v25  ;;  %v529_v34 = vsel %vm517_vm4, %v507_v25, %v510_v26 }
  0xdb   :  { %v523_v35 = vsel %vm519_vm6, %v507_v25, %v522_v31  ;;  %v526_v38 = vsel %vm520_vm7, %v513_v28, 920167782  ;;  %v530_v40 = vsel %vm520_vm7, %v516_v29, 1326507024  ;;  %v2169_v47 = vshll.u32 %v4297_v9, %v2163_v7 }
  0xdc   :  { %v527_v43 = vsel %vm519_vm6, %v510_v26, %v526_v38  ;;  %v531_v44 = vsel %vm519_vm6, %v513_v28, %v530_v40  ;;  %v524_v48 = vsel %vm518_vm5, %v521_v30, %v523_v35  ;;  %v2170_v51 = vshrl.u32 %v4298_v11, %v2164_v27 }
  0xdd   :  { %v528_v49 = vsel %vm518_vm5, %v525_v32, %v527_v43  ;;  %v532_v50 = vsel %vm518_vm5, %v529_v34, %v531_v44  ;;  %v2168_v57 = vor.u32 %v2167_v46, %v2166_v42  ;;  %v2172_v59 = vshll.u32 %v4298_v11, %v2163_v7 }
  0xde   :  { %v4517_v52 = vmul.u32.u64.low %v4483_v0, %v532_v50  ;;  %v4518_v53 = vmul.u32.u64.high %v4483_v0, %v532_v50, %v4517_v52  ;;  %v4521_v54 = vmul.u32.u64.low %v4483_v0, %v528_v49  ;;  %v4522_v56 = vmul.u32.u64.high %v4483_v0, %v528_v49, %v4521_v54 }
  0xdf   :  { %v2171_v58 = vor.u32 %v2170_v51, %v2169_v47  ;;  %v2173_v61 = vshrl.u32 %v4299_v13, %v2164_v27  ;;  %v2165_v62 = vshrl.u32 %v4296_v5, %v2164_v27  ;;  %v2175_v60 = vshll.u32 %v4299_v13, %v2163_v7 }
  0xe0   :  { %v2176_v4 = vshrl.u32 %v4300_v15, %v2164_v27  ;;  %v2179_v6 = vshrl.u32 %v4301_v22, %v2164_v27  ;;  %v540_v10 = vmul.u32 %v4483_v0, %v524_v48  ;;  %v2178_v14 = vshll.u32 %v4300_v15, %v2163_v7 }
  0xe1   :  { %v2174_v12 = vor.u32 %v2173_v61, %v2172_v59  ;;  %vm2181_vm8 = vcmp.lt.s32.totalorder %v4485_v1, 1  ;;  %vm542_vm9 = vc.u32 %v4518_v53, %v4521_v54  ;;  %v543_v16 = vadd.s32 1, %v4522_v56 }
  0xe2   :  { %v2177_v17 = vor.u32 %v2176_v4, %v2175_v60  ;;  %vm2182_vm10 = vcmp.lt.s32.totalorder %v4485_v1, 2  ;;  %v2180_v18 = vor.u32 %v2179_v6, %v2178_v14  ;;  %vm2183_vm11 = vcmp.lt.s32.totalorder %v4485_v1, 3 }
  0xe3   :  { %vm2184_vm12 = vcmp.lt.s32.totalorder %v4485_v1, 4  ;;  %v2189_v19 = vsel %vm2181_vm8, %v2168_v57, %v2171_v58  ;;  %v544_v0 = vsel %vm542_vm9, %v543_v16, %v4522_v56  ;;  %v2193_v7 = vsel %vm2181_vm8, %v2171_v58, %v2174_v12 }
  0xe4   :  { %v2186_v20 = vsel %vm2184_vm12, %v2174_v12, 2102212464  ;;  %v2190_v21 = vsel %vm2184_vm12, %v2177_v17, 920167782  ;;  %v545_v23 = vadd.s32 %v544_v0, %v540_v10  ;;  %v2185_v24 = vsel %vm2181_vm8, %v2165_v62, %v2168_v57 }
  0xe5   :  { %v2191_v25 = vsel %vm2183_vm11, %v2174_v12, %v2190_v21  ;;  %v2194_v26 = vsel %vm2184_vm12, %v2180_v18, 1326507024  ;;  %v2187_v27 = vsel %vm2183_vm11, %v2171_v58, %v2186_v20  ;;  %v393_v40 = vsel %vm392_vm13, %v4494_v8, 0 }
  0xe6   :  { %v2192_v28 = vsel %vm2182_vm10, %v2189_v19, %v2191_v25  ;;  %v2195_v29 = vsel %vm2183_vm11, %v2177_v17, %v2194_v26  ;;  %v546_v30 = vadd.s32 536870912, %v545_v23  ;;  %v2188_v43 = vsel %vm2182_vm10, %v2185_v24, %v2187_v27 }
  0xe7   :  { %v2196_v31 = vsel %vm2182_vm10, %v2193_v7, %v2195_v29  ;;  %v4545_v32 = vmul.u32.u64.low %v4487_v2, %v2192_v28  ;;  %v4546_v34 = vmul.u32.u64.high %v4487_v2, %v2192_v28, %v4545_v32  ;;  %v395_v44 = vand.u32 31, %v393_v40 }
  0xe8   :  { %v4550_v35 = vmul.u32.u64.low %v4487_v2, %v2196_v31  ;;  %v4551_v38 = vmul.u32.u64.high %v4487_v2, %v2196_v31, %v4550_v35  ;;  %v547_v42 = vshrl.u32 %v546_v30, 30  ;;  %v2048_v46 = vand.u32 2139095040, %v4481_v63 }
  0xe9   :  { %v2207_v48 = vadd.s32 1, %v4546_v34  ;;  %v389_v49 = vor.u32 8388608, %v4491_v3  ;;  %v2204_v50 = vmul.u32 %v4487_v2, %v2188_v43  ;;  %v396_v51 = vsub.s32 32, %v395_v44 }
  0xea   :  { %v548_v47 = vshll.u32 %v547_v42, 30  ;;  %vm2206_vm14 = vc.u32 %v4551_v38, %v4545_v32  ;;  %v2049_v1 = vshrl.u32 %v2048_v46, 23  ;;  %v541_v57 = vadd.s32 %v4521_v54, %v4518_v53 }
  0xeb   :  { %v2208_v8 = vsel %vm2206_vm14, %v2207_v48, %v4546_v34  ;;  %v4568_v59 = vshll.u32 %v389_v49, 8  ;;  %v2045_v2 = vand.u32 2147483647, %v4481_v63  ;;  %v4571_v61 = vshrl.u32 %v393_v40, 5 }
  0xec   :  { %v4562_v52 = vsub.s32 %v545_v23, %v548_v47  ;;  %v2209_v56 = vadd.s32 %v2208_v8, %v2204_v50  ;;  %v399_v62 = vshrl.u32 %v4297_v9, %v396_v51  ;;  %v402_v60 = vshrl.u32 %v4298_v11, %v396_v51 }
  0xed   :  { %v405_v6 = vshrl.u32 %v4299_v13, %v396_v51  ;;  %v408_v10 = vshrl.u32 %v4300_v15, %v396_v51  ;;  %v4578_v53 = vadd.s32 4294967169, %v2049_v1  ;;  %v571_v54 = vsub.s32 4, %v547_v42 }
  0xee   :  { %v551_v58 = vsub.s32 0, %v4562_v52  ;;  %v2210_v3 = vadd.s32 536870912, %v2209_v56  ;;  %v398_v14 = vshll.u32 %v4296_v5, %v395_v44  ;;  %v401_v16 = vshll.u32 %v4297_v9, %v395_v44 }
  0xef   :  { %v404_v19 = vshll.u32 %v4298_v11, %v395_v44  ;;  %v407_v0 = vshll.u32 %v4299_v13, %v395_v44  ;;  %v411_v20 = vshrl.u32 %v4301_v22, %v396_v51  ;;  %v4596_v24 = vand.u32 8388607, %v2045_v2 }
  0xf0   :  { %v3796_v4 = vmin.u32 %v551_v58, %v4562_v52  ;;  %v4580_v12 = vshrl.u32 %v2210_v3, 30  ;;  %v400_v7 = vor.u32 %v399_v62, %v398_v14  ;;  %v403_v23 = vor.u32 %v402_v60, %v401_v16 }
  0xf1   :  { %v406_v39 = vor.u32 %v405_v6, %v404_v19  ;;  %v409_v26 = vor.u32 %v408_v10, %v407_v0  ;;  %v410_v27 = vshll.u32 %v4300_v15, %v395_v44  ;;  %v572_v28 = vsel %vm487_vm15, %v571_v54, %v547_v42 }
  0xf2   :  { %v553_v18 = vclz %v3796_v4  ;;  %v2212_v21 = vshll.u32 %v4580_v12, 30  ;;  %v397_v30 = vshrl.u32 %v4296_v5, %v396_v51  ;;  %vm413_vm1 = vcmp.lt.s32.totalorder %v4571_v61, 1 }
  0xf3   :  { %v412_v31 = vor.u32 %v411_v20, %v410_v27  ;;  %vm414_vm3 = vcmp.lt.s32.totalorder %v4571_v61, 2  ;;  %vm415_vm4 = vcmp.lt.s32.totalorder %v4571_v61, 3  ;;  %vm2151_vm5 = vcmp.lt.s32.totalorder %v4465_v37, 0 }
  0xf4   :  { %v3797_v25 = vadd.s32 4294967294, %v553_v18  ;;  %v4601_v29 = vsub.s32 %v2209_v56, %v2212_v21  ;;  %vm416_vm6 = vcmp.lt.s32.totalorder %v4571_v61, 4  ;;  %v421_v40 = vsel %vm413_vm1, %v400_v7, %v403_v23 }
  0xf5   :  { %v418_v44 = vsel %vm416_vm6, %v406_v39, 2102212464  ;;  %v422_v46 = vsel %vm416_vm6, %v409_v26, 920167782  ;;  %v425_v50 = vsel %vm413_vm1, %v403_v23, %v406_v39  ;;  %v426_v56 = vsel %vm416_vm6, %v412_v31, 1326507024 }
  0xf6   :  { %vm3798_vm2 = vcmp.lt.s32.totalorder %v3797_v25, 0  ;;  %v2215_v35 = vsub.s32 0, %v4601_v29  ;;  %v423_v49 = vsel %vm415_vm4, %v406_v39, %v422_v46  ;;  %v574_v58 = vsel %vm4586_vm0, 0, %v572_v28 }
  0xf7   :  { %v556_v34 = vsel %vm3798_vm2, 0, %v3797_v25  ;;  %v424_v1 = vsel %vm414_vm3, %v421_v40, %v423_v49  ;;  %vm4624_vm7 = vcmp.le.f32.partialorder %v2149_v41, 0.7853982  ;;  %v417_v62 = vsel %vm413_vm1, %v397_v30, %v400_v7 }
  0xf8   :  { %v557_v42 = vsub.s32 32, %v556_v34  ;;  %v561_v43 = vsub.s32 4294967266, %v556_v34  ;;  %v558_v47 = vshll.u32 %v4562_v52, %v556_v34  ;;  %v3860_v48 = vmin.u32 %v2215_v35, %v4601_v29 }
  0xf9   :  { %v2235_v6 = vsub.s32 4, %v4580_v12  ;;  %v427_v10 = vsel %vm415_vm4, %v409_v26, %v426_v56  ;;  %v4638_v14 = vmul.u32.u64.low %v4568_v59, %v424_v1  ;;  %v4639_v16 = vmul.u32.u64.high %v4568_v59, %v424_v1, %v4638_v14 }
  0xfa   :  { %v559_v51 = vshrl.u32 %v541_v57, %v557_v42  ;;  %v562_v8 = vadd.s32 127, %v561_v43  ;;  %v2217_v3 = vclz %v3860_v48  ;;  %v419_v57 = vsel %vm415_vm4, %v403_v23, %v418_v44  ;;  %v3959_v42 = vpop.f32.mrf.mxu0 }
  0xfb   :  { %v428_v41 = vsel %vm414_vm3, %v425_v50, %v427_v10  ;;  %v420_v19 = vsel %vm414_vm3, %v417_v62, %v419_v57  ;;  %v578_v21 = vadd.s32 3, %v574_v58  ;;  %v2205_v7 = vadd.s32 %v4545_v32, %v4551_v38 }
  0xfc   :  { %v560_v60 = vor.u32 %v559_v51, %v558_v47  ;;  %v563_v4 = vshll.u32 %v562_v8, 23  ;;  %v3861_v54 = vadd.s32 4294967294, %v2217_v3  ;;  %v2055_v23 = vadd.s32 1, %v4578_v53 }
  0xfd   :  { %v4645_v0 = vmul.u32.u64.low %v4568_v59, %v428_v41  ;;  %v4646_v20 = vmul.u32.u64.high %v4568_v59, %v428_v41, %v4645_v0  ;;  %v2236_v27 = vsel %vm2151_vm5, %v2235_v6, %v4580_v12  ;;  %v436_v30 = vmul.u32 %v4568_v59, %v420_v19 }
  0xfe   :  { %v564_v18 = vor.u32 4788187, %v563_v4  ;;  %vm3862_vm8 = vcmp.lt.s32.totalorder %v3861_v54, 0  ;;  %v567_v39 = vcvt.s32.f32 %v560_v60  ;;  %v439_v31 = vadd.s32 1, %v4639_v16 }
  0xff   :  { %v2220_v26 = vsel %vm3862_vm8, 0, %v3861_v54  ;;  %vm438_vm9 = vc.u32 %v4646_v20, %v4638_v14  ;;  %vm2056_vm10 = vcmp.gt.s32.totalorder %v2055_v23, 0  ;;  %v2238_v43 = vsel %vm4624_vm7, 0, %v2236_v27 }
 0x100   :  { %v565_v25 = vand.u32 2147483647, %v564_v18  ;;  %v2221_v61 = vsub.s32 32, %v2220_v26  ;;  %v2225_v28 = vsub.s32 4294967266, %v2220_v26  ;;  %v2222_v35 = vshll.u32 %v4601_v29, %v2220_v26 }
 0x101   :  { %v440_v53 = vsel %vm438_vm9, %v439_v31, %v4639_v16  ;;  %v2057_v40 = vsel %vm2056_vm10, %v2055_v23, 0  ;;  %v4665_v50 = vadd.f32 %v3959_v42, %v4459_v33  ;;  %v4670_v8 = vand.u32 3, %v578_v21 }
 0x102   :  { %v568_v34 = vmul.f32 %v567_v39, %v565_v25  ;;  %v2223_v32 = vshrl.u32 %v2205_v7, %v2221_v61  ;;  %v2226_v38 = vadd.s32 127, %v2225_v28  ;;  %v441_v59 = vadd.s32 %v440_v53, %v436_v30 }
 0x103   :  { %v2059_v44 = vand.u32 31, %v2057_v40  ;;  %v4672_v56 = vadd.s32 3, %v2238_v43  ;;  %v2053_v3 = vor.u32 8388608, %v4596_v24  ;;  %vm383_vm11 = vcmp.lt.s32.totalorder %v4474_v45, 0 }
 0x104   :  { %v569_v12 = vxor.u32 2147483648, %v568_v34  ;;  %v2224_v46 = vor.u32 %v2223_v32, %v2222_v35  ;;  %v2227_v47 = vshll.u32 %v2226_v38, 23  ;;  %v442_v48 = vadd.s32 536870912, %v441_v59 }
 0x105   :  { %v2060_v49 = vsub.s32 32, %v2059_v44  ;;  %v4678_v6 = vshrl.u32 %v2057_v40, 5  ;;  %v2062_v10 = vshll.u32 %v4296_v5, %v2059_v44  ;;  %v2065_v16 = vshll.u32 %v4297_v9, %v2059_v44 }
 0x106   :  { %v570_v29 = vsel %vm487_vm15, %v569_v12, %v568_v34  ;;  %v2228_v1 = vor.u32 4788187, %v2227_v47  ;;  %v443_v58 = vshrl.u32 %v442_v48, 30  ;;  %v2231_v60 = vcvt.s32.f32 %v2224_v46 }
 0x107   :  { %v573_v51 = vsel %vm4586_vm0, %v4462_v36, %v570_v29  ;;  %v2063_v62 = vshrl.u32 %v4297_v9, %v2060_v49  ;;  %v2066_v4 = vshrl.u32 %v4298_v11, %v2060_v49  ;;  %v2069_v54 = vshrl.u32 %v4299_v13, %v2060_v49 }
 0x108   :  { %4141 = vcosq.f32 %v573_v51  ;;  %v2229_v57 = vand.u32 2147483647, %v2228_v1  ;;  %v444_v17 = vshll.u32 %v443_v58, 30  ;;  %v2071_v24 = vshll.u32 %v4299_v13, %v2059_v44 }
 0x109   :  { %4143 = vsinq.f32 %v573_v51  ;;  %v2072_v18 = vshrl.u32 %v4300_v15, %v2060_v49  ;;  %v2064_v0 = vor.u32 %v2063_v62, %v2062_v10  ;;  %v2068_v21 = vshll.u32 %v4298_v11, %v2059_v44 }
 0x10a   :  { %v2232_v41 = vmul.f32 %v2231_v60, %v2229_v57  ;;  %v4685_v19 = vsub.s32 %v441_v59, %v444_v17  ;;  %v696_v7 = vand.u32 2139095040, %v4665_v50  ;;  %v2067_v25 = vor.u32 %v2066_v4, %v2065_v16 }
 0x10b   :  { %v2073_v39 = vor.u32 %v2072_v18, %v2071_v24  ;;  %v2075_v26 = vshrl.u32 %v4301_v22, %v2060_v49  ;;  %v437_v27 = vadd.s32 %v4638_v14, %v4646_v20  ;;  %v2070_v28 = vor.u32 %v2069_v54, %v2068_v21 }
 0x10c   :  { %v2233_v23 = vxor.u32 2147483648, %v2232_v41  ;;  %v447_v61 = vsub.s32 0, %v4685_v19  ;;  %v2074_v30 = vshll.u32 %v4300_v15, %v2059_v44  ;;  %vm584_vm12 = vcmp.eq.s32.totalorder %v4670_v8, 2 }
 0x10d   :  { %v467_v34 = vsub.s32 4, %v443_v58  ;;  %vm2077_vm13 = vcmp.lt.s32.totalorder %v4678_v6, 1  ;;  %v2093_v35 = vshll.u32 %v2053_v3, 8  ;;  %vm581_vm14 = vcmp.eq.s32.totalorder %v4670_v8, 0 }
 0x10e   :  { %v2234_v31 = vsel %vm2151_vm5, %v2233_v23, %v2232_v41  ;;  %v3792_v20 = vmin.u32 %v447_v61, %v4685_v19  ;;  %v2076_v32 = vor.u32 %v2075_v26, %v2074_v30  ;;  %vm2080_vm15 = vcmp.lt.s32.totalorder %v4678_v6, 4 }
 0x10f   :  { %v2237_v14 = vsel %vm4624_vm7, %v4465_v37, %v2234_v31  ;;  %vm580_vm0 = vcmp.lt.s32.totalorder %v4670_v8, 2  ;;  %v2061_v38 = vshrl.u32 %v4296_v5, %v2060_v49  ;;  %v2085_v53 = vsel %vm2077_vm13, %v2064_v0, %v2067_v25 }
 0x110   :  { %4145 = vcosq.f32 %v2237_v14  ;;  %v2086_v40 = vsel %vm2080_vm15, %v2073_v39, 920167782  ;;  %vm577_vm1 = vweird.f32 %v4462_v36  ;;  %vm4713_vm2 = vcmp.le.f32.partialorder %v381_v55, 0.7853982 }
 0x111   :  { %4147 = vsinq.f32 %v2237_v14  ;;  %v449_v42 = vclz %v3792_v20  ;;  %vm2079_vm3 = vcmp.lt.s32.totalorder %v4678_v6, 3  ;;  %v2082_v12 = vsel %vm2080_vm15, %v2070_v28, 2102212464 }
 0x112   :  { %v468_v43 = vsel %vm383_vm11, %v467_v34, %v443_v58  ;;  %vm2078_vm4 = vcmp.lt.s32.totalorder %v4678_v6, 2  ;;  %v2087_v59 = vsel %vm2079_vm3, %v2070_v28, %v2086_v40  ;;  %v2089_v44 = vsel %vm2077_vm13, %v2067_v25, %v2070_v28 }
 0x113   :  { %v3793_v46 = vadd.s32 4294967294, %v449_v42  ;;  %v2081_v55 = vsel %vm2077_vm13, %v2061_v38, %v2064_v0  ;;  %v2088_v47 = vsel %vm2078_vm4, %v2085_v53, %v2087_v59  ;;  %v2090_v29 = vsel %vm2080_vm15, %v2076_v32, 1326507024 }
 0x114   :  { %v2083_v49 = vsel %vm2079_vm3, %v2067_v25, %v2082_v12  ;;  %v2091_v51 = vsel %vm2079_vm3, %v2073_v39, %v2090_v29  ;;  %v4731_v1 = vmul.u32.u64.low %v2093_v35, %v2088_v47  ;;  %v4732_v58 = vmul.u32.u64.high %v2093_v35, %v2088_v47, %v4731_v1 }
 0x115   :  { %v4142_v48 = vpop.eup %4141  ;;  %vm3794_vm5 = vcmp.lt.s32.totalorder %v3793_v46, 0  ;;  %v2092_v57 = vsel %vm2078_vm4, %v2089_v44, %v2091_v51  ;;  %v697_v60 = vshrl.u32 %v696_v7, 23  ;;  %v2084_v18 = vsel %vm2078_vm4, %v2081_v55, %v2083_v49 }
 0x116   :  { %v4144_v3 = vpop.eup %4143  ;;  %v585_v62 = vxor.u32 2147483648, %v4142_v48  ;;  %v452_v17 = vsel %vm3794_vm5, 0, %v3793_v46  ;;  %v4737_v10 = vmul.u32.u64.low %v2093_v35, %v2092_v57  ;;  %v4738_v54 = vmul.u32.u64.high %v2093_v35, %v2092_v57, %v4737_v10 }
 0x117   :  { %v582_v4 = vxor.u32 2147483648, %v4144_v3  ;;  %v453_v16 = vsub.s32 32, %v452_v17  ;;  %v457_v24 = vsub.s32 4294967266, %v452_v17  ;;  %v2243_v21 = vand.u32 3, %v4672_v56  ;;  %v3983_v56 = vpop.f32.mrf.mxu1 }
 0x118   :  { %v586_v41 = vsel %vm584_vm12, %v585_v62, %v4144_v3  ;;  %v2103_v7 = vadd.s32 1, %v4732_v58  ;;  %v3803_v23 = vadd.s32 4294967169, %v697_v60  ;;  %v454_v39 = vshll.u32 %v4685_v19, %v452_v17 }
 0x119   :  { %v583_v0 = vsel %vm581_vm14, %v4142_v48, %v582_v4  ;;  %v455_v26 = vshrl.u32 %v437_v27, %v453_v16  ;;  %v458_v61 = vadd.s32 127, %v457_v24  ;;  %v470_v6 = vsel %vm4713_vm2, 0, %v468_v43 }
 0x11a   :  { %v587_v25 = vsel %vm580_vm0, %v583_v0, %v586_v41  ;;  %v2100_v30 = vmul.u32 %v2093_v35, %v2084_v18  ;;  %vm2102_vm6 = vc.u32 %v4738_v54, %v4731_v1  ;;  %v703_v14 = vadd.s32 1, %v3803_v23 }
 0x11b   :  { %v588_v28 = vsel %vm577_vm1, nan, %v587_v25  ;;  %v456_v31 = vor.u32 %v455_v26, %v454_v39  ;;  %v459_v34 = vshll.u32 %v458_v61, 23  ;;  %v2104_v8 = vsel %vm2102_vm6, %v2103_v7, %v4732_v58 }
 0x11c   :  { %3710 = vst [vmem:[#allocation2 + $0x8] sm:$0xff] %v588_v28  ;;  %v2105_v19 = vadd.s32 %v2104_v8, %v2100_v30  ;;  %v693_v27 = vand.u32 2147483647, %v4665_v50  ;;  %vm2248_vm7 = vcmp.eq.s32.totalorder %v2243_v21, 2  ;;  %vm704_vm8 = vcmp.gt.s32.totalorder %v703_v14, 0 }
 0x11d   :  { %v4146_v20 = vpop.eup %4145  ;;  %v460_v36 = vor.u32 4788187, %v459_v34  ;;  %v4760_v32 = vadd.f32 %v3983_v56, %v4459_v33  ;;  %v474_v53 = vadd.s32 3, %v470_v6  ;;  %v705_v42 = vsel %vm704_vm8, %v703_v14, 0 }
 0x11e   :  { %v4148_v35 = vpop.eup %4147  ;;  %v2249_v38 = vxor.u32 2147483648, %v4146_v20  ;;  %v2106_v40 = vadd.s32 536870912, %v2105_v19  ;;  %v463_v59 = vcvt.s32.f32 %v456_v31  ;;  %v707_v44 = vand.u32 31, %v705_v42 }
 0x11f   :  { %v2246_v12 = vxor.u32 2147483648, %v4148_v35  ;;  %v461_v43 = vand.u32 2147483647, %v460_v36  ;;  %vm2245_vm9 = vcmp.eq.s32.totalorder %v2243_v21, 0  ;;  %v700_v47 = vand.u32 8388607, %v693_v27 }
 0x120   :  { %v2250_v46 = vsel %vm2248_vm7, %v2249_v38, %v4148_v35  ;;  %v4762_v55 = vshrl.u32 %v2106_v40, 30  ;;  %vm2244_vm10 = vcmp.lt.s32.totalorder %v2243_v21, 2  ;;  %v708_v49 = vsub.s32 32, %v707_v44 }
 0x121   :  { %v2247_v29 = vsel %vm2245_vm9, %v4146_v20, %v2246_v12  ;;  %v464_v48 = vmul.f32 %v463_v59, %v461_v43  ;;  %vm2241_vm12 = vweird.f32 %v4465_v37  ;;  %v4768_v57 = vand.u32 3, %v474_v53 }
 0x122   :  { %v2251_v51 = vsel %vm2244_vm10, %v2247_v29, %v2250_v46  ;;  %v2108_v58 = vshll.u32 %v4762_v55, 30  ;;  %v711_v60 = vshrl.u32 %v4297_v9, %v708_v49  ;;  %v701_v17 = vor.u32 8388608, %v700_v47 }
 0x123   :  { %v2252_v3 = vsel %vm2241_vm12, nan, %v2251_v51  ;;  %v465_v62 = vxor.u32 2147483648, %v464_v48  ;;  %v714_v10 = vshrl.u32 %v4298_v11, %v708_v49  ;;  %v2360_v41 = vand.u32 2139095040, %v4760_v32 }
 0x124   :  { %3726 = vst [vmem:[#allocation2 + $0x88] sm:$0xff] %v2252_v3  ;;  %v4771_v4 = vsub.s32 %v2105_v19, %v2108_v58  ;;  %v706_v16 = vshrl.u32 %v705_v42, 5  ;;  %v710_v24 = vshll.u32 %v4296_v5, %v707_v44  ;;  %v717_v18 = vshrl.u32 %v4299_v13, %v708_v49 }
 0x125   :  { %v466_v37 = vsel %vm383_vm11, %v465_v62, %v464_v48  ;;  %v713_v7 = vshll.u32 %v4297_v9, %v707_v44  ;;  %v716_v23 = vshll.u32 %v4298_v11, %v707_v44  ;;  %v719_v39 = vshll.u32 %v4299_v13, %v707_v44 }
 0x126   :  { %v469_v0 = vsel %vm4713_vm2, %v4474_v45, %v466_v37  ;;  %v2111_v21 = vsub.s32 0, %v4771_v4  ;;  %v712_v25 = vor.u32 %v711_v60, %v710_v24  ;;  %v720_v26 = vshrl.u32 %v4300_v15, %v708_v49 }
 0x127   :  { %4149 = vcosq.f32 %v469_v0  ;;  %v715_v28 = vor.u32 %v714_v10, %v713_v7  ;;  %v718_v6 = vor.u32 %v717_v18, %v716_v23  ;;  %v722_v52 = vshll.u32 %v4300_v15, %v707_v44 }
 0x128   :  { %4151 = vsinq.f32 %v469_v0  ;;  %v3856_v61 = vmin.u32 %v2111_v21, %v4771_v4  ;;  %v721_v30 = vor.u32 %v720_v26, %v719_v39  ;;  %v723_v56 = vshrl.u32 %v4301_v22, %v708_v49 }
 0x129   :  { %v741_v31 = vshll.u32 %v701_v17, 8  ;;  %v709_v8 = vshrl.u32 %v4296_v5, %v708_v49  ;;  %vm725_vm11 = vcmp.lt.s32.totalorder %v706_v16, 1  ;;  %v2361_v14 = vshrl.u32 %v2360_v41, 23 }
 0x12a   :  { %v2113_v34 = vclz %v3856_v61  ;;  %vm2047_vm13 = vcmp.lt.s32.totalorder %v4481_v63, 0  ;;  %v724_v19 = vor.u32 %v723_v56, %v722_v52  ;;  %vm726_vm14 = vcmp.lt.s32.totalorder %v706_v16, 2 }
 0x12b   :  { %vm727_vm15 = vcmp.lt.s32.totalorder %v706_v16, 3  ;;  %vm728_vm0 = vcmp.lt.s32.totalorder %v706_v16, 4  ;;  %v733_v35 = vsel %vm725_vm11, %v712_v25, %v715_v28  ;;  %v729_v53 = vsel %vm725_vm11, %v709_v8, %v712_v25 }
 0x12c   :  { %v3857_v20 = vadd.s32 4294967294, %v2113_v34  ;;  %v730_v36 = vsel %vm728_vm0, %v718_v6, 2102212464  ;;  %v734_v38 = vsel %vm728_vm0, %v721_v30, 920167782  ;;  %v737_v42 = vsel %vm725_vm11, %v715_v28, %v718_v6 }
 0x12d   :  { %v735_v40 = vsel %vm727_vm15, %v718_v6, %v734_v38  ;;  %v738_v12 = vsel %vm728_vm0, %v724_v19, 1326507024  ;;  %vm4794_vm1 = vcmp.le.f32.partialorder %v2045_v2, 0.7853982  ;;  %v731_v59 = vsel %vm727_vm15, %v715_v28, %v730_v36 }
 0x12e   :  { %vm3858_vm2 = vcmp.lt.s32.totalorder %v3857_v20, 0  ;;  %v736_v44 = vsel %vm726_vm14, %v733_v35, %v735_v40  ;;  %v739_v46 = vsel %vm727_vm15, %v721_v30, %v738_v12  ;;  %v2101_v51 = vadd.s32 %v4731_v1, %v4738_v54 }
 0x12f   :  { %v2116_v47 = vsel %vm3858_vm2, 0, %v3857_v20  ;;  %v740_v29 = vsel %vm726_vm14, %v737_v42, %v739_v46  ;;  %v4800_v48 = vmul.u32.u64.low %v741_v31, %v736_v44  ;;  %v4801_v49 = vmul.u32.u64.high %v741_v31, %v736_v44, %v4800_v48 }
 0x130   :  { %v2117_v58 = vsub.s32 32, %v2116_v47  ;;  %v2121_v2 = vsub.s32 4294967266, %v2116_v47  ;;  %v2131_v3 = vsub.s32 4, %v4762_v55  ;;  %v2357_v17 = vand.u32 2147483647, %v4760_v32 }
 0x131   :  { %v4807_v62 = vmul.u32.u64.low %v741_v31, %v740_v29  ;;  %v4808_v60 = vmul.u32.u64.high %v741_v31, %v740_v29, %v4807_v62  ;;  %v3867_v10 = vadd.s32 4294967169, %v2361_v14  ;;  %v2118_v41 = vshll.u32 %v4771_v4, %v2116_v47  ;;  %v232_v14 = vpop.f32.mrf.mxu0 }
 0x132   :  { %v2119_v37 = vshrl.u32 %v2101_v51, %v2117_v58  ;;  %v2122_v24 = vadd.s32 127, %v2121_v2  ;;  %v732_v18 = vsel %vm726_vm14, %v729_v53, %v731_v59  ;;  %vm476_vm3 = vcmp.lt.s32.totalorder %v4768_v57, 2 }
 0x133   :  { %vm477_vm4 = vcmp.eq.s32.totalorder %v4768_v57, 0  ;;  %v751_v1 = vadd.s32 1, %v4801_v49  ;;  %v2367_v54 = vadd.s32 1, %v3867_v10  ;;  %vm480_vm5 = vcmp.eq.s32.totalorder %v4768_v57, 2 }
 0x134   :  { %v4150_v0 = vpop.eup %4149  ;;  %v2120_v21 = vor.u32 %v2119_v37, %v2118_v41  ;;  %v2123_v7 = vshll.u32 %v2122_v24, 23  ;;  %v2132_v4 = vsel %vm2047_vm13, %v2131_v3, %v4762_v55  ;;  %v748_v16 = vmul.u32 %v741_v31, %v732_v18 }
 0x135   :  { %v4152_v23 = vpop.eup %4151  ;;  %v481_v25 = vxor.u32 2147483648, %v4150_v0  ;;  %vm750_vm6 = vc.u32 %v4808_v60, %v4800_v48  ;;  %vm2368_vm7 = vcmp.gt.s32.totalorder %v2367_v54, 0  ;;  %v2364_v28 = vand.u32 8388607, %v2357_v17 }
 0x136   :  { %v478_v39 = vxor.u32 2147483648, %v4152_v23  ;;  %v2124_v26 = vor.u32 4788187, %v2123_v7  ;;  %v752_v61 = vsel %vm750_vm6, %v751_v1, %v4801_v49  ;;  %v2134_v30 = vsel %vm4794_vm1, 0, %v2132_v4 }
 0x137   :  { %v482_v6 = vsel %vm480_vm5, %v481_v25, %v4152_v23  ;;  %v753_v52 = vadd.s32 %v752_v61, %v748_v16  ;;  %v2369_v55 = vsel %vm2368_vm7, %v2367_v54, 0  ;;  %v2127_v34 = vcvt.s32.f32 %v2120_v21 }
 0x138   :  { %v479_v56 = vsel %vm477_vm4, %v4150_v0, %v478_v39  ;;  %v2125_v31 = vand.u32 2147483647, %v2124_v26  ;;  %v2371_v8 = vand.u32 31, %v2369_v55  ;;  %vm473_vm8 = vweird.f32 %v4474_v45 }
 0x139   :  { %v483_v19 = vsel %vm476_vm3, %v479_v56, %v482_v6  ;;  %v754_v20 = vadd.s32 536870912, %v753_v52  ;;  %v2138_v38 = vadd.s32 3, %v2134_v30  ;;  %v2365_v42 = vor.u32 8388608, %v2364_v28 }
 0x13a   :  { %v484_v36 = vsel %vm473_vm8, nan, %v483_v19  ;;  %v2128_v35 = vmul.f32 %v2127_v34, %v2125_v31  ;;  %v2372_v53 = vsub.s32 32, %v2371_v8  ;;  %v2374_v12 = vshll.u32 %v4296_v5, %v2371_v8 }
 0x13b   :  { %3709 = vst [vmem:[#allocation2] sm:$0xff] %v484_v36  ;;  %v4832_v40 = vshrl.u32 %v754_v20, 30  ;;  %v4836_v59 = vadd.f32 %v4459_v33, %v232_v14  ;;  %v2377_v57 = vshll.u32 %v4297_v9, %v2371_v8  ;;  %v2380_v29 = vshll.u32 %v4298_v11, %v2371_v8 }
 0x13c   :  { %v2129_v44 = vxor.u32 2147483648, %v2128_v35  ;;  %v2375_v45 = vshrl.u32 %v4297_v9, %v2372_v53  ;;  %v2378_v46 = vshrl.u32 %v4298_v11, %v2372_v53  ;;  %v2381_v49 = vshrl.u32 %v4299_v13, %v2372_v53 }
 0x13d   :  { %v756_v47 = vshll.u32 %v4832_v40, 30  ;;  %v2384_v51 = vshrl.u32 %v4300_v15, %v2372_v53  ;;  %v2370_v33 = vshrl.u32 %v2369_v55, 5  ;;  %v2383_v3 = vshll.u32 %v4299_v13, %v2371_v8 }
 0x13e   :  { %v2130_v58 = vsel %vm2047_vm13, %v2129_v44, %v2128_v35  ;;  %v2376_v2 = vor.u32 %v2375_v45, %v2374_v12  ;;  %v2379_v41 = vor.u32 %v2378_v46, %v2377_v57  ;;  %v2382_v37 = vor.u32 %v2381_v49, %v2380_v29 }
 0x13f   :  { %v2133_v62 = vsel %vm4794_vm1, %v4481_v63, %v2130_v58  ;;  %v4851_v10 = vsub.s32 %v753_v52, %v756_v47  ;;  %v2385_v24 = vor.u32 %v2384_v51, %v2383_v3  ;;  %v2386_v18 = vshll.u32 %v4300_v15, %v2371_v8 }
 0x140   :  { %4153 = vcosq.f32 %v2133_v62  ;;  %v2387_v1 = vshrl.u32 %v4301_v22, %v2372_v53  ;;  %v4855_v54 = vand.u32 3, %v2138_v38  ;;  %vm695_vm9 = vcmp.lt.s32.totalorder %v4665_v50, 0 }
 0x141   :  { %4155 = vsinq.f32 %v2133_v62  ;;  %v759_v0 = vsub.s32 0, %v4851_v10  ;;  %vm2392_vm10 = vcmp.lt.s32.totalorder %v2370_v33, 4  ;;  %v2405_v43 = vshll.u32 %v2365_v42, 8 }
 0x142   :  { %v2388_v21 = vor.u32 %v2387_v1, %v2386_v18  ;;  %v592_v7 = vand.u32 2139095040, %v4836_v59  ;;  %v2373_v23 = vshrl.u32 %v4296_v5, %v2372_v53  ;;  %vm2389_vm12 = vcmp.lt.s32.totalorder %v2370_v33, 1 }
 0x143   :  { %v3804_v4 = vmin.u32 %v759_v0, %v4851_v10  ;;  %v2394_v25 = vsel %vm2392_vm10, %v2382_v37, 2102212464  ;;  %vm2390_vm11 = vcmp.lt.s32.totalorder %v2370_v33, 2  ;;  %v2397_v16 = vsel %vm2389_vm12, %v2376_v2, %v2379_v41 }
 0x144   :  { %v2398_v39 = vsel %vm2392_vm10, %v2385_v24, 920167782  ;;  %v589_v26 = vand.u32 2147483647, %v4836_v59  ;;  %vm2391_vm13 = vcmp.lt.s32.totalorder %v2370_v33, 3  ;;  %v2393_v28 = vsel %vm2389_vm12, %v2373_v23, %v2376_v2 }
 0x145   :  { %v761_v61 = vclz %v3804_v4  ;;  %v2401_v6 = vsel %vm2389_vm12, %v2379_v41, %v2382_v37  ;;  %v2395_v30 = vsel %vm2391_vm13, %v2379_v41, %v2394_v25  ;;  %v2399_v52 = vsel %vm2391_vm13, %v2382_v37, %v2398_v39 }
 0x146   :  { %v2402_v55 = vsel %vm2392_vm10, %v2388_v21, 1326507024  ;;  %v593_v56 = vshrl.u32 %v592_v7, 23  ;;  %v779_v34 = vsub.s32 4, %v4832_v40  ;;  %v2400_v8 = vsel %vm2390_vm11, %v2397_v16, %v2399_v52 }
 0x147   :  { %v3805_v31 = vadd.s32 4294967294, %v761_v61  ;;  %v2403_v14 = vsel %vm2391_vm13, %v2385_v24, %v2402_v55  ;;  %v4869_v20 = vmul.u32.u64.low %v2405_v43, %v2400_v8  ;;  %v4870_v36 = vmul.u32.u64.high %v2405_v43, %v2400_v8, %v4869_v20 }
 0x148   :  { %v2404_v19 = vsel %vm2390_vm11, %v2401_v6, %v2403_v14  ;;  %v3799_v35 = vadd.s32 4294967169, %v593_v56  ;;  %v2396_v38 = vsel %vm2390_vm11, %v2393_v28, %v2395_v30  ;;  %vm2137_vm15 = vweird.f32 %v4481_v63 }
 0x149   :  { %vm3806_vm14 = vcmp.lt.s32.totalorder %v3805_v31, 0  ;;  %v4874_v53 = vmul.u32.u64.low %v2405_v43, %v2404_v19  ;;  %v4875_v42 = vmul.u32.u64.high %v2405_v43, %v2404_v19, %v4874_v53  ;;  %vm2144_vm0 = vcmp.eq.s32.totalorder %v4855_v54, 2 }
 0x14a   :  { %vm4881_vm1 = vcmp.le.f32.partialorder %v693_v27, 0.7853982  ;;  %v764_v44 = vsel %vm3806_vm14, 0, %v3805_v31  ;;  %v599_v45 = vadd.s32 1, %v3799_v35  ;;  %v749_v57 = vadd.s32 %v4800_v48, %v4808_v60  ;;  %v312_v48 = vpop.f32.mrf.mxu1 }
 0x14b   :  { %v765_v46 = vsub.s32 32, %v764_v44  ;;  %v769_v47 = vsub.s32 4294967266, %v764_v44  ;;  %v780_v29 = vsel %vm695_vm9, %v779_v34, %v4832_v40  ;;  %v2412_v49 = vmul.u32 %v2405_v43, %v2396_v38  ;;  %v4905_v43 = vld [vmem:[%s6810_s2] ss:$0 sm:$0xff] }
 0x14c   :  { %v2415_v51 = vadd.s32 1, %v4870_v36  ;;  %v596_v27 = vand.u32 8388607, %v589_v26  ;;  %vm600_vm2 = vcmp.gt.s32.totalorder %v599_v45, 0  ;;  %v766_v33 = vshll.u32 %v4851_v10, %v764_v44 }
 0x14d   :  { %v4154_v58 = vpop.eup %4153  ;;  %v767_v2 = vshrl.u32 %v749_v57, %v765_v46  ;;  %v770_v3 = vadd.s32 127, %v769_v47  ;;  %vm2414_vm3 = vc.u32 %v4875_v42, %v4869_v20  ;;  %v782_v40 = vsel %vm4881_vm1, 0, %v780_v29 }
 0x14e   :  { %v4156_v60 = vpop.eup %4155  ;;  %v2145_v62 = vxor.u32 2147483648, %v4154_v58  ;;  %v2416_v41 = vsel %vm2414_vm3, %v2415_v51, %v4870_v36  ;;  %v601_v37 = vsel %vm600_vm2, %v599_v45, 0  ;;  %vm2141_vm4 = vcmp.eq.s32.totalorder %v4855_v54, 0 }
 0x14f   :  { %v2142_v24 = vxor.u32 2147483648, %v4156_v60  ;;  %v768_v18 = vor.u32 %v767_v2, %v766_v33  ;;  %v771_v1 = vshll.u32 %v770_v3, 23  ;;  %v2417_v0 = vadd.s32 %v2416_v41, %v2412_v49 }
 0x150   :  { %v2146_v10 = vsel %vm2144_vm0, %v2145_v62, %v4156_v60  ;;  %v603_v21 = vand.u32 31, %v601_v37  ;;  %v4908_v7 = vadd.f32 %v4905_v43, %v312_v48  ;;  %vm2140_vm5 = vcmp.lt.s32.totalorder %v4855_v54, 2 }
 0x151   :  { %v2143_v4 = vsel %vm2141_vm4, %v4154_v58, %v2142_v24  ;;  %v772_v23 = vor.u32 4788187, %v771_v1  ;;  %v2418_v25 = vadd.s32 536870912, %v2417_v0  ;;  %v4911_v39 = vadd.s32 3, %v782_v40 }
 0x152   :  { %v2147_v16 = vsel %vm2140_vm5, %v2143_v4, %v2146_v10  ;;  %v597_v61 = vor.u32 8388608, %v596_v27  ;;  %v604_v28 = vsub.s32 32, %v603_v21  ;;  %v775_v52 = vcvt.s32.f32 %v768_v18 }
 0x153   :  { %v2148_v6 = vsel %vm2137_vm15, nan, %v2147_v16  ;;  %v773_v30 = vand.u32 2147483647, %v772_v23  ;;  %v4915_v55 = vshrl.u32 %v2418_v25, 30  ;;  %v2256_v34 = vand.u32 2139095040, %v4908_v7 }
 0x154   :  { %3725 = vst [vmem:[#allocation2 + $0x80] sm:$0xff] %v2148_v6  ;;  %v607_v56 = vshrl.u32 %v4297_v9, %v604_v28  ;;  %v610_v54 = vshrl.u32 %v4298_v11, %v604_v28  ;;  %v613_v31 = vshrl.u32 %v4299_v13, %v604_v28  ;;  %v606_v19 = vshll.u32 %v4296_v5, %v603_v21 }
 0x155   :  { %v776_v8 = vmul.f32 %v775_v52, %v773_v30  ;;  %v2420_v14 = vshll.u32 %v4915_v55, 30  ;;  %v609_v63 = vshll.u32 %v4297_v9, %v603_v21  ;;  %v602_v36 = vshrl.u32 %v601_v37, 5 }
 0x156   :  { %v612_v35 = vshll.u32 %v4298_v11, %v603_v21  ;;  %v615_v38 = vshll.u32 %v4299_v13, %v603_v21  ;;  %v616_v53 = vshrl.u32 %v4300_v15, %v604_v28  ;;  %v608_v57 = vor.u32 %v607_v56, %v606_v19 }
 0x157   :  { %v777_v44 = vxor.u32 2147483648, %v776_v8  ;;  %v4927_v45 = vsub.s32 %v2417_v0, %v2420_v14  ;;  %v611_v46 = vor.u32 %v610_v54, %v609_v63  ;;  %v618_v49 = vshll.u32 %v4300_v15, %v603_v21 }
 0x158   :  { %v614_v47 = vor.u32 %v613_v31, %v612_v35  ;;  %v617_v29 = vor.u32 %v616_v53, %v615_v38  ;;  %v619_v51 = vshrl.u32 %v4301_v22, %v604_v28  ;;  %v637_v33 = vshll.u32 %v597_v61, 8 }
 0x159   :  { %v778_v27 = vsel %vm695_vm9, %v777_v44, %v776_v8  ;;  %v2423_v58 = vsub.s32 0, %v4927_v45  ;;  %v2253_v2 = vand.u32 2147483647, %v4908_v7  ;;  %v605_v48 = vshrl.u32 %v4296_v5, %v604_v28 }
 0x15a   :  { %v781_v3 = vsel %vm4881_vm1, %v4665_v50, %v778_v27  ;;  %v620_v60 = vor.u32 %v619_v51, %v618_v49  ;;  %v2257_v62 = vshrl.u32 %v2256_v34, 23  ;;  %vm621_vm6 = vcmp.lt.s32.totalorder %v602_v36, 1 }
 0x15b   :  { %4157 = vcosq.f32 %v781_v3  ;;  %v3868_v40 = vmin.u32 %v2423_v58, %v4927_v45  ;;  %vm624_vm7 = vcmp.lt.s32.totalorder %v602_v36, 4  ;;  %v629_v37 = vsel %vm621_vm6, %v608_v57, %v611_v46 }
 0x15c   :  { %4159 = vsinq.f32 %v781_v3  ;;  %v626_v41 = vsel %vm624_vm7, %v614_v47, 2102212464  ;;  %v630_v24 = vsel %vm624_vm7, %v617_v29, 920167782  ;;  %vm622_vm8 = vcmp.lt.s32.totalorder %v602_v36, 2 }
 0x15d   :  { %v2425_v18 = vclz %v3868_v40  ;;  %vm623_vm9 = vcmp.lt.s32.totalorder %v602_v36, 3  ;;  %v625_v1 = vsel %vm621_vm6, %v605_v48, %v608_v57  ;;  %v633_v10 = vsel %vm621_vm6, %v611_v46, %v614_v47  ;;  %v3962_v48 = vpop.f32.mrf.mxu0 }
 0x15e   :  { %v627_v0 = vsel %vm623_vm9, %v611_v46, %v626_v41  ;;  %v631_v12 = vsel %vm623_vm9, %v614_v47, %v630_v24  ;;  %v634_v21 = vsel %vm624_vm7, %v620_v60, 1326507024  ;;  %v2443_v23 = vsub.s32 4, %v4915_v55 }
 0x15f   :  { %v3869_v4 = vadd.s32 4294967294, %v2425_v18  ;;  %v632_v25 = vsel %vm622_vm8, %v629_v37, %v631_v12  ;;  %v635_v16 = vsel %vm623_vm9, %v617_v29, %v634_v21  ;;  %v628_v61 = vsel %vm622_vm8, %v625_v1, %v627_v0 }
 0x160   :  { %v636_v28 = vsel %vm622_vm8, %v633_v10, %v635_v16  ;;  %v4941_v6 = vmul.u32.u64.low %v637_v33, %v632_v25  ;;  %v4942_v30 = vmul.u32.u64.high %v637_v33, %v632_v25, %v4941_v6  ;;  %v3863_v54 = vadd.s32 4294967169, %v2257_v62 }
 0x161   :  { %vm3870_vm10 = vcmp.lt.s32.totalorder %v3869_v4, 0  ;;  %v4944_v52 = vmul.u32.u64.low %v637_v33, %v636_v28  ;;  %v4945_v56 = vmul.u32.u64.high %v637_v33, %v636_v28, %v4944_v52  ;;  %vm4949_vm12 = vcmp.le.f32.partialorder %v2357_v17, 0.7853982 }
 0x162   :  { %vm2359_vm11 = vcmp.lt.s32.totalorder %v4760_v32, 0  ;;  %v2413_v34 = vadd.s32 %v4869_v20, %v4875_v42  ;;  %v2428_v8 = vsel %vm3870_vm10, 0, %v3869_v4  ;;  %v2263_v36 = vadd.s32 1, %v3863_v54 }
 0x163   :  { %v2429_v14 = vsub.s32 32, %v2428_v8  ;;  %v2433_v19 = vsub.s32 4294967266, %v2428_v8  ;;  %v2444_v63 = vsel %vm2359_vm11, %v2443_v23, %v4915_v55  ;;  %v787_v35 = vand.u32 3, %v4911_v39 }
 0x164   :  { %v644_v38 = vmul.u32 %v637_v33, %v628_v61  ;;  %v647_v17 = vadd.s32 1, %v4942_v30  ;;  %v2260_v53 = vand.u32 8388607, %v2253_v2  ;;  %v2430_v44 = vshll.u32 %v4927_v45, %v2428_v8 }
 0x165   :  { %v2431_v57 = vshrl.u32 %v2413_v34, %v2429_v14  ;;  %v2434_v20 = vadd.s32 127, %v2433_v19  ;;  %vm646_vm13 = vc.u32 %v4945_v56, %v4941_v6  ;;  %v2446_v42 = vsel %vm4949_vm12, 0, %v2444_v63 }
 0x166   :  { %v648_v55 = vsel %vm646_vm13, %v647_v17, %v4942_v30  ;;  %vm2264_vm14 = vcmp.gt.s32.totalorder %v2263_v36, 0  ;;  %vm785_vm15 = vweird.f32 %v4665_v50  ;;  %vm788_vm0 = vcmp.lt.s32.totalorder %v787_v35, 2 }
 0x167   :  { %v2432_v46 = vor.u32 %v2431_v57, %v2430_v44  ;;  %v2435_v39 = vshll.u32 %v2434_v20, 23  ;;  %v649_v47 = vadd.s32 %v648_v55, %v644_v38  ;;  %v2265_v29 = vsel %vm2264_vm14, %v2263_v36, 0 }
 0x168   :  { %v4158_v49 = vpop.eup %4157  ;;  %vm789_vm1 = vcmp.eq.s32.totalorder %v787_v35, 0  ;;  %v2267_v45 = vand.u32 31, %v2265_v29  ;;  %v2261_v3 = vor.u32 8388608, %v2260_v53  ;;  %vm792_vm2 = vcmp.eq.s32.totalorder %v787_v35, 2 }
 0x169   :  { %v4160_v51 = vpop.eup %4159  ;;  %v793_v27 = vxor.u32 2147483648, %v4158_v49  ;;  %v2436_v58 = vor.u32 4788187, %v2435_v39  ;;  %v650_v33 = vadd.s32 536870912, %v649_v47  ;;  %v4969_v62 = vadd.s32 3, %v2446_v42 }
 0x16a   :  { %v790_v60 = vxor.u32 2147483648, %v4160_v51  ;;  %v2268_v40 = vsub.s32 32, %v2267_v45  ;;  %v2439_v24 = vcvt.s32.f32 %v2432_v46  ;;  %v4973_v0 = vadd.s32 %v4941_v6, %v4945_v56 }
 0x16b   :  { %v794_v41 = vsel %vm792_vm2, %v793_v27, %v4160_v51  ;;  %v2437_v37 = vand.u32 2147483647, %v2436_v58  ;;  %v651_v18 = vshrl.u32 %v650_v33, 30  ;;  %v4977_v10 = vadd.f32 %v4905_v43, %v3962_v48 }
 0x16c   :  { %v791_v1 = vsel %vm789_vm1, %v4158_v49, %v790_v60  ;;  %v2271_v12 = vshrl.u32 %v4297_v9, %v2268_v40  ;;  %v4980_v25 = vshll.u32 %v2261_v3, 8  ;;  %v2270_v61 = vshll.u32 %v4296_v5, %v2267_v45 }
 0x16d   :  { %v795_v21 = vsel %vm788_vm0, %v791_v1, %v794_v41  ;;  %v2440_v4 = vmul.f32 %v2439_v24, %v2437_v37  ;;  %v652_v23 = vshll.u32 %v651_v18, 30  ;;  %v2274_v28 = vshrl.u32 %v4298_v11, %v2268_v40 }
 0x16e   :  { %v796_v16 = vsel %vm785_vm15, nan, %v795_v21  ;;  %v2277_v6 = vshrl.u32 %v4299_v13, %v2268_v40  ;;  %v2266_v56 = vshrl.u32 %v2265_v29, 5  ;;  %v2273_v54 = vshll.u32 %v4297_v9, %v2267_v45 }
 0x16f   :  { %3712 = vst [vmem:[#allocation2 + $0x18] sm:$0xff] %v796_v16  ;;  %v2441_v30 = vxor.u32 2147483648, %v2440_v4  ;;  %v4987_v52 = vsub.s32 %v649_v47, %v652_v23  ;;  %v2272_v34 = vor.u32 %v2271_v12, %v2270_v61  ;;  %v2276_v8 = vshll.u32 %v4298_v11, %v2267_v45 }
 0x170   :  { %v2279_v14 = vshll.u32 %v4299_v13, %v2267_v45  ;;  %v2280_v50 = vshrl.u32 %v4300_v15, %v2268_v40  ;;  %vm591_vm3 = vcmp.lt.s32.totalorder %v4836_v59, 0  ;;  %v2282_v36 = vshll.u32 %v4300_v15, %v2267_v45 }
 0x171   :  { %v2442_v19 = vsel %vm2359_vm11, %v2441_v30, %v2440_v4  ;;  %v655_v63 = vsub.s32 0, %v4987_v52  ;;  %v2283_v35 = vshrl.u32 %v4301_v22, %v2268_v40  ;;  %v2275_v17 = vor.u32 %v2274_v28, %v2273_v54 }
 0x172   :  { %v2445_v38 = vsel %vm4949_vm12, %v4760_v32, %v2442_v19  ;;  %v2278_v53 = vor.u32 %v2277_v6, %v2276_v8  ;;  %v2281_v44 = vor.u32 %v2280_v50, %v2279_v14  ;;  %v904_v42 = vand.u32 2139095040, %v4977_v10 }
 0x173   :  { %4161 = vcosq.f32 %v2445_v38  ;;  %v3800_v57 = vmin.u32 %v655_v63, %v4987_v52  ;;  %v2284_v20 = vor.u32 %v2283_v35, %v2282_v36  ;;  %v675_v55 = vsub.s32 4, %v651_v18 }
 0x174   :  { %4163 = vsinq.f32 %v2445_v38  ;;  %v2269_v46 = vshrl.u32 %v4296_v5, %v2268_v40  ;;  %vm2285_vm4 = vcmp.lt.s32.totalorder %v2266_v56, 1  ;;  %vm2286_vm5 = vcmp.lt.s32.totalorder %v2266_v56, 2 }
 0x175   :  { %v657_v39 = vclz %v3800_v57  ;;  %vm2287_vm6 = vcmp.lt.s32.totalorder %v2266_v56, 3  ;;  %vm2288_vm7 = vcmp.lt.s32.totalorder %v2266_v56, 4  ;;  %v2293_v47 = vsel %vm2285_vm4, %v2272_v34, %v2275_v17 }
 0x176   :  { %v2290_v31 = vsel %vm2288_vm7, %v2278_v53, 2102212464  ;;  %v2294_v29 = vsel %vm2288_vm7, %v2281_v44, 920167782  ;;  %v2297_v49 = vsel %vm2285_vm4, %v2275_v17, %v2278_v53  ;;  %v2289_v51 = vsel %vm2285_vm4, %v2269_v46, %v2272_v34  ;;  %v3986_v46 = vpop.f32.mrf.mxu1 }
 0x177   :  { %v3801_v45 = vadd.s32 4294967294, %v657_v39  ;;  %v2295_v27 = vsel %vm2287_vm6, %v2278_v53, %v2294_v29  ;;  %v2298_v58 = vsel %vm2288_vm7, %v2284_v20, 1326507024  ;;  %v2291_v33 = vsel %vm2287_vm6, %v2275_v17, %v2290_v31 }
 0x178   :  { %v2296_v3 = vsel %vm2286_vm5, %v2293_v47, %v2295_v27  ;;  %v2299_v48 = vsel %vm2287_vm6, %v2281_v44, %v2298_v58  ;;  %v905_v60 = vshrl.u32 %v904_v42, 23  ;;  %v676_v1 = vsel %vm591_vm3, %v675_v55, %v651_v18 }
 0x179   :  { %vm3802_vm8 = vcmp.lt.s32.totalorder %v3801_v45, 0  ;;  %v2300_v40 = vsel %vm2286_vm5, %v2297_v49, %v2299_v48  ;;  %v5008_v41 = vmul.u32.u64.low %v4980_v25, %v2296_v3  ;;  %v5009_v37 = vmul.u32.u64.high %v4980_v25, %v2296_v3, %v5008_v41 }
 0x17a   :  { %v660_v24 = vsel %vm3802_vm8, 0, %v3801_v45  ;;  %v5015_v12 = vmul.u32.u64.low %v4980_v25, %v2300_v40  ;;  %v5016_v21 = vmul.u32.u64.high %v4980_v25, %v2300_v40, %v5015_v12  ;;  %v2292_v16 = vsel %vm2286_vm5, %v2289_v51, %v2291_v33 }
 0x17b   :  { %v661_v4 = vsub.s32 32, %v660_v24  ;;  %v665_v23 = vsub.s32 4294967266, %v660_v24  ;;  %v3811_v61 = vadd.s32 4294967169, %v905_v60  ;;  %vm5021_vm9 = vcmp.le.f32.partialorder %v589_v26, 0.7853982 }
 0x17c   :  { %v662_v6 = vshll.u32 %v4987_v52, %v660_v24  ;;  %v901_v30 = vand.u32 2147483647, %v4977_v10  ;;  %v2311_v34 = vadd.s32 1, %v5009_v37  ;;  %v2451_v56 = vand.u32 3, %v4969_v62 }
 0x17d   :  { %v663_v18 = vshrl.u32 %v4973_v0, %v661_v4  ;;  %v666_v54 = vadd.s32 127, %v665_v23  ;;  %v911_v8 = vadd.s32 1, %v3811_v61  ;;  %v678_v14 = vsel %vm5021_vm9, 0, %v676_v1 }
 0x17e   :  { %v2308_v26 = vmul.u32 %v4980_v25, %v2292_v16  ;;  %vm2310_vm10 = vc.u32 %v5016_v21, %v5008_v41  ;;  %vm2449_vm11 = vweird.f32 %v4760_v32  ;;  %v682_v17 = vadd.s32 3, %v678_v14 }
 0x17f   :  { %v664_v50 = vor.u32 %v663_v18, %v662_v6  ;;  %v667_v52 = vshll.u32 %v666_v54, 23  ;;  %v2312_v19 = vsel %vm2310_vm10, %v2311_v34, %v5009_v37  ;;  %vm912_vm12 = vcmp.gt.s32.totalorder %v911_v8, 0 }
 0x180   :  { %v4162_v0 = vpop.eup %4161  ;;  %v2313_v63 = vadd.s32 %v2312_v19, %v2308_v26  ;;  %v913_v36 = vsel %vm912_vm12, %v911_v8, 0  ;;  %v908_v25 = vand.u32 8388607, %v901_v30  ;;  %vm2456_vm13 = vcmp.eq.s32.totalorder %v2451_v56, 2 }
 0x181   :  { %v4164_v35 = vpop.eup %4163  ;;  %v2457_v62 = vxor.u32 2147483648, %v4162_v0  ;;  %v668_v38 = vor.u32 4788187, %v667_v52  ;;  %v915_v57 = vand.u32 31, %v913_v36  ;;  %vm2453_vm14 = vcmp.eq.s32.totalorder %v2451_v56, 0 }
 0x182   :  { %v2454_v53 = vxor.u32 2147483648, %v4164_v35  ;;  %v2314_v44 = vadd.s32 536870912, %v2313_v63  ;;  %v671_v55 = vcvt.s32.f32 %v664_v50  ;;  %vm2452_vm15 = vcmp.lt.s32.totalorder %v2451_v56, 2 }
 0x183   :  { %v2458_v20 = vsel %vm2456_vm13, %v2457_v62, %v4164_v35  ;;  %v669_v42 = vand.u32 2147483647, %v668_v38  ;;  %v916_v47 = vsub.s32 32, %v915_v57  ;;  %v5041_v45 = vand.u32 3, %v682_v17 }
 0x184   :  { %v2455_v39 = vsel %vm2453_vm14, %v4162_v0, %v2454_v53  ;;  %v5039_v31 = vshrl.u32 %v2314_v44, 30  ;;  %v909_v51 = vor.u32 8388608, %v908_v25  ;;  %v918_v33 = vshll.u32 %v4296_v5, %v915_v57 }
 0x185   :  { %v2459_v29 = vsel %vm2452_vm15, %v2455_v39, %v2458_v20  ;;  %v672_v49 = vmul.f32 %v671_v55, %v669_v42  ;;  %v5048_v3 = vadd.f32 %v4905_v43, %v3986_v46  ;;  %v919_v60 = vshrl.u32 %v4297_v9, %v916_v47 }
 0x186   :  { %v2460_v27 = vsel %vm2449_vm11, nan, %v2459_v29  ;;  %v2316_v58 = vshll.u32 %v5039_v31, 30  ;;  %v922_v40 = vshrl.u32 %v4298_v11, %v916_v47  ;;  %v925_v37 = vshrl.u32 %v4299_v13, %v916_v47 }
 0x187   :  { %3728 = vst [vmem:[#allocation2 + $0x98] sm:$0xff] %v2460_v27  ;;  %v673_v48 = vxor.u32 2147483648, %v672_v49  ;;  %v921_v32 = vshll.u32 %v4297_v9, %v915_v57  ;;  %v924_v1 = vshll.u32 %v4298_v11, %v915_v57  ;;  %v928_v12 = vshrl.u32 %v4300_v15, %v916_v47 }
 0x188   :  { %v5053_v24 = vsub.s32 %v2313_v63, %v2316_v58  ;;  %v914_v23 = vshrl.u32 %v913_v36, 5  ;;  %v920_v16 = vor.u32 %v919_v60, %v918_v33  ;;  %v927_v61 = vshll.u32 %v4299_v13, %v915_v57 }
 0x189   :  { %v674_v4 = vsel %vm591_vm3, %v673_v48, %v672_v49  ;;  %v923_v54 = vor.u32 %v922_v40, %v921_v32  ;;  %v926_v34 = vor.u32 %v925_v37, %v924_v1  ;;  %v930_v56 = vshll.u32 %v4300_v15, %v915_v57 }
 0x18a   :  { %v677_v6 = vsel %vm5021_vm9, %v4836_v59, %v674_v4  ;;  %v2319_v18 = vsub.s32 0, %v5053_v24  ;;  %v929_v8 = vor.u32 %v928_v12, %v927_v61  ;;  %v931_v14 = vshrl.u32 %v4301_v22, %v916_v47 }
 0x18b   :  { %4165 = vcosq.f32 %v677_v6  ;;  %v949_v50 = vshll.u32 %v909_v51, 8  ;;  %v2568_v52 = vand.u32 2139095040, %v5048_v3  ;;  %v917_v19 = vshrl.u32 %v4296_v5, %v916_v47 }
 0x18c   :  { %4167 = vsinq.f32 %v677_v6  ;;  %v3864_v26 = vmin.u32 %v2319_v18, %v5053_v24  ;;  %v932_v28 = vor.u32 %v931_v14, %v930_v56  ;;  %vm933_vm0 = vcmp.lt.s32.totalorder %v914_v23, 1 }
 0x18d   :  { %vm934_vm1 = vcmp.lt.s32.totalorder %v914_v23, 2  ;;  %vm935_vm2 = vcmp.lt.s32.totalorder %v914_v23, 3  ;;  %vm936_vm3 = vcmp.lt.s32.totalorder %v914_v23, 4  ;;  %v941_v63 = vsel %vm933_vm0, %v920_v16, %v923_v54 }
 0x18e   :  { %v2321_v0 = vclz %v3864_v26  ;;  %v938_v36 = vsel %vm936_vm3, %v926_v34, 2102212464  ;;  %v942_v35 = vsel %vm936_vm3, %v929_v8, 920167782  ;;  %v945_v62 = vsel %vm933_vm0, %v923_v54, %v926_v34 }
 0x18f   :  { %v946_v38 = vsel %vm936_vm3, %v932_v28, 1326507024  ;;  %v2339_v25 = vsub.s32 4, %v5039_v31  ;;  %v943_v53 = vsel %vm935_vm2, %v926_v34, %v942_v35  ;;  %v937_v57 = vsel %vm933_vm0, %v917_v19, %v920_v16 }
 0x190   :  { %v3865_v17 = vadd.s32 4294967294, %v2321_v0  ;;  %v947_v44 = vsel %vm935_vm2, %v929_v8, %v946_v38  ;;  %v944_v20 = vsel %vm934_vm1, %v941_v63, %v943_v53  ;;  %v2569_v55 = vshrl.u32 %v2568_v52, 23 }
 0x191   :  { %v948_v42 = vsel %vm934_vm1, %v945_v62, %v947_v44  ;;  %v939_v46 = vsel %vm935_vm2, %v923_v54, %v938_v36  ;;  %v5079_v49 = vmul.u32.u64.low %v949_v50, %v944_v20  ;;  %v5080_v51 = vmul.u32.u64.high %v949_v50, %v944_v20, %v5079_v49 }
 0x192   :  { %vm3866_vm4 = vcmp.lt.s32.totalorder %v3865_v17, 0  ;;  %v5076_v39 = vmul.u32.u64.low %v949_v50, %v948_v42  ;;  %v5077_v47 = vmul.u32.u64.high %v949_v50, %v948_v42, %v5076_v39  ;;  %v3875_v27 = vadd.s32 4294967169, %v2569_v55 }
 0x193   :  { %v2324_v29 = vsel %vm3866_vm4, 0, %v3865_v17  ;;  %vm5085_vm5 = vcmp.le.f32.partialorder %v2253_v2, 0.7853982  ;;  %v2309_v33 = vadd.s32 %v5008_v41, %v5016_v21  ;;  %vm681_vm6 = vweird.f32 %v4836_v59 }
 0x194   :  { %v2325_v48 = vsub.s32 32, %v2324_v29  ;;  %v2329_v60 = vsub.s32 4294967266, %v2324_v29  ;;  %vm684_vm7 = vcmp.lt.s32.totalorder %v5041_v45, 2  ;;  %vm2255_vm8 = vcmp.lt.s32.totalorder %v4908_v7, 0 }
 0x195   :  { %v940_v40 = vsel %vm934_vm1, %v937_v57, %v939_v46  ;;  %v2575_v37 = vadd.s32 1, %v3875_v27  ;;  %v2326_v32 = vshll.u32 %v5053_v24, %v2324_v29  ;;  %vm958_vm9 = vc.u32 %v5077_v47, %v5079_v49  ;;  %v242_v24 = vpop.f32.mrf.mxu0 }
 0x196   :  { %v2327_v2 = vshrl.u32 %v2309_v33, %v2325_v48  ;;  %v2330_v1 = vadd.s32 127, %v2329_v60  ;;  %vm685_vm10 = vcmp.eq.s32.totalorder %v5041_v45, 0  ;;  %v2340_v41 = vsel %vm2255_vm8, %v2339_v25, %v5039_v31 }
 0x197   :  { %v959_v21 = vadd.s32 1, %v5080_v51  ;;  %vm2576_vm12 = vcmp.gt.s32.totalorder %v2575_v37, 0  ;;  %v956_v16 = vmul.u32 %v949_v50, %v940_v40  ;;  %v2565_v34 = vand.u32 2147483647, %v5048_v3 }
 0x198   :  { %v4166_v12 = vpop.eup %4165  ;;  %v2328_v4 = vor.u32 %v2327_v2, %v2326_v32  ;;  %v2331_v23 = vshll.u32 %v2330_v1, 23  ;;  %v2577_v61 = vsel %vm2576_vm12, %v2575_v37, 0  ;;  %vm688_vm11 = vcmp.eq.s32.totalorder %v5041_v45, 2 }
 0x199   :  { %v4168_v6 = vpop.eup %4167  ;;  %v689_v18 = vxor.u32 2147483648, %v4166_v12  ;;  %v960_v54 = vsel %vm958_vm9, %v959_v21, %v5080_v51  ;;  %v2579_v8 = vand.u32 31, %v2577_v61  ;;  %v2342_v52 = vsel %vm5085_vm5, 0, %v2340_v41 }
 0x19a   :  { %v686_v56 = vxor.u32 2147483648, %v4168_v6  ;;  %v2332_v31 = vor.u32 4788187, %v2331_v23  ;;  %v961_v14 = vadd.s32 %v960_v54, %v956_v16  ;;  %v5109_v50 = vadd.f32 %v4905_v43, %v242_v24 }
 0x19b   :  { %v690_v26 = vsel %vm688_vm11, %v689_v18, %v4168_v6  ;;  %v2580_v19 = vsub.s32 32, %v2579_v8  ;;  %v2335_v63 = vcvt.s32.f32 %v2328_v4  ;;  %v2572_v62 = vand.u32 8388607, %v2565_v34 }
 0x19c   :  { %v687_v28 = vsel %vm685_vm10, %v4166_v12, %v686_v56  ;;  %v2333_v0 = vand.u32 2147483647, %v2332_v31  ;;  %v962_v36 = vadd.s32 536870912, %v961_v14  ;;  %v2578_v20 = vshrl.u32 %v2577_v61, 5 }
 0x19d   :  { %v691_v35 = vsel %vm684_vm7, %v687_v28, %v690_v26  ;;  %v2583_v38 = vshrl.u32 %v4297_v9, %v2580_v19  ;;  %v2586_v17 = vshrl.u32 %v4298_v11, %v2580_v19  ;;  %v2589_v57 = vshrl.u32 %v4299_v13, %v2580_v19 }
 0x19e   :  { %v692_v25 = vsel %vm681_vm6, nan, %v691_v35  ;;  %v2336_v53 = vmul.f32 %v2335_v63, %v2333_v0  ;;  %v963_v44 = vshrl.u32 %v962_v36, 30  ;;  %v2582_v42 = vshll.u32 %v4296_v5, %v2579_v8 }
 0x19f   :  { %3711 = vst [vmem:[#allocation2 + $0x10] sm:$0xff] %v692_v25  ;;  %v2588_v45 = vshll.u32 %v4298_v11, %v2579_v8  ;;  %v2592_v55 = vshrl.u32 %v4300_v15, %v2580_v19  ;;  %v2585_v29 = vshll.u32 %v4297_v9, %v2579_v8  ;;  %v2591_v51 = vshll.u32 %v4299_v13, %v2579_v8 }
 0x1a0   :  { %v2337_v46 = vxor.u32 2147483648, %v2336_v53  ;;  %v964_v39 = vshll.u32 %v963_v44, 30  ;;  %v2584_v59 = vor.u32 %v2583_v38, %v2582_v42  ;;  %v2594_v33 = vshll.u32 %v4300_v15, %v2579_v8 }
 0x1a1   :  { %v2590_v27 = vor.u32 %v2589_v57, %v2588_v45  ;;  %v2595_v48 = vshrl.u32 %v4301_v22, %v2580_v19  ;;  %v2587_v37 = vor.u32 %v2586_v17, %v2585_v29  ;;  %v2593_v32 = vor.u32 %v2592_v55, %v2591_v51 }
 0x1a2   :  { %v2338_v60 = vsel %vm2255_vm8, %v2337_v46, %v2336_v53  ;;  %v5131_v40 = vsub.s32 %v961_v14, %v964_v39  ;;  %v2346_v1 = vadd.s32 3, %v2342_v52  ;;  %v2573_v41 = vor.u32 8388608, %v2572_v62 }
 0x1a3   :  { %v2341_v2 = vsel %vm5085_vm5, %v4908_v7, %v2338_v60  ;;  %v2596_v21 = vor.u32 %v2595_v48, %v2594_v33  ;;  %vm2600_vm13 = vcmp.lt.s32.totalorder %v2578_v20, 4  ;;  %v800_v4 = vand.u32 2139095040, %v5109_v50 }
 0x1a4   :  { %4169 = vcosq.f32 %v2341_v2  ;;  %v967_v12 = vsub.s32 0, %v5131_v40  ;;  %v2581_v23 = vshrl.u32 %v4296_v5, %v2580_v19  ;;  %vm2597_vm14 = vcmp.lt.s32.totalorder %v2578_v20, 1 }
 0x1a5   :  { %4171 = vsinq.f32 %v2341_v2  ;;  %v2602_v16 = vsel %vm2600_vm13, %v2590_v27, 2102212464  ;;  %vm2599_vm15 = vcmp.lt.s32.totalorder %v2578_v20, 3  ;;  %v2605_v24 = vsel %vm2597_vm14, %v2584_v59, %v2587_v37 }
 0x1a6   :  { %v3812_v61 = vmin.u32 %v967_v12, %v5131_v40  ;;  %v2606_v58 = vsel %vm2600_vm13, %v2593_v32, 920167782  ;;  %v987_v6 = vsub.s32 4, %v963_v44  ;;  %v2609_v54 = vsel %vm2597_vm14, %v2587_v37, %v2590_v27 }
 0x1a7   :  { %v2607_v18 = vsel %vm2599_vm15, %v2590_v27, %v2606_v58  ;;  %v2610_v8 = vsel %vm2600_vm13, %v2596_v21, 1326507024  ;;  %vm2598_vm0 = vcmp.lt.s32.totalorder %v2578_v20, 2  ;;  %v2601_v31 = vsel %vm2597_vm14, %v2581_v23, %v2584_v59 }
 0x1a8   :  { %v969_v56 = vclz %v3812_v61  ;;  %v2603_v14 = vsel %vm2599_vm15, %v2587_v37, %v2602_v16  ;;  %v2608_v26 = vsel %vm2598_vm0, %v2605_v24, %v2607_v18  ;;  %v2611_v52 = vsel %vm2599_vm15, %v2593_v32, %v2610_v8  ;;  %v322_v8 = vpop.f32.mrf.mxu1 }
 0x1a9   :  { %v2613_v28 = vshll.u32 %v2573_v41, 8  ;;  %v801_v0 = vshrl.u32 %v800_v4, 23  ;;  %vm903_vm1 = vcmp.lt.s32.totalorder %v4977_v10, 0  ;;  %v2612_v63 = vsel %vm2598_vm0, %v2609_v54, %v2611_v52 }
 0x1aa   :  { %v3813_v19 = vadd.s32 4294967294, %v969_v56  ;;  %v988_v17 = vsel %vm903_vm1, %v987_v6, %v963_v44  ;;  %v2604_v25 = vsel %vm2598_vm0, %v2601_v31, %v2603_v14  ;;  %v2347_v57 = vand.u32 3, %v2346_v1 }
 0x1ab   :  { %v5141_v36 = vmul.u32.u64.low %v2613_v28, %v2612_v63  ;;  %v5142_v35 = vmul.u32.u64.high %v2613_v28, %v2612_v63, %v5141_v36  ;;  %v5144_v62 = vmul.u32.u64.low %v2613_v28, %v2608_v26  ;;  %v5145_v38 = vmul.u32.u64.high %v2613_v28, %v2608_v26, %v5144_v62 }
 0x1ac   :  { %vm3814_vm2 = vcmp.lt.s32.totalorder %v3813_v19, 0  ;;  %v3807_v53 = vadd.s32 4294967169, %v801_v0  ;;  %vm5152_vm3 = vcmp.le.f32.partialorder %v901_v30, 0.7853982  ;;  %v797_v45 = vand.u32 2147483647, %v5109_v50 }
 0x1ad   :  { %v972_v42 = vsel %vm3814_vm2, 0, %v3813_v19  ;;  %v957_v55 = vadd.s32 %v5079_v49, %v5077_v47  ;;  %v990_v44 = vsel %vm5152_vm3, 0, %v988_v17  ;;  %v2620_v51 = vmul.u32 %v2613_v28, %v2604_v25 }
 0x1ae   :  { %v973_v46 = vsub.s32 32, %v972_v42  ;;  %v977_v39 = vsub.s32 4294967266, %v972_v42  ;;  %v807_v29 = vadd.s32 1, %v3807_v53  ;;  %vm2622_vm4 = vc.u32 %v5142_v35, %v5144_v62 }
 0x1af   :  { %v2623_v30 = vadd.s32 1, %v5145_v38  ;;  %v974_v59 = vshll.u32 %v5131_v40, %v972_v42  ;;  %vm2352_vm6 = vcmp.eq.s32.totalorder %v2347_v57, 2  ;;  %v994_v21 = vadd.s32 3, %v990_v44 }
 0x1b0   :  { %v975_v27 = vshrl.u32 %v957_v55, %v973_v46  ;;  %v978_v33 = vadd.s32 127, %v977_v39  ;;  %vm808_vm5 = vcmp.gt.s32.totalorder %v807_v29, 0  ;;  %v804_v12 = vand.u32 8388607, %v797_v45 }
 0x1b1   :  { %v4170_v48 = vpop.eup %4169  ;;  %v2624_v47 = vsel %vm2622_vm4, %v2623_v30, %v5145_v38  ;;  %v809_v49 = vsel %vm808_vm5, %v807_v29, 0  ;;  %vm2349_vm7 = vcmp.eq.s32.totalorder %v2347_v57, 0  ;;  %vm2345_vm8 = vweird.f32 %v4908_v7 }
 0x1b2   :  { %v4172_v60 = vpop.eup %4171  ;;  %v2353_v37 = vxor.u32 2147483648, %v4170_v48  ;;  %v976_v32 = vor.u32 %v975_v27, %v974_v59  ;;  %v979_v2 = vshll.u32 %v978_v33, 23  ;;  %v2625_v1 = vadd.s32 %v2624_v47, %v2620_v51 }
 0x1b3   :  { %v2350_v41 = vxor.u32 2147483648, %v4172_v60  ;;  %v811_v4 = vand.u32 31, %v809_v49  ;;  %vm2348_vm9 = vcmp.lt.s32.totalorder %v2347_v57, 2  ;;  %v5171_v31 = vand.u32 3, %v994_v21 }
 0x1b4   :  { %v2354_v40 = vsel %vm2352_vm6, %v2353_v37, %v4172_v60  ;;  %v980_v23 = vor.u32 4788187, %v979_v2  ;;  %v2626_v16 = vadd.s32 536870912, %v2625_v1  ;;  %v983_v18 = vcvt.s32.f32 %v976_v32 }
 0x1b5   :  { %v2351_v61 = vsel %vm2349_vm7, %v4170_v48, %v2350_v41  ;;  %v812_v24 = vsub.s32 32, %v811_v4  ;;  %v805_v14 = vor.u32 8388608, %v804_v12  ;;  %v810_v0 = vshrl.u32 %v809_v49, 5 }
 0x1b6   :  { %v2355_v58 = vsel %vm2348_vm9, %v2351_v61, %v2354_v40  ;;  %v981_v6 = vand.u32 2147483647, %v980_v23  ;;  %v5169_v54 = vshrl.u32 %v2626_v16, 30  ;;  %v5179_v36 = vadd.f32 %v4905_v43, %v322_v8 }
 0x1b7   :  { %v2356_v56 = vsel %vm2345_vm8, nan, %v2355_v58  ;;  %v815_v28 = vshrl.u32 %v4297_v9, %v812_v24  ;;  %v818_v7 = vshrl.u32 %v4298_v11, %v812_v24  ;;  %v821_v19 = vshrl.u32 %v4299_v13, %v812_v24 }
 0x1b8   :  { %3727 = vst [vmem:[#allocation2 + $0x90] sm:$0xff] %v2356_v56  ;;  %v984_v26 = vmul.f32 %v983_v18, %v981_v6  ;;  %v2628_v52 = vshll.u32 %v5169_v54, 30  ;;  %v824_v63 = vshrl.u32 %v4300_v15, %v812_v24  ;;  %v814_v25 = vshll.u32 %v4296_v5, %v811_v4 }
 0x1b9   :  { %v817_v53 = vshll.u32 %v4297_v9, %v811_v4  ;;  %v820_v57 = vshll.u32 %v4298_v11, %v811_v4  ;;  %v823_v42 = vshll.u32 %v4299_v13, %v811_v4  ;;  %v826_v55 = vshll.u32 %v4300_v15, %v811_v4 }
 0x1ba   :  { %v985_v38 = vxor.u32 2147483648, %v984_v26  ;;  %v5181_v17 = vsub.s32 %v2625_v1, %v2628_v52  ;;  %v827_v46 = vshrl.u32 %v4301_v22, %v812_v24  ;;  %v816_v29 = vor.u32 %v815_v28, %v814_v25 }
 0x1bb   :  { %v819_v44 = vor.u32 %v818_v7, %v817_v53  ;;  %vm2567_vm10 = vcmp.lt.s32.totalorder %v5048_v3, 0  ;;  %v822_v30 = vor.u32 %v821_v19, %v820_v57  ;;  %v825_v59 = vor.u32 %v824_v63, %v823_v42 }
 0x1bc   :  { %v986_v39 = vsel %vm903_vm1, %v985_v38, %v984_v26  ;;  %v2631_v43 = vsub.s32 0, %v5181_v17  ;;  %v828_v27 = vor.u32 %v827_v46, %v826_v55  ;;  %v845_v48 = vshll.u32 %v805_v14, 8 }
 0x1bd   :  { %v989_v51 = vsel %vm5152_vm3, %v4977_v10, %v986_v39  ;;  %v2464_v47 = vand.u32 2139095040, %v5179_v36  ;;  %v2651_v49 = vsub.s32 4, %v5169_v54  ;;  %v813_v60 = vshrl.u32 %v4296_v5, %v812_v24 }
 0x1be   :  { %4173 = vcosq.f32 %v989_v51  ;;  %v3876_v33 = vmin.u32 %v2631_v43, %v5181_v17  ;;  %vm829_vm12 = vcmp.lt.s32.totalorder %v810_v0, 1  ;;  %vm831_vm11 = vcmp.lt.s32.totalorder %v810_v0, 3 }
 0x1bf   :  { %4175 = vsinq.f32 %v989_v51  ;;  %vm832_vm13 = vcmp.lt.s32.totalorder %v810_v0, 4  ;;  %v837_v20 = vsel %vm829_vm12, %v816_v29, %v819_v44  ;;  %v841_v1 = vsel %vm829_vm12, %v819_v44, %v822_v30 }
 0x1c0   :  { %v2633_v37 = vclz %v3876_v33  ;;  %v834_v32 = vsel %vm832_vm13, %v822_v30, 2102212464  ;;  %v838_v2 = vsel %vm832_vm13, %v825_v59, 920167782  ;;  %v842_v41 = vsel %vm832_vm13, %v828_v27, 1326507024 }
 0x1c1   :  { %vm830_vm14 = vcmp.lt.s32.totalorder %v810_v0, 2  ;;  %v839_v12 = vsel %vm831_vm11, %v822_v30, %v838_v2  ;;  %v843_v4 = vsel %vm831_vm11, %v825_v59, %v842_v41  ;;  %v833_v40 = vsel %vm829_vm12, %v813_v60, %v816_v29  ;;  %v3965_v0 = vpop.f32.mrf.mxu0  ;;  %v5239_v59 = vld [vmem:[%s6810_s2] ss:$0 sm:$0xff] }
 0x1c2   :  { %v3877_v21 = vadd.s32 4294967294, %v2633_v37  ;;  %v840_v23 = vsel %vm830_vm14, %v837_v20, %v839_v12  ;;  %v844_v16 = vsel %vm830_vm14, %v841_v1, %v843_v4  ;;  %v2465_v61 = vshrl.u32 %v2464_v47, 23 }
 0x1c3   :  { %v835_v24 = vsel %vm831_vm11, %v819_v44, %v834_v32  ;;  %v5205_v58 = vmul.u32.u64.low %v845_v48, %v844_v16  ;;  %v5206_v6 = vmul.u32.u64.high %v845_v48, %v844_v16, %v5205_v58  ;;  %v2621_v26 = vadd.s32 %v5144_v62, %v5142_v35 }
 0x1c4   :  { %vm3878_vm15 = vcmp.lt.s32.totalorder %v3877_v21, 0  ;;  %v5208_v8 = vmul.u32.u64.low %v845_v48, %v840_v23  ;;  %v5209_v56 = vmul.u32.u64.high %v845_v48, %v840_v23, %v5208_v8  ;;  %v3871_v14 = vadd.s32 4294967169, %v2465_v61 }
 0x1c5   :  { %v2636_v18 = vsel %vm3878_vm15, 0, %v3877_v21  ;;  %v2652_v7 = vsel %vm2567_vm10, %v2651_v49, %v5169_v54  ;;  %vm996_vm0 = vcmp.lt.s32.totalorder %v5171_v31, 2  ;;  %vm5220_vm1 = vcmp.le.f32.partialorder %v2565_v34, 0.7853982 }
 0x1c6   :  { %v2637_v52 = vsub.s32 32, %v2636_v18  ;;  %v2641_v28 = vsub.s32 4294967266, %v2636_v18  ;;  %v836_v63 = vsel %vm830_vm14, %v833_v40, %v835_v24  ;;  %v2471_v38 = vadd.s32 1, %v3871_v14 }
 0x1c7   :  { %vm993_vm2 = vweird.f32 %v4977_v10  ;;  %v2638_v35 = vshll.u32 %v5181_v17, %v2636_v18  ;;  %vm854_vm3 = vc.u32 %v5206_v6, %v5208_v8  ;;  %v2654_v54 = vsel %vm5220_vm1, 0, %v2652_v7 }
 0x1c8   :  { %v2639_v62 = vshrl.u32 %v2621_v26, %v2637_v52  ;;  %v2642_v25 = vadd.s32 127, %v2641_v28  ;;  %v855_v34 = vadd.s32 1, %v5209_v56  ;;  %v2461_v53 = vand.u32 2147483647, %v5179_v36 }
 0x1c9   :  { %vm2472_vm4 = vcmp.gt.s32.totalorder %v2471_v38, 0  ;;  %v852_v55 = vmul.u32 %v845_v48, %v836_v63  ;;  %vm997_vm5 = vcmp.eq.s32.totalorder %v5171_v31, 0  ;;  %vm1000_vm6 = vcmp.eq.s32.totalorder %v5171_v31, 2 }
 0x1ca   :  { %v2640_v57 = vor.u32 %v2639_v62, %v2638_v35  ;;  %v2643_v42 = vshll.u32 %v2642_v25, 23  ;;  %v2473_v46 = vsel %vm2472_vm4, %v2471_v38, 0  ;;  %v856_v17 = vsel %vm854_vm3, %v855_v34, %v5209_v56 }
 0x1cb   :  { %v4174_v39 = vpop.eup %4173  ;;  %v2475_v43 = vand.u32 31, %v2473_v46  ;;  %v857_v30 = vadd.s32 %v856_v17, %v852_v55  ;;  %v5242_v27 = vadd.f32 %v5239_v59, %v3965_v0  ;;  %v5244_v48 = vadd.s32 3, %v2654_v54 }
 0x1cc   :  { %v4176_v29 = vpop.eup %4175  ;;  %v1001_v44 = vxor.u32 2147483648, %v4174_v39  ;;  %v2644_v51 = vor.u32 4788187, %v2643_v42  ;;  %v2468_v47 = vand.u32 8388607, %v2461_v53  ;;  %v2647_v20 = vcvt.s32.f32 %v2640_v57 }
 0x1cd   :  { %v998_v33 = vxor.u32 2147483648, %v4176_v29  ;;  %v2476_v49 = vsub.s32 32, %v2475_v43  ;;  %v858_v32 = vadd.s32 536870912, %v857_v30  ;;  %v2478_v1 = vshll.u32 %v4296_v5, %v2475_v43 }
 0x1ce   :  { %v1002_v60 = vsel %vm1000_vm6, %v1001_v44, %v4176_v29  ;;  %v2645_v37 = vand.u32 2147483647, %v2644_v51  ;;  %v2469_v61 = vor.u32 8388608, %v2468_v47  ;;  %v2474_v24 = vshrl.u32 %v2473_v46, 5 }
 0x1cf   :  { %v999_v2 = vsel %vm997_vm5, %v4174_v39, %v998_v33  ;;  %v2479_v41 = vshrl.u32 %v4297_v9, %v2476_v49  ;;  %v2482_v21 = vshrl.u32 %v4298_v11, %v2476_v49  ;;  %v5255_v40 = vshrl.u32 %v858_v32, 30 }
 0x1d0   :  { %v1003_v12 = vsel %vm996_vm0, %v999_v2, %v1002_v60  ;;  %v2648_v4 = vmul.f32 %v2647_v20, %v2645_v37  ;;  %v2485_v23 = vshrl.u32 %v4299_v13, %v2476_v49  ;;  %v2481_v58 = vshll.u32 %v4297_v9, %v2475_v43  ;;  %v3989_v20 = vpop.f32.mrf.mxu1 }
 0x1d1   :  { %v1004_v16 = vsel %vm993_vm2, nan, %v1003_v12  ;;  %v860_v56 = vshll.u32 %v5255_v40, 30  ;;  %v2480_v14 = vor.u32 %v2479_v41, %v2478_v1  ;;  %v2484_v31 = vshll.u32 %v4298_v11, %v2475_v43 }
 0x1d2   :  { %3714 = vst [vmem:[#allocation2 + $0x28] sm:$0xff] %v1004_v16  ;;  %v2649_v18 = vxor.u32 2147483648, %v2648_v4  ;;  %v2487_v26 = vshll.u32 %v4299_v13, %v2475_v43  ;;  %v2488_v52 = vshrl.u32 %v4300_v15, %v2476_v49  ;;  %v2490_v28 = vshll.u32 %v4300_v15, %v2475_v43 }
 0x1d3   :  { %v2491_v10 = vshrl.u32 %v4301_v22, %v2476_v49  ;;  %v5269_v63 = vsub.s32 %v857_v30, %v860_v56  ;;  %v2483_v38 = vor.u32 %v2482_v21, %v2481_v58  ;;  %v2486_v35 = vor.u32 %v2485_v23, %v2484_v31 }
 0x1d4   :  { %v2650_v7 = vsel %vm2567_vm10, %v2649_v18, %v2648_v4  ;;  %v2489_v25 = vor.u32 %v2488_v52, %v2487_v26  ;;  %v1109_v34 = vand.u32 2147483647, %v5242_v27  ;;  %v2477_v57 = vshrl.u32 %v4296_v5, %v2476_v49 }
 0x1d5   :  { %v2653_v62 = vsel %vm5220_vm1, %v5048_v3, %v2650_v7  ;;  %v2492_v54 = vor.u32 %v2491_v10, %v2490_v28  ;;  %v863_v0 = vsub.s32 0, %v5269_v63  ;;  %v1112_v42 = vand.u32 2139095040, %v5242_v27 }
 0x1d6   :  { %4177 = vcosq.f32 %v2653_v62  ;;  %vm799_vm7 = vcmp.lt.s32.totalorder %v5109_v50, 0  ;;  %vm2493_vm8 = vcmp.lt.s32.totalorder %v2474_v24, 1  ;;  %vm2495_vm9 = vcmp.lt.s32.totalorder %v2474_v24, 3 }
 0x1d7   :  { %4179 = vsinq.f32 %v2653_v62  ;;  %vm2496_vm10 = vcmp.lt.s32.totalorder %v2474_v24, 4  ;;  %v3808_v19 = vmin.u32 %v863_v0, %v5269_v63  ;;  %v2501_v46 = vsel %vm2493_vm8, %v2480_v14, %v2483_v38 }
 0x1d8   :  { %v2498_v55 = vsel %vm2496_vm10, %v2486_v35, 2102212464  ;;  %v2502_v39 = vsel %vm2496_vm10, %v2489_v25, 920167782  ;;  %v2505_v43 = vsel %vm2493_vm8, %v2483_v38, %v2486_v35  ;;  %v2506_v29 = vsel %vm2496_vm10, %v2492_v54, 1326507024 }
 0x1d9   :  { %v2503_v17 = vsel %vm2495_vm9, %v2486_v35, %v2502_v39  ;;  %v2509_v44 = vshll.u32 %v2469_v61, 8  ;;  %v865_v51 = vclz %v3808_v19  ;;  %v883_v30 = vsub.s32 4, %v5255_v40 }
 0x1da   :  { %vm2494_vm12 = vcmp.lt.s32.totalorder %v2474_v24, 2  ;;  %v2497_v33 = vsel %vm2493_vm8, %v2477_v57, %v2480_v14  ;;  %v2499_v47 = vsel %vm2495_vm9, %v2483_v38, %v2498_v55  ;;  %v2507_v60 = vsel %vm2495_vm9, %v2489_v25, %v2506_v29 }
 0x1db   :  { %v2504_v49 = vsel %vm2494_vm12, %v2501_v46, %v2503_v17  ;;  %v1113_v37 = vshrl.u32 %v1112_v42, 23  ;;  %v3809_v32 = vadd.s32 4294967294, %v865_v51  ;;  %v2508_v2 = vsel %vm2494_vm12, %v2505_v43, %v2507_v60 }
 0x1dc   :  { %v5284_v1 = vmul.u32.u64.low %v2509_v44, %v2504_v49  ;;  %v5285_v41 = vmul.u32.u64.high %v2509_v44, %v2504_v49, %v5284_v1  ;;  %vm5289_vm11 = vcmp.le.f32.partialorder %v797_v45, 0.7853982  ;;  %v2659_v16 = vand.u32 3, %v5244_v48 }
 0x1dd   :  { %v5293_v12 = vmul.u32.u64.low %v2509_v44, %v2508_v2  ;;  %v5294_v4 = vmul.u32.u64.high %v2509_v44, %v2508_v2, %v5293_v12  ;;  %v3819_v23 = vadd.s32 4294967169, %v1113_v37  ;;  %vm3810_vm13 = vcmp.lt.s32.totalorder %v3809_v32, 0 }
 0x1de   :  { %v2500_v61 = vsel %vm2494_vm12, %v2497_v33, %v2499_v47  ;;  %v5298_v24 = vadd.f32 %v5239_v59, %v3989_v20  ;;  %v853_v58 = vadd.s32 %v5208_v8, %v5206_v6  ;;  %v868_v18 = vsel %vm3810_vm13, 0, %v3809_v32 }
 0x1df   :  { %v5304_v45 = vand.u32 8388607, %v1109_v34  ;;  %v1119_v56 = vadd.s32 1, %v3819_v23  ;;  %vm2657_vm14 = vweird.f32 %v5048_v3  ;;  %v869_v14 = vsub.s32 32, %v868_v18 }
 0x1e0   :  { %v873_v31 = vsub.s32 4294967266, %v868_v18  ;;  %v884_v48 = vsel %vm799_vm7, %v883_v30, %v5255_v40  ;;  %v2519_v26 = vadd.s32 1, %v5285_v41  ;;  %v870_v52 = vshll.u32 %v5269_v63, %v868_v18 }
 0x1e1   :  { %v2516_v28 = vmul.u32 %v2509_v44, %v2500_v61  ;;  %vm2518_vm15 = vc.u32 %v5294_v4, %v5284_v1  ;;  %vm1120_vm0 = vcmp.gt.s32.totalorder %v1119_v56, 0  ;;  %v871_v6 = vshrl.u32 %v853_v58, %v869_v14 }
 0x1e2   :  { %v874_v8 = vadd.s32 127, %v873_v31  ;;  %v2520_v10 = vsel %vm2518_vm15, %v2519_v26, %v5285_v41  ;;  %v1121_v7 = vsel %vm1120_vm0, %v1119_v56, 0  ;;  %vm2660_vm1 = vcmp.lt.s32.totalorder %v2659_v16, 2 }
 0x1e3   :  { %v4178_v38 = vpop.eup %4177  ;;  %v886_v35 = vsel %vm5289_vm11, 0, %v884_v48  ;;  %v2521_v62 = vadd.s32 %v2520_v10, %v2516_v28  ;;  %v1123_v40 = vand.u32 31, %v1121_v7  ;;  %vm2661_vm2 = vcmp.eq.s32.totalorder %v2659_v16, 0 }
 0x1e4   :  { %v4180_v25 = vpop.eup %4179  ;;  %v2665_v54 = vxor.u32 2147483648, %v4178_v38  ;;  %v872_v63 = vor.u32 %v871_v6, %v870_v52  ;;  %v875_v0 = vshll.u32 %v874_v8, 23  ;;  %vm2664_vm3 = vcmp.eq.s32.totalorder %v2659_v16, 2 }
 0x1e5   :  { %v2662_v57 = vxor.u32 2147483648, %v4180_v25  ;;  %v2522_v42 = vadd.s32 536870912, %v2521_v62  ;;  %v1124_v19 = vsub.s32 32, %v1123_v40  ;;  %v5316_v39 = vadd.s32 3, %v886_v35 }
 0x1e6   :  { %v2666_v55 = vsel %vm2664_vm3, %v2665_v54, %v4180_v25  ;;  %v876_v46 = vor.u32 4788187, %v875_v0  ;;  %v1117_v17 = vor.u32 8388608, %v5304_v45  ;;  %v2773_v44 = vand.u32 2147483647, %v5298_v24 }
 0x1e7   :  { %v2663_v43 = vsel %vm2661_vm2, %v4178_v38, %v2662_v57  ;;  %v2523_v29 = vshrl.u32 %v2522_v42, 30  ;;  %v2776_v51 = vand.u32 2139095040, %v5298_v24  ;;  %v879_v47 = vcvt.s32.f32 %v872_v63 }
 0x1e8   :  { %v2667_v30 = vsel %vm2660_vm1, %v2663_v43, %v2666_v55  ;;  %v877_v33 = vand.u32 2147483647, %v876_v46  ;;  %v1127_v49 = vshrl.u32 %v4297_v9, %v1124_v19  ;;  %v5326_v37 = vadd.s32 %v5284_v1, %v5294_v4 }
 0x1e9   :  { %v2668_v60 = vsel %vm2657_vm14, nan, %v2667_v30  ;;  %v2524_v20 = vshll.u32 %v2523_v29, 30  ;;  %v1130_v32 = vshrl.u32 %v4298_v11, %v1124_v19  ;;  %v1122_v41 = vshrl.u32 %v1121_v7, 5 }
 0x1ea   :  { %3730 = vst [vmem:[#allocation2 + $0xa8] sm:$0xff] %v2668_v60  ;;  %v880_v2 = vmul.f32 %v879_v47, %v877_v33  ;;  %v1126_v12 = vshll.u32 %v4296_v5, %v1123_v40  ;;  %v1133_v23 = vshrl.u32 %v4299_v13, %v1124_v19  ;;  %v1129_v61 = vshll.u32 %v4297_v9, %v1123_v40 }
 0x1eb   :  { %v5331_v16 = vsub.s32 %v2521_v62, %v2524_v20  ;;  %v1132_v3 = vshll.u32 %v4298_v11, %v1123_v40  ;;  %v1136_v58 = vshrl.u32 %v4300_v15, %v1124_v19  ;;  %v1135_v18 = vshll.u32 %v4299_v13, %v1123_v40 }
 0x1ec   :  { %v881_v1 = vxor.u32 2147483648, %v880_v2  ;;  %v1128_v4 = vor.u32 %v1127_v49, %v1126_v12  ;;  %v1139_v45 = vshrl.u32 %v4301_v22, %v1124_v19  ;;  %vm2463_vm4 = vcmp.lt.s32.totalorder %v5179_v36, 0 }
 0x1ed   :  { %v2527_v56 = vsub.s32 0, %v5331_v16  ;;  %v1131_v14 = vor.u32 %v1130_v32, %v1129_v61  ;;  %v1134_v31 = vor.u32 %v1133_v23, %v1132_v3  ;;  %v1138_v48 = vshll.u32 %v4300_v15, %v1123_v40 }
 0x1ee   :  { %v882_v26 = vsel %vm799_vm7, %v881_v1, %v880_v2  ;;  %v1137_v52 = vor.u32 %v1136_v58, %v1135_v18  ;;  %v1157_v28 = vshll.u32 %v1117_v17, 8  ;;  %v2777_v6 = vshrl.u32 %v2776_v51, 23 }
 0x1ef   :  { %v885_v8 = vsel %vm5289_vm11, %v5109_v50, %v882_v26  ;;  %v3872_v10 = vmin.u32 %v2527_v56, %v5331_v16  ;;  %v1125_v7 = vshrl.u32 %v4296_v5, %v1124_v19  ;;  %v1140_v38 = vor.u32 %v1139_v45, %v1138_v48 }
 0x1f0   :  { %4181 = vcosq.f32 %v885_v8  ;;  %v2547_v35 = vsub.s32 4, %v2523_v29  ;;  %vm1141_vm5 = vcmp.lt.s32.totalorder %v1122_v41, 1  ;;  %vm1144_vm6 = vcmp.lt.s32.totalorder %v1122_v41, 4 }
 0x1f1   :  { %4183 = vsinq.f32 %v885_v8  ;;  %v2529_v62 = vclz %v3872_v10  ;;  %v1146_v40 = vsel %vm1144_vm6, %v1134_v31, 2102212464  ;;  %v1149_v25 = vsel %vm1141_vm5, %v1128_v4, %v1131_v14 }
 0x1f2   :  { %vm1142_vm7 = vcmp.lt.s32.totalorder %v1122_v41, 2  ;;  %vm1143_vm8 = vcmp.lt.s32.totalorder %v1122_v41, 3  ;;  %v1150_v54 = vsel %vm1144_vm6, %v1137_v52, 920167782  ;;  %v1153_v63 = vsel %vm1141_vm5, %v1131_v14, %v1134_v31 }
 0x1f3   :  { %v3873_v0 = vadd.s32 4294967294, %v2529_v62  ;;  %v1145_v21 = vsel %vm1141_vm5, %v1125_v7, %v1128_v4  ;;  %v1151_v57 = vsel %vm1143_vm8, %v1134_v31, %v1150_v54  ;;  %v1154_v42 = vsel %vm1144_vm6, %v1140_v38, 1326507024 }
 0x1f4   :  { %v1147_v55 = vsel %vm1143_vm8, %v1131_v14, %v1146_v40  ;;  %v1152_v19 = vsel %vm1142_vm7, %v1149_v25, %v1151_v57  ;;  %v1155_v46 = vsel %vm1143_vm8, %v1137_v52, %v1154_v42  ;;  %v3883_v17 = vadd.s32 4294967169, %v2777_v6 }
 0x1f5   :  { %vm3874_vm9 = vcmp.lt.s32.totalorder %v3873_v0, 0  ;;  %v1156_v43 = vsel %vm1142_vm7, %v1153_v63, %v1155_v46  ;;  %v5350_v51 = vmul.u32.u64.low %v1157_v28, %v1152_v19  ;;  %v5351_v30 = vmul.u32.u64.high %v1157_v28, %v1152_v19, %v5350_v51 }
 0x1f6   :  { %v2532_v33 = vsel %vm3874_vm9, 0, %v3873_v0  ;;  %v2548_v47 = vsel %vm2463_vm4, %v2547_v35, %v2523_v29  ;;  %v5356_v49 = vmul.u32.u64.low %v1157_v28, %v1156_v43  ;;  %v5357_v60 = vmul.u32.u64.high %v1157_v28, %v1156_v43, %v5356_v49 }
 0x1f7   :  { %v2533_v20 = vsub.s32 32, %v2532_v33  ;;  %v2537_v32 = vsub.s32 4294967266, %v2532_v33  ;;  %v1148_v2 = vsel %vm1142_vm7, %v1145_v21, %v1147_v55  ;;  %v2783_v12 = vadd.s32 1, %v3883_v17 }
 0x1f8   :  { %v891_v23 = vand.u32 3, %v5316_v39  ;;  %vm5363_vm10 = vcmp.le.f32.partialorder %v2461_v53, 0.7853982  ;;  %v2534_v3 = vshll.u32 %v5331_v16, %v2532_v33  ;;  %v1167_v1 = vadd.s32 1, %v5351_v30  ;;  %v252_v33 = vpop.f32.mrf.mxu0 }
 0x1f9   :  { %v2535_v29 = vshrl.u32 %v5326_v37, %v2533_v20  ;;  %v2538_v58 = vadd.s32 127, %v2537_v32  ;;  %vm2784_vm12 = vcmp.gt.s32.totalorder %v2783_v12, 0  ;;  %v2550_v41 = vsel %vm5363_vm10, 0, %v2548_v47 }
 0x1fa   :  { %v1164_v4 = vmul.u32 %v1157_v28, %v1148_v2  ;;  %vm1166_vm11 = vc.u32 %v5357_v60, %v5350_v51  ;;  %v2785_v39 = vsel %vm2784_vm12, %v2783_v12, 0  ;;  %v2780_v16 = vand.u32 8388607, %v2773_v44 }
 0x1fb   :  { %v2536_v53 = vor.u32 %v2535_v29, %v2534_v3  ;;  %v2539_v18 = vshll.u32 %v2538_v58, 23  ;;  %v1168_v45 = vsel %vm1166_vm11, %v1167_v1, %v5351_v30  ;;  %vm889_vm13 = vweird.f32 %v5109_v50 }
 0x1fc   :  { %v1169_v37 = vadd.s32 %v1168_v45, %v1164_v4  ;;  %v2787_v56 = vand.u32 31, %v2785_v39  ;;  %vm892_vm14 = vcmp.lt.s32.totalorder %v891_v23, 2  ;;  %vm893_vm15 = vcmp.eq.s32.totalorder %v891_v23, 0 }
 0x1fd   :  { %v4182_v14 = vpop.eup %4181  ;;  %vm896_vm0 = vcmp.eq.s32.totalorder %v891_v23, 2  ;;  %v2540_v31 = vor.u32 4788187, %v2539_v18  ;;  %v5378_v52 = vadd.s32 3, %v2550_v41  ;;  %v2543_v7 = vcvt.s32.f32 %v2536_v53 }
 0x1fe   :  { %v4184_v48 = vpop.eup %4183  ;;  %v897_v26 = vxor.u32 2147483648, %v4182_v14  ;;  %v1170_v28 = vadd.s32 536870912, %v1169_v37  ;;  %v2788_v6 = vsub.s32 32, %v2787_v56  ;;  %v2781_v38 = vor.u32 8388608, %v2780_v16 }
 0x1ff   :  { %v894_v8 = vxor.u32 2147483648, %v4184_v48  ;;  %v2541_v10 = vand.u32 2147483647, %v2540_v31  ;;  %v2790_v40 = vshll.u32 %v4296_v5, %v2787_v56  ;;  %v2786_v55 = vshrl.u32 %v2785_v39, 5 }
 0x200   :  { %v898_v35 = vsel %vm896_vm0, %v897_v26, %v4184_v48  ;;  %v1171_v62 = vshrl.u32 %v1170_v28, 30  ;;  %v2791_v25 = vshrl.u32 %v4297_v9, %v2788_v6  ;;  %v2794_v0 = vshrl.u32 %v4298_v11, %v2788_v6 }
 0x201   :  { %v895_v54 = vsel %vm893_vm15, %v4182_v14, %v894_v8  ;;  %v2544_v63 = vmul.f32 %v2543_v7, %v2541_v10  ;;  %v2797_v21 = vshrl.u32 %v4299_v13, %v2788_v6  ;;  %v2793_v19 = vshll.u32 %v4297_v9, %v2787_v56  ;;  %v332_v7 = vpop.f32.mrf.mxu1 }
 0x202   :  { %v899_v57 = vsel %vm892_vm14, %v895_v54, %v898_v35  ;;  %v1172_v42 = vshll.u32 %v1171_v62, 30  ;;  %vm1111_vm1 = vcmp.lt.s32.totalorder %v5242_v27, 0  ;;  %v2792_v43 = vor.u32 %v2791_v25, %v2790_v40 }
 0x203   :  { %v900_v46 = vsel %vm889_vm13, nan, %v899_v57  ;;  %v2545_v17 = vxor.u32 2147483648, %v2544_v63  ;;  %v2796_v30 = vshll.u32 %v4298_v11, %v2787_v56  ;;  %v2795_v49 = vor.u32 %v2794_v0, %v2793_v19 }
 0x204   :  { %3713 = vst [vmem:[#allocation2 + $0x20] sm:$0xff] %v900_v46  ;;  %v5391_v47 = vsub.s32 %v1169_v37, %v1172_v42  ;;  %v2799_v20 = vshll.u32 %v4299_v13, %v2787_v56  ;;  %v2800_v32 = vshrl.u32 %v4300_v15, %v2788_v6  ;;  %v2802_v12 = vshll.u32 %v4300_v15, %v2787_v56 }
 0x205   :  { %v2546_v2 = vsel %vm2463_vm4, %v2545_v17, %v2544_v63  ;;  %v2798_v50 = vor.u32 %v2797_v21, %v2796_v30  ;;  %v2803_v23 = vshrl.u32 %v4301_v22, %v2788_v6  ;;  %v5404_v1 = vadd.f32 %v5239_v59, %v252_v33 }
 0x206   :  { %v2549_v3 = vsel %vm5363_vm10, %v5179_v36, %v2546_v2  ;;  %v1175_v29 = vsub.s32 0, %v5391_v47  ;;  %v2801_v58 = vor.u32 %v2800_v32, %v2799_v20  ;;  %v2789_v41 = vshrl.u32 %v4296_v5, %v2788_v6 }
 0x207   :  { %4185 = vcosq.f32 %v2549_v3  ;;  %v2804_v4 = vor.u32 %v2803_v23, %v2802_v12  ;;  %vm2805_vm2 = vcmp.lt.s32.totalorder %v2786_v55, 1  ;;  %v1195_v53 = vsub.s32 4, %v1171_v62 }
 0x208   :  { %4187 = vsinq.f32 %v2549_v3  ;;  %v3820_v39 = vmin.u32 %v1175_v29, %v5391_v47  ;;  %vm2808_vm3 = vcmp.lt.s32.totalorder %v2786_v55, 4  ;;  %v2813_v45 = vsel %vm2805_vm2, %v2792_v43, %v2795_v49 }
 0x209   :  { %v2810_v18 = vsel %vm2808_vm3, %v2798_v50, 2102212464  ;;  %v2814_v61 = vsel %vm2808_vm3, %v2801_v58, 920167782  ;;  %v2821_v16 = vshll.u32 %v2781_v38, 8  ;;  %vm2807_vm4 = vcmp.lt.s32.totalorder %v2786_v55, 3 }
 0x20a   :  { %v1177_v37 = vclz %v3820_v39  ;;  %v2809_v56 = vsel %vm2805_vm2, %v2789_v41, %v2792_v43  ;;  %v2817_v14 = vsel %vm2805_vm2, %v2795_v49, %v2798_v50  ;;  %vm2806_vm5 = vcmp.lt.s32.totalorder %v2786_v55, 2 }
 0x20b   :  { %v2811_v31 = vsel %vm2807_vm4, %v2795_v49, %v2810_v18  ;;  %v2815_v48 = vsel %vm2807_vm4, %v2798_v50, %v2814_v61  ;;  %v2818_v26 = vsel %vm2808_vm3, %v2804_v4, 1326507024  ;;  %v1196_v6 = vsel %vm1111_vm1, %v1195_v53, %v1171_v62 }
 0x20c   :  { %v3821_v28 = vadd.s32 4294967294, %v1177_v37  ;;  %v2816_v8 = vsel %vm2806_vm5, %v2813_v45, %v2815_v48  ;;  %v2819_v10 = vsel %vm2807_vm4, %v2801_v58, %v2818_v26  ;;  %v2812_v35 = vsel %vm2806_vm5, %v2809_v56, %v2811_v31 }
 0x20d   :  { %v2820_v40 = vsel %vm2806_vm5, %v2817_v14, %v2819_v10  ;;  %v5410_v25 = vmul.u32.u64.low %v2821_v16, %v2816_v8  ;;  %v5411_v54 = vmul.u32.u64.high %v2821_v16, %v2816_v8, %v5410_v25  ;;  %v1008_v0 = vand.u32 2139095040, %v5404_v1 }
 0x20e   :  { %vm3822_vm6 = vcmp.lt.s32.totalorder %v3821_v28, 0  ;;  %v5414_v38 = vmul.u32.u64.low %v2821_v16, %v2820_v40  ;;  %v5415_v63 = vmul.u32.u64.high %v2821_v16, %v2820_v40, %v5414_v38  ;;  %v2555_v21 = vand.u32 3, %v5378_v52 }
 0x20f   :  { %vm5421_vm7 = vcmp.le.f32.partialorder %v1109_v34, 0.7853982  ;;  %v1180_v57 = vsel %vm3822_vm6, 0, %v3821_v28  ;;  %v5426_v42 = vadd.f32 %v5239_v59, %v332_v7  ;;  %v1165_v55 = vadd.s32 %v5350_v51, %v5357_v60 }
 0x210   :  { %v1181_v19 = vsub.s32 32, %v1180_v57  ;;  %v1185_v46 = vsub.s32 4294967266, %v1180_v57  ;;  %v1009_v17 = vshrl.u32 %v1008_v0, 23  ;;  %v1198_v43 = vsel %vm5421_vm7, 0, %v1196_v6 }
 0x211   :  { %v2828_v52 = vmul.u32 %v2821_v16, %v2812_v35  ;;  %v2831_v30 = vadd.s32 1, %v5411_v54  ;;  %v1005_v34 = vand.u32 2147483647, %v5404_v1  ;;  %v1182_v33 = vshll.u32 %v5391_v47, %v1180_v57 }
 0x212   :  { %v1183_v49 = vshrl.u32 %v1165_v55, %v1181_v19  ;;  %v1186_v20 = vadd.s32 127, %v1185_v46  ;;  %vm2830_vm8 = vc.u32 %v5415_v63, %v5410_v25  ;;  %vm2556_vm9 = vcmp.lt.s32.totalorder %v2555_v21, 2 }
 0x213   :  { %v2832_v51 = vsel %vm2830_vm8, %v2831_v30, %v5411_v54  ;;  %v3815_v60 = vadd.s32 4294967169, %v1009_v17  ;;  %v2672_v32 = vand.u32 2139095040, %v5426_v42  ;;  %vm2557_vm10 = vcmp.eq.s32.totalorder %v2555_v21, 0 }
 0x214   :  { %v4186_v2 = vpop.eup %4185  ;;  %v1184_v50 = vor.u32 %v1183_v49, %v1182_v33  ;;  %v1187_v12 = vshll.u32 %v1186_v20, 23  ;;  %v2833_v23 = vadd.s32 %v2832_v51, %v2828_v52  ;;  %vm2560_vm12 = vcmp.eq.s32.totalorder %v2555_v21, 2 }
 0x215   :  { %v4188_v3 = vpop.eup %4187  ;;  %v2561_v29 = vxor.u32 2147483648, %v4186_v2  ;;  %v1202_v47 = vadd.s32 3, %v1198_v43  ;;  %v1015_v58 = vadd.s32 1, %v3815_v60  ;;  %v1012_v53 = vand.u32 8388607, %v1005_v34 }
 0x216   :  { %v2558_v41 = vxor.u32 2147483648, %v4188_v3  ;;  %v1188_v4 = vor.u32 4788187, %v1187_v12  ;;  %v2834_v39 = vadd.s32 536870912, %v2833_v23  ;;  %v1191_v45 = vcvt.s32.f32 %v1184_v50 }
 0x217   :  { %v2562_v18 = vsel %vm2560_vm12, %v2561_v29, %v4188_v3  ;;  %vm1016_vm11 = vcmp.gt.s32.totalorder %v1015_v58, 0  ;;  %v2673_v61 = vshrl.u32 %v2672_v32, 23  ;;  %vm2553_vm13 = vweird.f32 %v5179_v36 }
 0x218   :  { %v2559_v16 = vsel %vm2557_vm10, %v4186_v2, %v2558_v41  ;;  %v1189_v37 = vand.u32 2147483647, %v1188_v4  ;;  %v2835_v56 = vshrl.u32 %v2834_v39, 30  ;;  %v1017_v14 = vsel %vm1016_vm11, %v1015_v58, 0 }
 0x219   :  { %v2563_v31 = vsel %vm2556_vm9, %v2559_v16, %v2562_v18  ;;  %v1019_v48 = vand.u32 31, %v1017_v14  ;;  %v5444_v6 = vand.u32 3, %v1202_v47  ;;  %vm2775_vm14 = vcmp.lt.s32.totalorder %v5298_v24, 0 }
 0x21a   :  { %v2564_v26 = vsel %vm2553_vm13, nan, %v2563_v31  ;;  %v1192_v28 = vmul.f32 %v1191_v45, %v1189_v37  ;;  %v2836_v8 = vshll.u32 %v2835_v56, 30  ;;  %v1013_v10 = vor.u32 8388608, %v1012_v53 }
 0x21b   :  { %3729 = vst [vmem:[#allocation2 + $0xa0] sm:$0xff] %v2564_v26  ;;  %v1020_v7 = vsub.s32 32, %v1019_v48  ;;  %v2669_v35 = vand.u32 2147483647, %v5426_v42  ;;  %v3879_v40 = vadd.s32 4294967169, %v2673_v61  ;;  %v2859_v36 = vsub.s32 4, %v2835_v56 }
 0x21c   :  { %v1193_v54 = vxor.u32 2147483648, %v1192_v28  ;;  %v5448_v38 = vsub.s32 %v2833_v23, %v2836_v8  ;;  %v1018_v0 = vshrl.u32 %v1017_v14, 5  ;;  %v1022_v21 = vshll.u32 %v4296_v5, %v1019_v48 }
 0x21d   :  { %v1023_v57 = vshrl.u32 %v4297_v9, %v1020_v7  ;;  %v1025_v55 = vshll.u32 %v4297_v9, %v1019_v48  ;;  %v1026_v19 = vshrl.u32 %v4298_v11, %v1020_v7  ;;  %vm5458_vm15 = vcmp.le.f32.partialorder %v2773_v44, 0.7853982 }
 0x21e   :  { %v1194_v46 = vsel %vm1111_vm1, %v1193_v54, %v1192_v28  ;;  %v2839_v43 = vsub.s32 0, %v5448_v38  ;;  %v1028_v52 = vshll.u32 %v4298_v11, %v1019_v48  ;;  %v1029_v30 = vshrl.u32 %v4299_v13, %v1020_v7 }
 0x21f   :  { %v1197_v33 = vsel %vm5421_vm7, %v5242_v27, %v1194_v46  ;;  %v1024_v49 = vor.u32 %v1023_v57, %v1022_v21  ;;  %v1031_v20 = vshll.u32 %v4299_v13, %v1019_v48  ;;  %v1032_v51 = vshrl.u32 %v4300_v15, %v1020_v7 }
 0x220   :  { %4189 = vcosq.f32 %v1197_v33  ;;  %v3884_v44 = vmin.u32 %v2839_v43, %v5448_v38  ;;  %v1027_v60 = vor.u32 %v1026_v19, %v1025_v55  ;;  %v1030_v32 = vor.u32 %v1029_v30, %v1028_v52 }
 0x221   :  { %4191 = vsinq.f32 %v1197_v33  ;;  %v1033_v2 = vor.u32 %v1032_v51, %v1031_v20  ;;  %v1034_v50 = vshll.u32 %v4300_v15, %v1019_v48  ;;  %v1035_v12 = vshrl.u32 %v4301_v22, %v1020_v7 }
 0x222   :  { %v2829_v62 = vadd.s32 %v5410_v25, %v5415_v63  ;;  %v2841_v23 = vclz %v3884_v44  ;;  %v1053_v3 = vshll.u32 %v1013_v10, 8  ;;  %v2679_v29 = vadd.s32 1, %v3879_v40 }
 0x223   :  { %v2860_v47 = vsel %vm2775_vm14, %v2859_v36, %v2835_v56  ;;  %v1021_v58 = vshrl.u32 %v4296_v5, %v1020_v7  ;;  %v1036_v41 = vor.u32 %v1035_v12, %v1034_v50  ;;  %vm1037_vm0 = vcmp.lt.s32.totalorder %v1018_v0, 1 }
 0x224   :  { %v3885_v4 = vadd.s32 4294967294, %v2841_v23  ;;  %vm1039_vm1 = vcmp.lt.s32.totalorder %v1018_v0, 3  ;;  %vm1040_vm2 = vcmp.lt.s32.totalorder %v1018_v0, 4  ;;  %v1045_v39 = vsel %vm1037_vm0, %v1024_v49, %v1027_v60 }
 0x225   :  { %v1042_v53 = vsel %vm1040_vm2, %v1030_v32, 2102212464  ;;  %v1046_v18 = vsel %vm1040_vm2, %v1033_v2, 920167782  ;;  %v1049_v45 = vsel %vm1037_vm0, %v1027_v60, %v1030_v32  ;;  %v1050_v25 = vsel %vm1040_vm2, %v1036_v41, 1326507024 }
 0x226   :  { %vm3886_vm3 = vcmp.lt.s32.totalorder %v3885_v4, 0  ;;  %vm1038_vm4 = vcmp.lt.s32.totalorder %v1018_v0, 2  ;;  %v1047_v63 = vsel %vm1039_vm1, %v1030_v32, %v1046_v18  ;;  %v1051_v61 = vsel %vm1039_vm1, %v1033_v2, %v1050_v25 }
 0x227   :  { %v2844_v16 = vsel %vm3886_vm3, 0, %v3885_v4  ;;  %v2862_v37 = vsel %vm5458_vm15, 0, %v2860_v47  ;;  %v1048_v56 = vsel %vm1038_vm4, %v1045_v39, %v1047_v63  ;;  %v1052_v14 = vsel %vm1038_vm4, %v1049_v45, %v1051_v61 }
 0x228   :  { %v2845_v31 = vsub.s32 32, %v2844_v16  ;;  %v2849_v48 = vsub.s32 4294967266, %v2844_v16  ;;  %v1041_v26 = vsel %vm1037_vm0, %v1021_v58, %v1024_v49  ;;  %v1043_v28 = vsel %vm1039_vm1, %v1027_v60, %v1042_v53 }
 0x229   :  { %v5488_v8 = vmul.u32.u64.low %v1053_v3, %v1052_v14  ;;  %v5489_v10 = vmul.u32.u64.high %v1053_v3, %v1052_v14, %v5488_v8  ;;  %v5491_v7 = vmul.u32.u64.low %v1053_v3, %v1048_v56  ;;  %v5492_v40 = vmul.u32.u64.high %v1053_v3, %v1048_v56, %v5491_v7  ;;  %v3968_v14 = vpop.f32.mrf.mxu0 }
 0x22a   :  { %vm1201_vm5 = vweird.f32 %v5242_v27  ;;  %v2846_v54 = vshll.u32 %v5448_v38, %v2844_v16  ;;  %v2847_v36 = vshrl.u32 %v2829_v62, %v2845_v31  ;;  %v2850_v21 = vadd.s32 127, %v2849_v48 }
 0x22b   :  { %vm2680_vm6 = vcmp.gt.s32.totalorder %v2679_v29, 0  ;;  %v2866_v57 = vadd.s32 3, %v2862_v37  ;;  %v1044_v55 = vsel %vm1038_vm4, %v1041_v26, %v1043_v28  ;;  %v2676_v19 = vand.u32 8388607, %v2669_v35 }
 0x22c   :  { %v2681_v46 = vsel %vm2680_vm6, %v2679_v29, 0  ;;  %vm1204_vm7 = vcmp.lt.s32.totalorder %v5444_v6, 2  ;;  %v2848_v43 = vor.u32 %v2847_v36, %v2846_v54  ;;  %v2851_v52 = vshll.u32 %v2850_v21, 23 }
 0x22d   :  { %v2683_v30 = vand.u32 31, %v2681_v46  ;;  %v4190_v33 = vpop.eup %4189  ;;  %vm1205_vm8 = vcmp.eq.s32.totalorder %v5444_v6, 0  ;;  %vm1208_vm9 = vcmp.eq.s32.totalorder %v5444_v6, 2  ;;  %vm1062_vm10 = vc.u32 %v5489_v10, %v5491_v7 }
 0x22e   :  { %v1063_v38 = vadd.s32 1, %v5492_v40  ;;  %v4192_v0 = vpop.eup %4191  ;;  %v1209_v49 = vxor.u32 2147483648, %v4190_v33  ;;  %v2852_v20 = vor.u32 4788187, %v2851_v52  ;;  %v1060_v51 = vmul.u32 %v1053_v3, %v1044_v55 }
 0x22f   :  { %v2684_v44 = vsub.s32 32, %v2683_v30  ;;  %v1206_v60 = vxor.u32 2147483648, %v4192_v0  ;;  %v5506_v32 = vand.u32 3, %v2866_v57  ;;  %v2677_v50 = vor.u32 8388608, %v2676_v19 }
 0x230   :  { %v1064_v2 = vsel %vm1062_vm10, %v1063_v38, %v5492_v40  ;;  %v1210_v12 = vsel %vm1208_vm9, %v1209_v49, %v4192_v0  ;;  %v2853_v62 = vand.u32 2147483647, %v2852_v20  ;;  %v2855_v23 = vcvt.s32.f32 %v2848_v43 }
 0x231   :  { %v1065_v29 = vadd.s32 %v1064_v2, %v1060_v51  ;;  %v1207_v47 = vsel %vm1205_vm8, %v4190_v33, %v1206_v60  ;;  %v2682_v58 = vshrl.u32 %v2681_v46, 5  ;;  %v2687_v41 = vshrl.u32 %v4297_v9, %v2684_v44  ;;  %v3992_v2 = vpop.f32.mrf.mxu1 }
 0x232   :  { %v2690_v4 = vshrl.u32 %v4298_v11, %v2684_v44  ;;  %v1211_v3 = vsel %vm1204_vm7, %v1207_v47, %v1210_v12  ;;  %v2856_v39 = vmul.f32 %v2855_v23, %v2853_v62  ;;  %v2693_v18 = vshrl.u32 %v4299_v13, %v2684_v44 }
 0x233   :  { %v1066_v53 = vadd.s32 536870912, %v1065_v29  ;;  %v1212_v45 = vsel %vm1201_vm5, nan, %v1211_v3  ;;  %v2686_v25 = vshll.u32 %v4296_v5, %v2683_v30  ;;  %v2689_v63 = vshll.u32 %v4297_v9, %v2683_v30 }
 0x234   :  { %v2692_v61 = vshll.u32 %v4298_v11, %v2683_v30  ;;  %3716 = vst [vmem:[#allocation2 + $0x38] sm:$0xff] %v1212_v45  ;;  %v2857_v16 = vxor.u32 2147483648, %v2856_v39  ;;  %v2695_v56 = vshll.u32 %v4299_v13, %v2683_v30  ;;  %v2696_v6 = vshrl.u32 %v4300_v15, %v2684_v44 }
 0x235   :  { %v1067_v37 = vshrl.u32 %v1066_v53, 30  ;;  %v2688_v31 = vor.u32 %v2687_v41, %v2686_v25  ;;  %v2691_v48 = vor.u32 %v2690_v4, %v2689_v63  ;;  %v2698_v26 = vshll.u32 %v4300_v15, %v2683_v30 }
 0x236   :  { %v2699_v27 = vshrl.u32 %v4301_v22, %v2684_v44  ;;  %v2858_v28 = vsel %vm2775_vm14, %v2857_v16, %v2856_v39  ;;  %v2694_v40 = vor.u32 %v2693_v18, %v2692_v61  ;;  %v2697_v54 = vor.u32 %v2696_v6, %v2695_v56 }
 0x237   :  { %v1068_v8 = vshll.u32 %v1067_v37, 30  ;;  %v2861_v36 = vsel %vm5458_vm15, %v5298_v24, %v2858_v28  ;;  %v2717_v57 = vshll.u32 %v2677_v50, 8  ;;  %v5531_v55 = vadd.f32 %v5239_v59, %v3968_v14 }
 0x238   :  { %v2700_v21 = vor.u32 %v2699_v27, %v2698_v26  ;;  %4193 = vcosq.f32 %v2861_v36  ;;  %v2685_v46 = vshrl.u32 %v4296_v5, %v2684_v44  ;;  %vm2701_vm12 = vcmp.lt.s32.totalorder %v2682_v58, 1 }
 0x239   :  { %v5533_v19 = vsub.s32 %v1065_v29, %v1068_v8  ;;  %4195 = vsinq.f32 %v2861_v36  ;;  %vm2702_vm11 = vcmp.lt.s32.totalorder %v2682_v58, 2  ;;  %vm2704_vm13 = vcmp.lt.s32.totalorder %v2682_v58, 4 }
 0x23a   :  { %v2709_v43 = vsel %vm2701_vm12, %v2688_v31, %v2691_v48  ;;  %vm2703_vm14 = vcmp.lt.s32.totalorder %v2682_v58, 3  ;;  %v2706_v17 = vsel %vm2704_vm13, %v2694_v40, 2102212464  ;;  %v2710_v30 = vsel %vm2704_vm13, %v2697_v54, 920167782 }
 0x23b   :  { %v1071_v52 = vsub.s32 0, %v5533_v19  ;;  %v1091_v33 = vsub.s32 4, %v1067_v37  ;;  %v2711_v38 = vsel %vm2703_vm14, %v2694_v40, %v2710_v30  ;;  %v2713_v0 = vsel %vm2701_vm12, %v2691_v48, %v2694_v40 }
 0x23c   :  { %v2714_v49 = vsel %vm2704_vm13, %v2700_v21, 1326507024  ;;  %v2705_v51 = vsel %vm2701_vm12, %v2685_v46, %v2688_v31  ;;  %v2712_v60 = vsel %vm2702_vm11, %v2709_v43, %v2711_v38  ;;  %v2707_v50 = vsel %vm2703_vm14, %v2691_v48, %v2706_v17 }
 0x23d   :  { %v3816_v20 = vmin.u32 %v1071_v52, %v5533_v19  ;;  %v2715_v44 = vsel %vm2703_vm14, %v2697_v54, %v2714_v49  ;;  %v5540_v62 = vmul.u32.u64.low %v2717_v57, %v2712_v60  ;;  %v5541_v23 = vmul.u32.u64.high %v2717_v57, %v2712_v60, %v5540_v62  ;;  %v262_v60 = vpop.f32.mrf.mxu0 }
 0x23e   :  { %v2716_v12 = vsel %vm2702_vm11, %v2713_v0, %v2715_v44  ;;  %vm1007_vm15 = vcmp.lt.s32.totalorder %v5404_v1, 0  ;;  %v5549_v4 = vadd.f32 %v5239_v59, %v3992_v2  ;;  %vm5553_vm0 = vcmp.le.f32.partialorder %v1005_v34, 0.7853982 }
 0x23f   :  { %v1073_v29 = vclz %v3816_v20  ;;  %v5545_v47 = vmul.u32.u64.low %v2717_v57, %v2716_v12  ;;  %v5546_v41 = vmul.u32.u64.high %v2717_v57, %v2716_v12, %v5545_v47  ;;  %v2708_v53 = vsel %vm2702_vm11, %v2705_v51, %v2707_v50 }
 0x240   :  { %v1320_v18 = vand.u32 2139095040, %v5531_v55  ;;  %vm2868_vm1 = vcmp.lt.s32.totalorder %v5506_v32, 2  ;;  %vm2869_vm2 = vcmp.eq.s32.totalorder %v5506_v32, 0  ;;  %v1092_v45 = vsel %vm1007_vm15, %v1091_v33, %v1067_v37 }
 0x241   :  { %v3817_v39 = vadd.s32 4294967294, %v1073_v29  ;;  %v2727_v59 = vadd.s32 1, %v5541_v23  ;;  %v1317_v25 = vand.u32 2147483647, %v5531_v55  ;;  %vm2865_vm3 = vweird.f32 %v5298_v24 }
 0x242   :  { %vm2872_vm4 = vcmp.eq.s32.totalorder %v5506_v32, 2  ;;  %v1061_v34 = vadd.s32 %v5491_v7, %v5489_v10  ;;  %v1321_v58 = vshrl.u32 %v1320_v18, 23  ;;  %v2724_v61 = vmul.u32 %v2717_v57, %v2708_v53  ;;  %v5603_v53 = vld [vmem:[%s6810_s2] ss:$0 sm:$0xff] }
 0x243   :  { %vm3818_vm5 = vcmp.lt.s32.totalorder %v3817_v39, 0  ;;  %vm2726_vm6 = vc.u32 %v5546_v41, %v5540_v62  ;;  %v2984_v16 = vand.u32 2139095040, %v5549_v4  ;;  %v1094_v6 = vsel %vm5553_vm0, 0, %v1092_v45 }
 0x244   :  { %v1076_v63 = vsel %vm3818_vm5, 0, %v3817_v39  ;;  %v2728_v14 = vsel %vm2726_vm6, %v2727_v59, %v5541_v23  ;;  %v3827_v26 = vadd.s32 4294967169, %v1321_v58  ;;  %v1324_v10 = vand.u32 8388607, %v1317_v25 }
 0x245   :  { %v1077_v37 = vsub.s32 32, %v1076_v63  ;;  %v1081_v56 = vsub.s32 4294967266, %v1076_v63  ;;  %v4194_v31 = vpop.eup %4193  ;;  %v2729_v48 = vadd.s32 %v2728_v14, %v2724_v61  ;;  %v2981_v7 = vand.u32 2147483647, %v5549_v4 }
 0x246   :  { %v4196_v27 = vpop.eup %4195  ;;  %v2873_v28 = vxor.u32 2147483648, %v4194_v31  ;;  %v1078_v8 = vshll.u32 %v5533_v19, %v1076_v63  ;;  %v1327_v57 = vadd.s32 1, %v3827_v26  ;;  %v2985_v46 = vshrl.u32 %v2984_v16, 23 }
 0x247   :  { %v1079_v40 = vshrl.u32 %v1061_v34, %v1077_v37  ;;  %v1082_v54 = vadd.s32 127, %v1081_v56  ;;  %v2870_v36 = vxor.u32 2147483648, %v4196_v27  ;;  %v2730_v21 = vadd.s32 536870912, %v2729_v48 }
 0x248   :  { %v2874_v43 = vsel %vm2872_vm4, %v2873_v28, %v4196_v27  ;;  %v1098_v30 = vadd.s32 3, %v1094_v6  ;;  %v1325_v0 = vor.u32 8388608, %v1324_v10  ;;  %vm1328_vm7 = vcmp.gt.s32.totalorder %v1327_v57, 0 }
 0x249   :  { %v1080_v52 = vor.u32 %v1079_v40, %v1078_v8  ;;  %v1083_v17 = vshll.u32 %v1082_v54, 23  ;;  %v2871_v33 = vsel %vm2869_vm2, %v4194_v31, %v2870_v36  ;;  %v5583_v38 = vshrl.u32 %v2730_v21, 30 }
 0x24a   :  { %v2875_v19 = vsel %vm2868_vm1, %v2871_v33, %v2874_v43  ;;  %v1329_v20 = vsel %vm1328_vm7, %v1327_v57, 0  ;;  %v5589_v51 = vand.u32 8388607, %v2981_v7  ;;  %v3891_v50 = vadd.s32 4294967169, %v2985_v46 }
 0x24b   :  { %v1084_v49 = vor.u32 4788187, %v1083_v17  ;;  %v2876_v44 = vsel %vm2865_vm3, nan, %v2875_v19  ;;  %v2732_v2 = vshll.u32 %v5583_v38, 30  ;;  %v1087_v23 = vcvt.s32.f32 %v1080_v52 }
 0x24c   :  { %3732 = vst [vmem:[#allocation2 + $0xb8] sm:$0xff] %v2876_v44  ;;  %v1331_v29 = vand.u32 31, %v1329_v20  ;;  %v5594_v47 = vand.u32 3, %v1098_v30  ;;  %v2725_v32 = vadd.s32 %v5540_v62, %v5546_v41  ;;  %v5606_v24 = vadd.f32 %v5603_v53, %v262_v60 }
 0x24d   :  { %v1085_v12 = vand.u32 2147483647, %v1084_v49  ;;  %v5598_v39 = vsub.s32 %v2729_v48, %v2732_v2  ;;  %v5608_v59 = vshll.u32 %v1325_v0, 8  ;;  %v2989_v34 = vor.u32 8388608, %v5589_v51 }
 0x24e   :  { %v1332_v45 = vsub.s32 32, %v1331_v29  ;;  %v1330_v63 = vshrl.u32 %v1329_v20, 5  ;;  %v1334_v62 = vshll.u32 %v4296_v5, %v1331_v29  ;;  %v2991_v41 = vadd.s32 1, %v3891_v50 }
 0x24f   :  { %v1088_v18 = vmul.f32 %v1087_v23, %v1085_v12  ;;  %v2735_v58 = vsub.s32 0, %v5598_v39  ;;  %v1337_v37 = vshll.u32 %v4297_v9, %v1331_v29  ;;  %v1340_v14 = vshll.u32 %v4298_v11, %v1331_v29 }
 0x250   :  { %v1335_v16 = vshrl.u32 %v4297_v9, %v1332_v45  ;;  %v1338_v56 = vshrl.u32 %v4298_v11, %v1332_v45  ;;  %v1341_v31 = vshrl.u32 %v4299_v13, %v1332_v45  ;;  %v1343_v48 = vshll.u32 %v4299_v13, %v1331_v29 }
 0x251   :  { %v1089_v61 = vxor.u32 2147483648, %v1088_v18  ;;  %v3880_v6 = vmin.u32 %v2735_v58, %v5598_v39  ;;  %v1344_v28 = vshrl.u32 %v4300_v15, %v1332_v45  ;;  %v2755_v54 = vsub.s32 4, %v5583_v38 }
 0x252   :  { %v1336_v10 = vor.u32 %v1335_v16, %v1334_v62  ;;  %v1339_v27 = vor.u32 %v1338_v56, %v1337_v37  ;;  %vm2992_vm8 = vcmp.gt.s32.totalorder %v2991_v41, 0  ;;  %v1342_v36 = vor.u32 %v1341_v31, %v1340_v14 }
 0x253   :  { %v1090_v26 = vsel %vm1007_vm15, %v1089_v61, %v1088_v18  ;;  %v2737_v40 = vclz %v3880_v6  ;;  %v1345_v21 = vor.u32 %v1344_v28, %v1343_v48  ;;  %vm1349_vm9 = vcmp.lt.s32.totalorder %v1330_v63, 1 }
 0x254   :  { %v1093_v8 = vsel %vm5553_vm0, %v5404_v1, %v1090_v26  ;;  %vm2671_vm10 = vcmp.lt.s32.totalorder %v5426_v42, 0  ;;  %v1346_v46 = vshll.u32 %v4300_v15, %v1331_v29  ;;  %v1347_v43 = vshrl.u32 %v4301_v22, %v1332_v45 }
 0x255   :  { %4197 = vcosq.f32 %v1093_v8  ;;  %v3881_v57 = vadd.s32 4294967294, %v2737_v40  ;;  %v1333_v52 = vshrl.u32 %v4296_v5, %v1332_v45  ;;  %vm1351_vm12 = vcmp.lt.s32.totalorder %v1330_v63, 3 }
 0x256   :  { %4199 = vsinq.f32 %v1093_v8  ;;  %vm1352_vm11 = vcmp.lt.s32.totalorder %v1330_v63, 4  ;;  %v1357_v3 = vsel %vm1349_vm9, %v1336_v10, %v1339_v27  ;;  %v1348_v17 = vor.u32 %v1347_v43, %v1346_v46 }
 0x257   :  { %vm3882_vm13 = vcmp.lt.s32.totalorder %v3881_v57, 0  ;;  %v1354_v30 = vsel %vm1352_vm11, %v1342_v36, 2102212464  ;;  %v1358_v33 = vsel %vm1352_vm11, %v1345_v21, 920167782  ;;  %v1353_v19 = vsel %vm1349_vm9, %v1333_v52, %v1336_v10 }
 0x258   :  { %v2740_v0 = vsel %vm3882_vm13, 0, %v3881_v57  ;;  %v1355_v49 = vsel %vm1351_vm12, %v1339_v27, %v1354_v30  ;;  %v1359_v20 = vsel %vm1351_vm12, %v1342_v36, %v1358_v33  ;;  %vm1350_vm14 = vcmp.lt.s32.totalorder %v1330_v63, 2 }
 0x259   :  { %v2741_v60 = vsub.s32 32, %v2740_v0  ;;  %v2745_v44 = vsub.s32 4294967266, %v2740_v0  ;;  %v1361_v2 = vsel %vm1349_vm9, %v1339_v27, %v1342_v36  ;;  %v2742_v50 = vshll.u32 %v5598_v39, %v2740_v0 }
 0x25a   :  { %v1360_v12 = vsel %vm1350_vm14, %v1357_v3, %v1359_v20  ;;  %v1362_v23 = vsel %vm1352_vm11, %v1348_v17, 1326507024  ;;  %v2993_v29 = vsel %vm2992_vm8, %v2991_v41, 0  ;;  %v1356_v58 = vsel %vm1350_vm14, %v1353_v19, %v1355_v49 }
 0x25b   :  { %v2743_v18 = vshrl.u32 %v2725_v32, %v2741_v60  ;;  %v2746_v45 = vadd.s32 127, %v2745_v44  ;;  %v1363_v62 = vsel %vm1351_vm12, %v1345_v21, %v1362_v23  ;;  %vm1101_vm15 = vcmp.eq.s32.totalorder %v5594_v47, 0 }
 0x25c   :  { %v1364_v61 = vsel %vm1350_vm14, %v1361_v2, %v1363_v62  ;;  %v5644_v16 = vmul.u32.u64.low %v5608_v59, %v1360_v12  ;;  %v5645_v37 = vmul.u32.u64.high %v5608_v59, %v1360_v12, %v5644_v16  ;;  %v2995_v56 = vand.u32 31, %v2993_v29 }
 0x25d   :  { %vm1100_vm0 = vcmp.lt.s32.totalorder %v5594_v47, 2  ;;  %vm5651_vm1 = vcmp.le.f32.partialorder %v2669_v35, 0.7853982  ;;  %v2744_v32 = vor.u32 %v2743_v18, %v2742_v50  ;;  %v2747_v63 = vshll.u32 %v2746_v45, 23 }
 0x25e   :  { %v5656_v41 = vmul.u32.u64.low %v5608_v59, %v1364_v61  ;;  %v5657_v6 = vmul.u32.u64.high %v5608_v59, %v1364_v61, %v5656_v41  ;;  %vm1097_vm2 = vweird.f32 %v5404_v1  ;;  %vm1104_vm3 = vcmp.eq.s32.totalorder %v5594_v47, 2 }
 0x25f   :  { %v2756_v14 = vsel %vm2671_vm10, %v2755_v54, %v5583_v38  ;;  %v2996_v31 = vsub.s32 32, %v2995_v56  ;;  %v5666_v35 = vshll.u32 %v2989_v34, 8  ;;  %v2748_v48 = vor.u32 4788187, %v2747_v63 }
 0x260   :  { %v1372_v26 = vmul.u32 %v5608_v59, %v1356_v58  ;;  %v5669_v10 = vshrl.u32 %v2993_v29, 5  ;;  %v2998_v27 = vshll.u32 %v4296_v5, %v2995_v56  ;;  %v1375_v28 = vadd.s32 1, %v5645_v37 }
 0x261   :  { %v2999_v8 = vshrl.u32 %v4297_v9, %v2996_v31  ;;  %v3001_v40 = vshll.u32 %v4297_v9, %v2995_v56  ;;  %v3004_v38 = vshll.u32 %v4298_v11, %v2995_v56  ;;  %v2749_v36 = vand.u32 2147483647, %v2748_v48 }
 0x262   :  { %v4198_v54 = vpop.eup %4197  ;;  %v2751_v51 = vcvt.s32.f32 %v2744_v32  ;;  %vm1374_vm4 = vc.u32 %v5657_v6, %v5644_v16  ;;  %v3002_v59 = vshrl.u32 %v4298_v11, %v2996_v31  ;;  %v3005_v46 = vshrl.u32 %v4299_v13, %v2996_v31 }
 0x263   :  { %v4200_v34 = vpop.eup %4199  ;;  %v1105_v21 = vxor.u32 2147483648, %v4198_v54  ;;  %v1376_v57 = vsel %vm1374_vm4, %v1375_v28, %v5645_v37  ;;  %v3007_v43 = vshll.u32 %v4299_v13, %v2995_v56  ;;  %v3010_v30 = vshll.u32 %v4300_v15, %v2995_v56 }
 0x264   :  { %v1102_v52 = vxor.u32 2147483648, %v4200_v34  ;;  %v2752_v3 = vmul.f32 %v2751_v51, %v2749_v36  ;;  %v1377_v17 = vadd.s32 %v1376_v57, %v1372_v26  ;;  %v3000_v0 = vor.u32 %v2999_v8, %v2998_v27 }
 0x265   :  { %v1106_v33 = vsel %vm1104_vm3, %v1105_v21, %v4200_v34  ;;  %v3008_v19 = vshrl.u32 %v4300_v15, %v2996_v31  ;;  %v3011_v49 = vshrl.u32 %v4301_v22, %v2996_v31  ;;  %v3003_v2 = vor.u32 %v3002_v59, %v3001_v40 }
 0x266   :  { %v1103_v20 = vsel %vm1101_vm15, %v4198_v54, %v1102_v52  ;;  %v2753_v60 = vxor.u32 2147483648, %v2752_v3  ;;  %v1378_v44 = vadd.s32 536870912, %v1377_v17  ;;  %v2758_v12 = vsel %vm5651_vm1, 0, %v2756_v14 }
 0x267   :  { %v1107_v50 = vsel %vm1100_vm0, %v1103_v20, %v1106_v33  ;;  %v3006_v23 = vor.u32 %v3005_v46, %v3004_v38  ;;  %v3009_v29 = vor.u32 %v3008_v19, %v3007_v43  ;;  %v3012_v62 = vor.u32 %v3011_v49, %v3010_v30  ;;  %v342_v49 = vpop.f32.mrf.mxu1 }
 0x268   :  { %v1108_v18 = vsel %vm1097_vm2, nan, %v1107_v50  ;;  %v2754_v45 = vsel %vm2671_vm10, %v2753_v60, %v2752_v3  ;;  %v1379_v58 = vshrl.u32 %v1378_v44, 30  ;;  %v2997_v47 = vshrl.u32 %v4296_v5, %v2996_v31 }
 0x269   :  { %3715 = vst [vmem:[#allocation2 + $0x30] sm:$0xff] %v1108_v18  ;;  %v2757_v61 = vsel %vm5651_vm1, %v5426_v42, %v2754_v45  ;;  %vm3013_vm5 = vcmp.lt.s32.totalorder %v5669_v10, 1  ;;  %vm3015_vm6 = vcmp.lt.s32.totalorder %v5669_v10, 3  ;;  %vm3016_vm7 = vcmp.lt.s32.totalorder %v5669_v10, 4 }
 0x26a   :  { %4201 = vcosq.f32 %v2757_v61  ;;  %v1380_v37 = vshll.u32 %v1379_v58, 30  ;;  %v3021_v1 = vsel %vm3013_vm5, %v3000_v0, %v3003_v2  ;;  %v3018_v56 = vsel %vm3016_vm7, %v3006_v23, 2102212464 }
 0x26b   :  { %4203 = vsinq.f32 %v2757_v61  ;;  %v3022_v32 = vsel %vm3016_vm7, %v3009_v29, 920167782  ;;  %v3025_v39 = vsel %vm3013_vm5, %v3003_v2, %v3006_v23  ;;  %vm3014_vm8 = vcmp.lt.s32.totalorder %v5669_v10, 2 }
 0x26c   :  { %v5708_v63 = vsub.s32 %v1377_v17, %v1380_v37  ;;  %v3023_v41 = vsel %vm3015_vm6, %v3006_v23, %v3022_v32  ;;  %v3026_v14 = vsel %vm3016_vm7, %v3012_v62, 1326507024  ;;  %v2762_v31 = vadd.s32 3, %v2758_v12 }
 0x26d   :  { %v1403_v48 = vsub.s32 4, %v1379_v58  ;;  %v3024_v26 = vsel %vm3014_vm8, %v3021_v1, %v3023_v41  ;;  %v3027_v27 = vsel %vm3015_vm6, %v3009_v29, %v3026_v14  ;;  %v3017_v8 = vsel %vm3013_vm5, %v2997_v47, %v3000_v0 }
 0x26e   :  { %v1383_v28 = vsub.s32 0, %v5708_v63  ;;  %v3019_v40 = vsel %vm3015_vm6, %v3003_v2, %v3018_v56  ;;  %v3028_v38 = vsel %vm3014_vm8, %v3025_v39, %v3027_v27  ;;  %vm1319_vm9 = vcmp.lt.s32.totalorder %v5531_v55, 0 }
 0x26f   :  { %v5725_v54 = vmul.u32.u64.low %v5666_v35, %v3028_v38  ;;  %v5726_v36 = vmul.u32.u64.high %v5666_v35, %v3028_v38, %v5725_v54  ;;  %v5729_v51 = vmul.u32.u64.low %v5666_v35, %v3024_v26  ;;  %v5730_v59 = vmul.u32.u64.high %v5666_v35, %v3024_v26, %v5729_v51 }
 0x270   :  { %v3828_v34 = vmin.u32 %v1383_v28, %v5708_v63  ;;  %v2763_v21 = vand.u32 3, %v2762_v31  ;;  %v1404_v57 = vsel %vm1319_vm9, %v1403_v48, %v1379_v58  ;;  %v3020_v46 = vsel %vm3014_vm8, %v3017_v8, %v3019_v40 }
 0x271   :  { %v1216_v43 = vand.u32 2139095040, %v5606_v24  ;;  %vm5741_vm10 = vcmp.le.f32.partialorder %v1317_v25, 0.7853982  ;;  %vm3038_vm12 = vc.u32 %v5726_v36, %v5729_v51  ;;  %v3039_v17 = vadd.s32 1, %v5730_v59 }
 0x272   :  { %v1385_v52 = vclz %v3828_v34  ;;  %v1406_v0 = vsel %vm5741_vm10, 0, %v1404_v57  ;;  %v3036_v10 = vmul.u32 %v5666_v35, %v3020_v46  ;;  %v1213_v19 = vand.u32 2147483647, %v5606_v24 }
 0x273   :  { %v1217_v30 = vshrl.u32 %v1216_v43, 23  ;;  %vm2764_vm11 = vcmp.lt.s32.totalorder %v2763_v21, 2  ;;  %vm2765_vm13 = vcmp.eq.s32.totalorder %v2763_v21, 0  ;;  %v3040_v25 = vsel %vm3038_vm12, %v3039_v17, %v5730_v59 }
 0x274   :  { %v3829_v33 = vadd.s32 4294967294, %v1385_v52  ;;  %vm2768_vm14 = vcmp.eq.s32.totalorder %v2763_v21, 2  ;;  %v1373_v60 = vadd.s32 %v5644_v16, %v5657_v6  ;;  %v3041_v44 = vadd.s32 %v3040_v25, %v3036_v10 }
 0x275   :  { %v3823_v20 = vadd.s32 4294967169, %v1217_v30  ;;  %v1410_v12 = vadd.s32 3, %v1406_v0  ;;  %v5755_v35 = vadd.f32 %v5603_v53, %v342_v49  ;;  %v1220_v62 = vand.u32 8388607, %v1213_v19 }
 0x276   :  { %vm3830_vm15 = vcmp.lt.s32.totalorder %v3829_v33, 0  ;;  %v3042_v16 = vadd.s32 536870912, %v3041_v44  ;;  %vm2761_vm1 = vweird.f32 %v5426_v42  ;;  %vm2983_vm2 = vcmp.lt.s32.totalorder %v5549_v4, 0 }
 0x277   :  { %v4202_v2 = vpop.eup %4201  ;;  %v1388_v50 = vsel %vm3830_vm15, 0, %v3829_v33  ;;  %v1223_v23 = vadd.s32 1, %v3823_v20  ;;  %v2880_v14 = vand.u32 2139095040, %v5755_v35  ;;  %v5766_v40 = vand.u32 3, %v1410_v12 }
 0x278   :  { %v4204_v29 = vpop.eup %4203  ;;  %v2769_v18 = vxor.u32 2147483648, %v4202_v2  ;;  %v1389_v45 = vsub.s32 32, %v1388_v50  ;;  %v1393_v58 = vsub.s32 4294967266, %v1388_v50  ;;  %v1390_v47 = vshll.u32 %v5708_v63, %v1388_v50 }
 0x279   :  { %v2766_v61 = vxor.u32 2147483648, %v4204_v29  ;;  %vm1224_vm0 = vcmp.gt.s32.totalorder %v1223_v23, 0  ;;  %v3043_v39 = vshrl.u32 %v3042_v16, 30  ;;  %v3037_v38 = vadd.s32 %v5729_v51, %v5726_v36 }
 0x27a   :  { %v2770_v6 = vsel %vm2768_vm14, %v2769_v18, %v4204_v29  ;;  %v1391_v37 = vshrl.u32 %v1373_v60, %v1389_v45  ;;  %v1394_v1 = vadd.s32 127, %v1393_v58  ;;  %v1225_v56 = vsel %vm1224_vm0, %v1223_v23, 0 }
 0x27b   :  { %v2767_v32 = vsel %vm2765_vm13, %v4202_v2, %v2766_v61  ;;  %v1227_v41 = vand.u32 31, %v1225_v56  ;;  %v3044_v27 = vshll.u32 %v3043_v39, 30  ;;  %v1221_v54 = vor.u32 8388608, %v1220_v62 }
 0x27c   :  { %v2771_v31 = vsel %vm2764_vm11, %v2767_v32, %v2770_v6  ;;  %v1392_v48 = vor.u32 %v1391_v37, %v1390_v47  ;;  %v1395_v26 = vshll.u32 %v1394_v1, 23  ;;  %v3067_v34 = vsub.s32 4, %v3043_v39 }
 0x27d   :  { %v2772_v63 = vsel %vm2761_vm1, nan, %v2771_v31  ;;  %v1228_v28 = vsub.s32 32, %v1227_v41  ;;  %v5769_v59 = vsub.s32 %v3041_v44, %v3044_v27  ;;  %v2881_v21 = vshrl.u32 %v2880_v14, 23 }
 0x27e   :  { %3731 = vst [vmem:[#allocation2 + $0xb0] sm:$0xff] %v2772_v63  ;;  %v1396_v8 = vor.u32 4788187, %v1395_v26  ;;  %v1399_v46 = vcvt.s32.f32 %v1392_v48  ;;  %v1230_v43 = vshll.u32 %v4296_v5, %v1227_v41  ;;  %v1233_v30 = vshll.u32 %v4297_v9, %v1227_v41 }
 0x27f   :  { %v1231_v42 = vshrl.u32 %v4297_v9, %v1228_v28  ;;  %v1234_v52 = vshrl.u32 %v4298_v11, %v1228_v28  ;;  %v3047_v17 = vsub.s32 0, %v5769_v59  ;;  %v1236_v33 = vshll.u32 %v4298_v11, %v1227_v41 }
 0x280   :  { %v1397_v57 = vand.u32 2147483647, %v1396_v8  ;;  %v1237_v36 = vshrl.u32 %v4299_v13, %v1228_v28  ;;  %v1226_v0 = vshrl.u32 %v1225_v56, 5  ;;  %v1239_v10 = vshll.u32 %v4299_v13, %v1227_v41 }
 0x281   :  { %v1240_v49 = vshrl.u32 %v4300_v15, %v1228_v28  ;;  %v3892_v25 = vmin.u32 %v3047_v17, %v5769_v59  ;;  %v1232_v20 = vor.u32 %v1231_v42, %v1230_v43  ;;  %v1235_v60 = vor.u32 %v1234_v52, %v1233_v30 }
 0x282   :  { %v1400_v51 = vmul.f32 %v1399_v46, %v1397_v57  ;;  %v1238_v44 = vor.u32 %v1237_v36, %v1236_v33  ;;  %v1242_v12 = vshll.u32 %v4300_v15, %v1227_v41  ;;  %v1243_v23 = vshrl.u32 %v4301_v22, %v1228_v28 }
 0x283   :  { %v1241_v50 = vor.u32 %v1240_v49, %v1239_v10  ;;  %vm5785_vm3 = vcmp.le.f32.partialorder %v2981_v7, 0.7853982  ;;  %v3049_v18 = vclz %v3892_v25  ;;  %v3068_v45 = vsel %vm2983_vm2, %v3067_v34, %v3043_v39  ;;  %v3971_v49 = vpop.f32.mrf.mxu0 }
 0x284   :  { %v1401_v2 = vxor.u32 2147483648, %v1400_v51  ;;  %v1261_v58 = vshll.u32 %v1221_v54, 8  ;;  %v3887_v62 = vadd.s32 4294967169, %v2881_v21  ;;  %v1229_v47 = vshrl.u32 %v4296_v5, %v1228_v28 }
 0x285   :  { %v1244_v16 = vor.u32 %v1243_v23, %v1242_v12  ;;  %vm1245_vm4 = vcmp.lt.s32.totalorder %v1226_v0, 1  ;;  %v3893_v6 = vadd.s32 4294967294, %v3049_v18  ;;  %vm1247_vm5 = vcmp.lt.s32.totalorder %v1226_v0, 3 }
 0x286   :  { %v1402_v61 = vsel %vm1319_vm9, %v1401_v2, %v1400_v51  ;;  %vm1248_vm6 = vcmp.lt.s32.totalorder %v1226_v0, 4  ;;  %v1253_v1 = vsel %vm1245_vm4, %v1232_v20, %v1235_v60  ;;  %vm1246_vm8 = vcmp.lt.s32.totalorder %v1226_v0, 2 }
 0x287   :  { %v1405_v7 = vsel %vm5741_vm10, %v5531_v55, %v1402_v61  ;;  %v1250_v37 = vsel %vm1248_vm6, %v1238_v44, 2102212464  ;;  %v1254_v56 = vsel %vm1248_vm6, %v1241_v50, 920167782  ;;  %vm3894_vm7 = vcmp.lt.s32.totalorder %v3893_v6, 0 }
 0x288   :  { %4205 = vcosq.f32 %v1405_v7  ;;  %v1255_v32 = vsel %vm1247_vm5, %v1238_v44, %v1254_v56  ;;  %v3052_v39 = vsel %vm3894_vm7, 0, %v3893_v6  ;;  %v1249_v41 = vsel %vm1245_vm4, %v1229_v47, %v1232_v20 }
 0x289   :  { %4207 = vsinq.f32 %v1405_v7  ;;  %v1256_v3 = vsel %vm1246_vm8, %v1253_v1, %v1255_v32  ;;  %v1257_v14 = vsel %vm1245_vm4, %v1235_v60, %v1238_v44  ;;  %v3053_v31 = vsub.s32 32, %v3052_v39 }
 0x28a   :  { %v3057_v48 = vsub.s32 4294967266, %v3052_v39  ;;  %v1251_v26 = vsel %vm1247_vm5, %v1235_v60, %v1250_v37  ;;  %v1258_v63 = vsel %vm1248_vm6, %v1244_v16, 1326507024  ;;  %v3054_v27 = vshll.u32 %v5769_v59, %v3052_v39 }
 0x28b   :  { %v1259_v28 = vsel %vm1247_vm5, %v1241_v50, %v1258_v63  ;;  %v5808_v8 = vmul.u32.u64.low %v1261_v58, %v1256_v3  ;;  %v5809_v54 = vmul.u32.u64.high %v1261_v58, %v1256_v3, %v5808_v8  ;;  %v3055_v34 = vshrl.u32 %v3037_v38, %v3053_v31 }
 0x28c   :  { %v3058_v42 = vadd.s32 127, %v3057_v48  ;;  %v1260_v21 = vsel %vm1246_vm8, %v1257_v14, %v1259_v28  ;;  %v2887_v57 = vadd.s32 1, %v3887_v62  ;;  %v3070_v46 = vsel %vm5785_vm3, 0, %v3068_v45 }
 0x28d   :  { %v5815_v43 = vmul.u32.u64.low %v1261_v58, %v1260_v21  ;;  %v5816_v52 = vmul.u32.u64.high %v1261_v58, %v1260_v21, %v5815_v43  ;;  %v2877_v17 = vand.u32 2147483647, %v5755_v35  ;;  %v3056_v59 = vor.u32 %v3055_v34, %v3054_v27 }
 0x28e   :  { %v3059_v30 = vshll.u32 %v3058_v42, 23  ;;  %v1252_v33 = vsel %vm1246_vm8, %v1249_v41, %v1251_v26  ;;  %vm2888_vm9 = vcmp.gt.s32.totalorder %v2887_v57, 0  ;;  %v1271_v36 = vadd.s32 1, %v5809_v54 }
 0x28f   :  { %v2889_v38 = vsel %vm2888_vm9, %v2887_v57, 0  ;;  %vm1412_vm10 = vcmp.lt.s32.totalorder %v5766_v40, 2  ;;  %vm1413_vm12 = vcmp.eq.s32.totalorder %v5766_v40, 0  ;;  %vm1416_vm11 = vcmp.eq.s32.totalorder %v5766_v40, 2 }
 0x290   :  { %v3060_v51 = vor.u32 4788187, %v3059_v30  ;;  %v2891_v10 = vand.u32 31, %v2889_v38  ;;  %vm1409_vm13 = vweird.f32 %v5531_v55  ;;  %v3074_v25 = vadd.s32 3, %v3070_v46 }
 0x291   :  { %v1268_v20 = vmul.u32 %v1261_v58, %v1252_v33  ;;  %vm1270_vm14 = vc.u32 %v5816_v52, %v5808_v8  ;;  %v2884_v0 = vand.u32 8388607, %v2877_v17  ;;  %v3063_v44 = vcvt.s32.f32 %v3056_v59 }
 0x292   :  { %v3061_v60 = vand.u32 2147483647, %v3060_v51  ;;  %v1272_v2 = vsel %vm1270_vm14, %v1271_v36, %v5809_v54  ;;  %v2892_v50 = vsub.s32 32, %v2891_v10  ;;  %v5830_v23 = vshrl.u32 %v2889_v38, 5 }
 0x293   :  { %v1273_v12 = vadd.s32 %v1272_v2, %v1268_v20  ;;  %v2894_v18 = vshll.u32 %v4296_v5, %v2891_v10  ;;  %v5834_v45 = vadd.f32 %v5603_v53, %v3971_v49  ;;  %v2897_v47 = vshll.u32 %v4297_v9, %v2891_v10 }
 0x294   :  { %v3064_v62 = vmul.f32 %v3063_v44, %v3061_v60  ;;  %v2895_v61 = vshrl.u32 %v4297_v9, %v2892_v50  ;;  %v2898_v16 = vshrl.u32 %v4298_v11, %v2892_v50  ;;  %v2900_v1 = vshll.u32 %v4298_v11, %v2891_v10 }
 0x295   :  { %v4206_v58 = vpop.eup %4205  ;;  %v1274_v37 = vadd.s32 536870912, %v1273_v12  ;;  %v2901_v56 = vshrl.u32 %v4299_v13, %v2892_v50  ;;  %v2903_v41 = vshll.u32 %v4299_v13, %v2891_v10  ;;  %v2904_v3 = vshrl.u32 %v4300_v15, %v2892_v50 }
 0x296   :  { %v4208_v7 = vpop.eup %4207  ;;  %v1417_v6 = vxor.u32 2147483648, %v4206_v58  ;;  %v3065_v39 = vxor.u32 2147483648, %v3064_v62  ;;  %v2896_v48 = vor.u32 %v2895_v61, %v2894_v18  ;;  %v2899_v26 = vor.u32 %v2898_v16, %v2897_v47 }
 0x297   :  { %v1414_v32 = vxor.u32 2147483648, %v4208_v7  ;;  %v5845_v31 = vshrl.u32 %v1274_v37, 30  ;;  %v2906_v28 = vshll.u32 %v4300_v15, %v2891_v10  ;;  %v2907_v54 = vshrl.u32 %v4301_v22, %v2892_v50 }
 0x298   :  { %v1418_v14 = vsel %vm1416_vm11, %v1417_v6, %v4208_v7  ;;  %v3066_v27 = vsel %vm2983_vm2, %v3065_v39, %v3064_v62  ;;  %v2902_v57 = vor.u32 %v2901_v56, %v2900_v1  ;;  %v2905_v43 = vor.u32 %v2904_v3, %v2903_v41  ;;  %v3995_v7 = vpop.f32.mrf.mxu1 }
 0x299   :  { %v1415_v63 = vsel %vm1413_vm12, %v4206_v58, %v1414_v32  ;;  %v3069_v42 = vsel %vm5785_vm3, %v5549_v4, %v3066_v27  ;;  %v1276_v21 = vshll.u32 %v5845_v31, 30  ;;  %v2908_v59 = vor.u32 %v2907_v54, %v2906_v28 }
 0x29a   :  { %v1419_v34 = vsel %vm1412_vm10, %v1415_v63, %v1418_v14  ;;  %4209 = vcosq.f32 %v3069_v42  ;;  %v5863_v33 = vand.u32 3, %v3074_v25  ;;  %v2885_v40 = vor.u32 8388608, %v2884_v0 }
 0x29b   :  { %v1420_v46 = vsel %vm1409_vm13, nan, %v1419_v34  ;;  %4211 = vsinq.f32 %v3069_v42  ;;  %v5861_v30 = vsub.s32 %v1273_v12, %v1276_v21  ;;  %vm2909_vm15 = vcmp.lt.s32.totalorder %v5830_v23, 1 }
 0x29c   :  { %3718 = vst [vmem:[#allocation2 + $0x48] sm:$0xff] %v1420_v46  ;;  %v1528_v29 = vand.u32 2139095040, %v5834_v45  ;;  %vm2911_vm0 = vcmp.lt.s32.totalorder %v5830_v23, 3  ;;  %vm2912_vm1 = vcmp.lt.s32.totalorder %v5830_v23, 4  ;;  %v2917_v55 = vsel %vm2909_vm15, %v2896_v48, %v2899_v26 }
 0x29d   :  { %v1279_v36 = vsub.s32 0, %v5861_v30  ;;  %v2893_v38 = vshrl.u32 %v4296_v5, %v2892_v50  ;;  %v2914_v51 = vsel %vm2912_vm1, %v2902_v57, 2102212464  ;;  %v2918_v10 = vsel %vm2912_vm1, %v2905_v43, 920167782 }
 0x29e   :  { %v2922_v49 = vsel %vm2912_vm1, %v2908_v59, 1326507024  ;;  %vm2910_vm2 = vcmp.lt.s32.totalorder %v5830_v23, 2  ;;  %v2919_v20 = vsel %vm2911_vm0, %v2902_v57, %v2918_v10  ;;  %v2921_v0 = vsel %vm2909_vm15, %v2899_v26, %v2902_v57 }
 0x29f   :  { %v3824_v25 = vmin.u32 %v1279_v36, %v5861_v30  ;;  %v2920_v60 = vsel %vm2910_vm2, %v2917_v55, %v2919_v20  ;;  %v2923_v44 = vsel %vm2911_vm0, %v2905_v43, %v2922_v49  ;;  %v2925_v2 = vshll.u32 %v2885_v40, 8 }
 0x2a0   :  { %v1529_v50 = vshrl.u32 %v1528_v29, 23  ;;  %v2913_v18 = vsel %vm2909_vm15, %v2893_v38, %v2896_v48  ;;  %v2915_v58 = vsel %vm2911_vm0, %v2899_v26, %v2914_v51  ;;  %v2924_v62 = vsel %vm2910_vm2, %v2921_v0, %v2923_v44 }
 0x2a1   :  { %v1281_v12 = vclz %v3824_v25  ;;  %v5889_v61 = vmul.u32.u64.low %v2925_v2, %v2920_v60  ;;  %v5890_v47 = vmul.u32.u64.high %v2925_v2, %v2920_v60, %v5889_v61  ;;  %v1299_v37 = vsub.s32 4, %v5845_v31 }
 0x2a2   :  { %v3835_v16 = vadd.s32 4294967169, %v1529_v50  ;;  %v5894_v1 = vmul.u32.u64.low %v2925_v2, %v2924_v62  ;;  %v5895_v56 = vmul.u32.u64.high %v2925_v2, %v2924_v62, %v5894_v1  ;;  %vm3073_vm3 = vweird.f32 %v5549_v4 }
 0x2a3   :  { %v3825_v6 = vadd.s32 4294967294, %v1281_v12  ;;  %vm3077_vm4 = vcmp.eq.s32.totalorder %v5863_v33, 0  ;;  %vm1215_vm5 = vcmp.lt.s32.totalorder %v5606_v24, 0  ;;  %v2916_v32 = vsel %vm2910_vm2, %v2913_v18, %v2915_v58 }
 0x2a4   :  { %v1535_v39 = vadd.s32 1, %v3835_v16  ;;  %vm3080_vm6 = vcmp.eq.s32.totalorder %v5863_v33, 2  ;;  %v1525_v41 = vand.u32 2147483647, %v5834_v45  ;;  %v5905_v3 = vadd.f32 %v5603_v53, %v3995_v7 }
 0x2a5   :  { %vm3826_vm7 = vcmp.lt.s32.totalorder %v3825_v6, 0  ;;  %v1269_v14 = vadd.s32 %v5808_v8, %v5816_v52  ;;  %v2935_v26 = vadd.s32 1, %v5890_v47  ;;  %v1300_v28 = vsel %vm1215_vm5, %v1299_v37, %v5845_v31 }
 0x2a6   :  { %v1284_v48 = vsel %vm3826_vm7, 0, %v3825_v6  ;;  %vm1536_vm8 = vcmp.gt.s32.totalorder %v1535_v39, 0  ;;  %v2932_v54 = vmul.u32 %v2925_v2, %v2916_v32  ;;  %vm2934_vm9 = vc.u32 %v5895_v56, %v5889_v61 }
 0x2a7   :  { %v4210_v63 = vpop.eup %4209  ;;  %v1285_v27 = vsub.s32 32, %v1284_v48  ;;  %v1289_v23 = vsub.s32 4294967266, %v1284_v48  ;;  %v1286_v21 = vshll.u32 %v5861_v30, %v1284_v48  ;;  %v1537_v8 = vsel %vm1536_vm8, %v1535_v39, 0 }
 0x2a8   :  { %v4212_v34 = vpop.eup %4211  ;;  %v3081_v42 = vxor.u32 2147483648, %v4210_v63  ;;  %v2936_v43 = vsel %vm2934_vm9, %v2935_v26, %v5890_v47  ;;  %v1532_v31 = vand.u32 8388607, %v1525_v41  ;;  %v1539_v29 = vand.u32 31, %v1537_v8 }
 0x2a9   :  { %v3078_v52 = vxor.u32 2147483648, %v4212_v34  ;;  %v1287_v57 = vshrl.u32 %v1269_v14, %v1285_v27  ;;  %v1290_v46 = vadd.s32 127, %v1289_v23  ;;  %v2937_v40 = vadd.s32 %v2936_v43, %v2932_v54 }
 0x2aa   :  { %v3082_v59 = vsel %vm3080_vm6, %v3081_v42, %v4212_v34  ;;  %vm3076_vm10 = vcmp.lt.s32.totalorder %v5863_v33, 2  ;;  %vm5926_vm12 = vcmp.le.f32.partialorder %v1213_v19, 0.7853982  ;;  %v1540_v49 = vsub.s32 32, %v1539_v29 }
 0x2ab   :  { %v3079_v30 = vsel %vm3077_vm4, %v4210_v63, %v3078_v52  ;;  %v1288_v36 = vor.u32 %v1287_v57, %v1286_v21  ;;  %v1291_v55 = vshll.u32 %v1290_v46, 23  ;;  %v2938_v10 = vadd.s32 536870912, %v2937_v40 }
 0x2ac   :  { %v3083_v38 = vsel %vm3076_vm10, %v3079_v30, %v3082_v59  ;;  %v1302_v0 = vsel %vm5926_vm12, 0, %v1300_v28  ;;  %v1533_v60 = vor.u32 8388608, %v1532_v31  ;;  %v1543_v44 = vshrl.u32 %v4297_v9, %v1540_v49 }
 0x2ad   :  { %v3084_v25 = vsel %vm3073_vm3, nan, %v3083_v38  ;;  %v1292_v20 = vor.u32 4788187, %v1291_v55  ;;  %v5934_v33 = vshrl.u32 %v2938_v10, 30  ;;  %v3192_v19 = vand.u32 2139095040, %v5905_v3 }
 0x2ae   :  { %3734 = vst [vmem:[#allocation2 + $0xc8] sm:$0xff] %v3084_v25  ;;  %v1295_v50 = vcvt.s32.f32 %v1288_v36  ;;  %v1546_v12 = vshrl.u32 %v4298_v11, %v1540_v49  ;;  %v1549_v18 = vshrl.u32 %v4299_v13, %v1540_v49  ;;  %v1538_v58 = vshrl.u32 %v1537_v8, 5 }
 0x2af   :  { %v1293_v2 = vand.u32 2147483647, %v1292_v20  ;;  %v2940_v4 = vshll.u32 %v5934_v33, 30  ;;  %v1542_v62 = vshll.u32 %v4296_v5, %v1539_v29  ;;  %v1548_v47 = vshll.u32 %v4298_v11, %v1539_v29 }
 0x2b0   :  { %v1545_v7 = vshll.u32 %v4297_v9, %v1539_v29  ;;  %v1551_v6 = vshll.u32 %v4299_v13, %v1539_v29  ;;  %v1552_v37 = vshrl.u32 %v4300_v15, %v1540_v49  ;;  %v1555_v14 = vshrl.u32 %v4301_v22, %v1540_v49 }
 0x2b1   :  { %v1296_v16 = vmul.f32 %v1295_v50, %v1293_v2  ;;  %v5946_v1 = vsub.s32 %v2937_v40, %v2940_v4  ;;  %v1544_v32 = vor.u32 %v1543_v44, %v1542_v62  ;;  %v1550_v39 = vor.u32 %v1549_v18, %v1548_v47 }
 0x2b2   :  { %v1547_v26 = vor.u32 %v1546_v12, %v1545_v7  ;;  %v1553_v63 = vor.u32 %v1552_v37, %v1551_v6  ;;  %v1554_v27 = vshll.u32 %v4300_v15, %v1539_v29  ;;  %v1306_v23 = vadd.s32 3, %v1302_v0 }
 0x2b3   :  { %v1297_v48 = vxor.u32 2147483648, %v1296_v16  ;;  %v2943_v28 = vsub.s32 0, %v5946_v1  ;;  %v1573_v54 = vshll.u32 %v1533_v60, 8  ;;  %v3193_v34 = vshrl.u32 %v3192_v19, 23 }
 0x2b4   :  { %v1541_v21 = vshrl.u32 %v4296_v5, %v1540_v49  ;;  %v1556_v8 = vor.u32 %v1555_v14, %v1554_v27  ;;  %vm1560_vm11 = vcmp.lt.s32.totalorder %v1538_v58, 4  ;;  %vm1557_vm13 = vcmp.lt.s32.totalorder %v1538_v58, 1 }
 0x2b5   :  { %v1298_v42 = vsel %vm1215_vm5, %v1297_v48, %v1296_v16  ;;  %v3888_v57 = vmin.u32 %v2943_v28, %v5946_v1  ;;  %v1562_v46 = vsel %vm1560_vm11, %v1550_v39, 2102212464  ;;  %vm1558_vm14 = vcmp.lt.s32.totalorder %v1538_v58, 2 }
 0x2b6   :  { %v1301_v52 = vsel %vm5926_vm12, %v5606_v24, %v1298_v42  ;;  %v1565_v43 = vsel %vm1557_vm13, %v1544_v32, %v1547_v26  ;;  %v1566_v59 = vsel %vm1560_vm11, %v1553_v63, 920167782  ;;  %vm1559_vm15 = vcmp.lt.s32.totalorder %v1538_v58, 3 }
 0x2b7   :  { %4213 = vcosq.f32 %v1301_v52  ;;  %v2945_v40 = vclz %v3888_v57  ;;  %v1569_v31 = vsel %vm1557_vm13, %v1547_v26, %v1550_v39  ;;  %v1561_v29 = vsel %vm1557_vm13, %v1541_v21, %v1544_v32 }
 0x2b8   :  { %4215 = vsinq.f32 %v1301_v52  ;;  %v1563_v30 = vsel %vm1559_vm15, %v1547_v26, %v1562_v46  ;;  %v1567_v36 = vsel %vm1559_vm15, %v1550_v39, %v1566_v59  ;;  %v1570_v55 = vsel %vm1560_vm11, %v1556_v8, 1326507024 }
 0x2b9   :  { %v3889_v38 = vadd.s32 4294967294, %v2945_v40  ;;  %v2963_v51 = vsub.s32 4, %v5934_v33  ;;  %v1568_v10 = vsel %vm1558_vm14, %v1565_v43, %v1567_v36  ;;  %v1571_v49 = vsel %vm1559_vm15, %v1553_v63, %v1570_v55 }
 0x2ba   :  { %v1572_v25 = vsel %vm1558_vm14, %v1569_v31, %v1571_v49  ;;  %v5964_v20 = vmul.u32.u64.low %v1573_v54, %v1568_v10  ;;  %v5965_v0 = vmul.u32.u64.high %v1573_v54, %v1568_v10, %v5964_v20  ;;  %v3899_v60 = vadd.s32 4294967169, %v3193_v34 }
 0x2bb   :  { %vm3890_vm0 = vcmp.lt.s32.totalorder %v3889_v38, 0  ;;  %v1564_v44 = vsel %vm1558_vm14, %v1561_v29, %v1563_v30  ;;  %v5969_v19 = vmul.u32.u64.low %v1573_v54, %v1572_v25  ;;  %v5970_v2 = vmul.u32.u64.high %v1573_v54, %v1572_v25, %v5969_v19 }
 0x2bc   :  { %v1307_v50 = vand.u32 3, %v1306_v23  ;;  %vm2879_vm1 = vcmp.lt.s32.totalorder %v5755_v35, 0  ;;  %v2948_v12 = vsel %vm3890_vm0, 0, %v3889_v38  ;;  %v3199_v18 = vadd.s32 1, %v3899_v60 }
 0x2bd   :  { %v2933_v4 = vadd.s32 %v5889_v61, %v5895_v56  ;;  %v2949_v62 = vsub.s32 32, %v2948_v12  ;;  %v2953_v47 = vsub.s32 4294967266, %v2948_v12  ;;  %v3189_v16 = vand.u32 2147483647, %v5905_v3 }
 0x2be   :  { %v2964_v58 = vsel %vm2879_vm1, %v2963_v51, %v5934_v33  ;;  %v1580_v7 = vmul.u32 %v1573_v54, %v1564_v44  ;;  %v1583_v6 = vadd.s32 1, %v5965_v0  ;;  %vm3200_vm2 = vcmp.gt.s32.totalorder %v3199_v18, 0  ;;  %v272_v54 = vpop.f32.mrf.mxu0 }
 0x2bf   :  { %v2950_v37 = vshll.u32 %v5946_v1, %v2948_v12  ;;  %v2951_v32 = vshrl.u32 %v2933_v4, %v2949_v62  ;;  %v2954_v39 = vadd.s32 127, %v2953_v47  ;;  %vm1582_vm3 = vc.u32 %v5970_v2, %v5964_v20 }
 0x2c0   :  { %vm5985_vm4 = vcmp.le.f32.partialorder %v2877_v17, 0.7853982  ;;  %v1584_v56 = vsel %vm1582_vm3, %v1583_v6, %v5965_v0  ;;  %v3201_v33 = vsel %vm3200_vm2, %v3199_v18, 0  ;;  %vm1305_vm5 = vweird.f32 %v5606_v24 }
 0x2c1   :  { %v2952_v14 = vor.u32 %v2951_v32, %v2950_v37  ;;  %v2955_v48 = vshll.u32 %v2954_v39, 23  ;;  %v2966_v26 = vsel %vm5985_vm4, 0, %v2964_v58  ;;  %v1585_v1 = vadd.s32 %v1584_v56, %v1580_v7 }
 0x2c2   :  { %v3196_v63 = vand.u32 8388607, %v3189_v16  ;;  %v3203_v27 = vand.u32 31, %v3201_v33  ;;  %vm1308_vm6 = vcmp.lt.s32.totalorder %v1307_v50, 2  ;;  %vm1309_vm7 = vcmp.eq.s32.totalorder %v1307_v50, 0 }
 0x2c3   :  { %v2956_v17 = vor.u32 4788187, %v2955_v48  ;;  %v1586_v28 = vadd.s32 536870912, %v1585_v1  ;;  %vm1312_vm8 = vcmp.eq.s32.totalorder %v1307_v50, 2  ;;  %v5995_v21 = vadd.s32 3, %v2966_v26 }
 0x2c4   :  { %v4214_v23 = vpop.eup %4213  ;;  %v3204_v8 = vsub.s32 32, %v3203_v27  ;;  %v2959_v46 = vcvt.s32.f32 %v2952_v14  ;;  %v3197_v40 = vor.u32 8388608, %v3196_v63  ;;  %v6001_v29 = vadd.f32 %v5603_v53, %v272_v54 }
 0x2c5   :  { %v4216_v34 = vpop.eup %4215  ;;  %v1313_v42 = vxor.u32 2147483648, %v4214_v23  ;;  %v2957_v57 = vand.u32 2147483647, %v2956_v17  ;;  %v5997_v43 = vshrl.u32 %v1586_v28, 30  ;;  %v3206_v10 = vshll.u32 %v4296_v5, %v3203_v27 }
 0x2c6   :  { %v1310_v52 = vxor.u32 2147483648, %v4216_v34  ;;  %v3207_v31 = vshrl.u32 %v4297_v9, %v3204_v8  ;;  %v3210_v38 = vshrl.u32 %v4298_v11, %v3204_v8  ;;  %v3209_v49 = vshll.u32 %v4297_v9, %v3203_v27 }
 0x2c7   :  { %v1314_v59 = vsel %vm1312_vm8, %v1313_v42, %v4216_v34  ;;  %v2960_v36 = vmul.f32 %v2959_v46, %v2957_v57  ;;  %v1588_v55 = vshll.u32 %v5997_v43, 30  ;;  %v3213_v25 = vshrl.u32 %v4299_v13, %v3204_v8 }
 0x2c8   :  { %v1311_v30 = vsel %vm1309_vm7, %v4214_v23, %v1310_v52  ;;  %v3212_v44 = vshll.u32 %v4298_v11, %v3203_v27  ;;  %v3202_v19 = vshrl.u32 %v3201_v33, 5  ;;  %v3208_v12 = vor.u32 %v3207_v31, %v3206_v10  ;;  %v352_v10 = vpop.f32.mrf.mxu1 }
 0x2c9   :  { %v1315_v51 = vsel %vm1308_vm6, %v1311_v30, %v1314_v59  ;;  %v2961_v53 = vxor.u32 2147483648, %v2960_v36  ;;  %v6012_v60 = vsub.s32 %v1585_v1, %v1588_v55  ;;  %v3215_v50 = vshll.u32 %v4299_v13, %v3203_v27 }
 0x2ca   :  { %v1316_v0 = vsel %vm1305_vm5, nan, %v1315_v51  ;;  %v3216_v18 = vshrl.u32 %v4300_v15, %v3204_v8  ;;  %v3211_v47 = vor.u32 %v3210_v38, %v3209_v49  ;;  %v3214_v24 = vor.u32 %v3213_v25, %v3212_v44 }
 0x2cb   :  { %3717 = vst [vmem:[#allocation2 + $0x40] sm:$0xff] %v1316_v0  ;;  %v2962_v4 = vsel %vm2879_vm1, %v2961_v53, %v2960_v36  ;;  %v1591_v62 = vsub.s32 0, %v6012_v60  ;;  %v3218_v6 = vshll.u32 %v4300_v15, %v3203_v27  ;;  %v3219_v37 = vshrl.u32 %v4301_v22, %v3204_v8 }
 0x2cc   :  { %v2965_v58 = vsel %vm5985_vm4, %v5755_v35, %v2962_v4  ;;  %v3217_v7 = vor.u32 %v3216_v18, %v3215_v50  ;;  %v3237_v39 = vshll.u32 %v3197_v40, 8  ;;  %v1424_v56 = vand.u32 2139095040, %v6001_v29 }
 0x2cd   :  { %4217 = vcosq.f32 %v2965_v58  ;;  %v3836_v32 = vmin.u32 %v1591_v62, %v6012_v60  ;;  %v3205_v33 = vshrl.u32 %v4296_v5, %v3204_v8  ;;  %v3220_v14 = vor.u32 %v3219_v37, %v3218_v6 }
 0x2ce   :  { %4219 = vsinq.f32 %v2965_v58  ;;  %vm3221_vm9 = vcmp.lt.s32.totalorder %v3202_v19, 1  ;;  %vm3222_vm10 = vcmp.lt.s32.totalorder %v3202_v19, 2  ;;  %vm3223_vm12 = vcmp.lt.s32.totalorder %v3202_v19, 3 }
 0x2cf   :  { %v1593_v48 = vclz %v3836_v32  ;;  %vm3224_vm11 = vcmp.lt.s32.totalorder %v3202_v19, 4  ;;  %v3229_v26 = vsel %vm3221_vm9, %v3208_v12, %v3211_v47  ;;  %v3233_v63 = vsel %vm3221_vm9, %v3211_v47, %v3214_v24 }
 0x2d0   :  { %v3226_v61 = vsel %vm3224_vm11, %v3214_v24, 2102212464  ;;  %v3230_v1 = vsel %vm3224_vm11, %v3217_v7, 920167782  ;;  %v3225_v23 = vsel %vm3221_vm9, %v3205_v33, %v3208_v12  ;;  %v3234_v28 = vsel %vm3224_vm11, %v3220_v14, 1326507024 }
 0x2d1   :  { %v3837_v27 = vadd.s32 4294967294, %v1593_v48  ;;  %v3231_v17 = vsel %vm3223_vm12, %v3214_v24, %v3230_v1  ;;  %v3227_v54 = vsel %vm3223_vm12, %v3211_v47, %v3226_v61  ;;  %v3235_v42 = vsel %vm3223_vm12, %v3217_v7, %v3234_v28 }
 0x2d2   :  { %v3232_v34 = vsel %vm3222_vm10, %v3229_v26, %v3231_v17  ;;  %v1425_v52 = vshrl.u32 %v1424_v56, 23  ;;  %v3236_v8 = vsel %vm3222_vm10, %v3233_v63, %v3235_v42  ;;  %v1581_v59 = vadd.s32 %v5964_v20, %v5970_v2 }
 0x2d3   :  { %vm3838_vm13 = vcmp.lt.s32.totalorder %v3837_v27, 0  ;;  %v6030_v57 = vmul.u32.u64.low %v3237_v39, %v3232_v34  ;;  %v6031_v46 = vmul.u32.u64.high %v3237_v39, %v3232_v34, %v6030_v57  ;;  %v3228_v38 = vsel %vm3222_vm10, %v3225_v23, %v3227_v54 }
 0x2d4   :  { %v1596_v40 = vsel %vm3838_vm13, 0, %v3837_v27  ;;  %v6036_v31 = vmul.u32.u64.low %v3237_v39, %v3236_v8  ;;  %v6037_v30 = vmul.u32.u64.high %v3237_v39, %v3236_v8, %v6036_v31  ;;  %v3831_v51 = vadd.s32 4294967169, %v1425_v52 }
 0x2d5   :  { %v1597_v36 = vsub.s32 32, %v1596_v40  ;;  %v1601_v55 = vsub.s32 4294967266, %v1596_v40  ;;  %v2971_v49 = vand.u32 3, %v5995_v21  ;;  %v1598_v25 = vshll.u32 %v6012_v60, %v1596_v40  ;;  %v6052_v21 = vld [vmem:[%s6810_s2] ss:$0 sm:$0xff] }
 0x2d6   :  { %v1611_v0 = vsub.s32 4, %v5997_v43  ;;  %v1421_v53 = vand.u32 2147483647, %v6001_v29  ;;  %vm2969_vm14 = vweird.f32 %v5755_v35  ;;  %v3247_v44 = vadd.s32 1, %v6031_v46 }
 0x2d7   :  { %v1599_v20 = vshrl.u32 %v1581_v59, %v1597_v36  ;;  %v1602_v2 = vadd.s32 127, %v1601_v55  ;;  %v1431_v12 = vadd.s32 1, %v3831_v51  ;;  %vm1527_vm15 = vcmp.lt.s32.totalorder %v5834_v45, 0 }
 0x2d8   :  { %v3244_v19 = vmul.u32 %v3237_v39, %v3228_v38  ;;  %vm3246_vm0 = vc.u32 %v6037_v30, %v6030_v57  ;;  %v6055_v60 = vadd.f32 %v6052_v21, %v352_v10  ;;  %vm2976_vm2 = vcmp.eq.s32.totalorder %v2971_v49, 2 }
 0x2d9   :  { %v1600_v50 = vor.u32 %v1599_v20, %v1598_v25  ;;  %v1603_v18 = vshll.u32 %v1602_v2, 23  ;;  %v3248_v4 = vsel %vm3246_vm0, %v3247_v44, %v6031_v46  ;;  %vm1432_vm1 = vcmp.gt.s32.totalorder %v1431_v12, 0 }
 0x2da   :  { %v4218_v62 = vpop.eup %4217  ;;  %vm6060_vm3 = vcmp.le.f32.partialorder %v1525_v41, 0.7853982  ;;  %v3249_v24 = vadd.s32 %v3248_v4, %v3244_v19  ;;  %v1433_v58 = vsel %vm1432_vm1, %v1431_v12, 0  ;;  %v6067_v32 = vsel %vm1527_vm15, %v1611_v0, %v5997_v43 }
 0x2db   :  { %v4220_v7 = vpop.eup %4219  ;;  %v2977_v6 = vxor.u32 2147483648, %v4218_v62  ;;  %v1604_v37 = vor.u32 4788187, %v1603_v18  ;;  %v1428_v39 = vand.u32 8388607, %v1421_v53  ;;  %v1435_v14 = vand.u32 31, %v1433_v58 }
 0x2dc   :  { %v2974_v56 = vxor.u32 2147483648, %v4220_v7  ;;  %v3250_v33 = vadd.s32 536870912, %v3249_v24  ;;  %v3088_v41 = vand.u32 2139095040, %v6055_v60  ;;  %vm2973_vm4 = vcmp.eq.s32.totalorder %v2971_v49, 0 }
 0x2dd   :  { %v2978_v48 = vsel %vm2976_vm2, %v2977_v6, %v4220_v7  ;;  %v1605_v61 = vand.u32 2147483647, %v1604_v37  ;;  %v1607_v26 = vcvt.s32.f32 %v1600_v50  ;;  %vm2972_vm5 = vcmp.lt.s32.totalorder %v2971_v49, 2 }
 0x2de   :  { %v2975_v1 = vsel %vm2973_vm4, %v4218_v62, %v2974_v56  ;;  %v6072_v63 = vshrl.u32 %v3250_v33, 30  ;;  %v1436_v27 = vsub.s32 32, %v1435_v14  ;;  %v1614_v17 = vsel %vm6060_vm3, 0, %v6067_v32 }
 0x2df   :  { %v2979_v23 = vsel %vm2972_vm5, %v2975_v1, %v2978_v48  ;;  %v1608_v43 = vmul.f32 %v1607_v26, %v1605_v61  ;;  %v1429_v28 = vor.u32 8388608, %v1428_v39  ;;  %v1438_v42 = vshll.u32 %v4296_v5, %v1435_v14 }
 0x2e0   :  { %v2980_v54 = vsel %vm2969_vm14, nan, %v2979_v23  ;;  %v3252_v34 = vshll.u32 %v6072_v63, 30  ;;  %v3089_v52 = vshrl.u32 %v3088_v41, 23  ;;  %v1439_v46 = vshrl.u32 %v4297_v9, %v1436_v27 }
 0x2e1   :  { %3733 = vst [vmem:[#allocation2 + $0xc0] sm:$0xff] %v2980_v54  ;;  %v1609_v8 = vxor.u32 2147483648, %v1608_v43  ;;  %v1442_v59 = vshrl.u32 %v4298_v11, %v1436_v27  ;;  %v1445_v40 = vshrl.u32 %v4299_v13, %v1436_v27  ;;  %v1441_v36 = vshll.u32 %v4297_v9, %v1435_v14 }
 0x2e2   :  { %v6084_v31 = vsub.s32 %v3249_v24, %v3252_v34  ;;  %v1444_v35 = vshll.u32 %v4298_v11, %v1435_v14  ;;  %v1448_v55 = vshrl.u32 %v4300_v15, %v1436_v27  ;;  %v1434_v51 = vshrl.u32 %v1433_v58, 5 }
 0x2e3   :  { %v1610_v38 = vsel %vm1527_vm15, %v1609_v8, %v1608_v43  ;;  %v1440_v10 = vor.u32 %v1439_v46, %v1438_v42  ;;  %v1447_v49 = vshll.u32 %v4299_v13, %v1435_v14  ;;  %v1443_v20 = vor.u32 %v1442_v59, %v1441_v36 }
 0x2e4   :  { %v1613_v25 = vsel %vm6060_vm3, %v5834_v45, %v1610_v38  ;;  %v3255_v0 = vsub.s32 0, %v6084_v31  ;;  %v1446_v2 = vor.u32 %v1445_v40, %v1444_v35  ;;  %vm3191_vm6 = vcmp.lt.s32.totalorder %v5905_v3, 0 }
 0x2e5   :  { %4221 = vcosq.f32 %v1613_v25  ;;  %v1449_v44 = vor.u32 %v1448_v55, %v1447_v49  ;;  %v1450_v12 = vshll.u32 %v4300_v15, %v1435_v14  ;;  %v1451_v19 = vshrl.u32 %v4301_v22, %v1436_v27 }
 0x2e6   :  { %4223 = vsinq.f32 %v1613_v25  ;;  %v3900_v50 = vmin.u32 %v3255_v0, %v6084_v31  ;;  %v1469_v18 = vshll.u32 %v1429_v28, 8  ;;  %v3895_v4 = vadd.s32 4294967169, %v3089_v52 }
 0x2e7   :  { %v1437_v62 = vshrl.u32 %v4296_v5, %v1436_v27  ;;  %v1452_v47 = vor.u32 %v1451_v19, %v1450_v12  ;;  %vm1453_vm7 = vcmp.lt.s32.totalorder %v1434_v51, 1  ;;  %vm1454_vm8 = vcmp.lt.s32.totalorder %v1434_v51, 2  ;;  %v3974_v19 = vpop.f32.mrf.mxu0 }
 0x2e8   :  { %v3257_v24 = vclz %v3900_v50  ;;  %vm1455_vm9 = vcmp.lt.s32.totalorder %v1434_v51, 3  ;;  %vm1456_vm10 = vcmp.lt.s32.totalorder %v1434_v51, 4  ;;  %v1461_v58 = vsel %vm1453_vm7, %v1440_v10, %v1443_v20 }
 0x2e9   :  { %v1458_v7 = vsel %vm1456_vm10, %v1446_v2, 2102212464  ;;  %v1462_v6 = vsel %vm1456_vm10, %v1449_v44, 920167782  ;;  %v1465_v37 = vsel %vm1453_vm7, %v1443_v20, %v1446_v2  ;;  %v1466_v32 = vsel %vm1456_vm10, %v1452_v47, 1326507024 }
 0x2ea   :  { %v3901_v39 = vadd.s32 4294967294, %v3257_v24  ;;  %v3275_v56 = vsub.s32 4, %v6072_v63  ;;  %v1463_v33 = vsel %vm1455_vm9, %v1446_v2, %v1462_v6  ;;  %v1467_v14 = vsel %vm1455_vm9, %v1449_v44, %v1466_v32 }
 0x2eb   :  { %v1618_v41 = vadd.s32 3, %v1614_v17  ;;  %v1457_v48 = vsel %vm1453_vm7, %v1437_v62, %v1440_v10  ;;  %v1464_v61 = vsel %vm1454_vm8, %v1461_v58, %v1463_v33  ;;  %v1468_v26 = vsel %vm1454_vm8, %v1465_v37, %v1467_v14 }
 0x2ec   :  { %vm3902_vm12 = vcmp.lt.s32.totalorder %v3901_v39, 0  ;;  %v1459_v1 = vsel %vm1455_vm9, %v1443_v20, %v1458_v7  ;;  %v6107_v27 = vmul.u32.u64.low %v1469_v18, %v1468_v26  ;;  %v6108_v23 = vmul.u32.u64.high %v1469_v18, %v1468_v26, %v6107_v27 }
 0x2ed   :  { %v3260_v43 = vsel %vm3902_vm12, 0, %v3901_v39  ;;  %v6110_v28 = vmul.u32.u64.low %v1469_v18, %v1464_v61  ;;  %v6111_v54 = vmul.u32.u64.high %v1469_v18, %v1464_v61, %v6110_v28  ;;  %v3095_v34 = vadd.s32 1, %v3895_v4 }
 0x2ee   :  { %v3245_v17 = vadd.s32 %v6030_v57, %v6037_v30  ;;  %v3261_v42 = vsub.s32 32, %v3260_v43  ;;  %v3265_v52 = vsub.s32 4294967266, %v3260_v43  ;;  %v3276_v8 = vsel %vm3191_vm6, %v3275_v56, %v6072_v63 }
 0x2ef   :  { %vm1617_vm11 = vweird.f32 %v5834_v45  ;;  %v1619_v46 = vand.u32 3, %v1618_v41  ;;  %vm6122_vm13 = vcmp.le.f32.partialorder %v3189_v16, 0.7853982  ;;  %v1460_v40 = vsel %vm1454_vm8, %v1457_v48, %v1459_v1 }
 0x2f0   :  { %vm3096_vm14 = vcmp.gt.s32.totalorder %v3095_v34, 0  ;;  %v3262_v57 = vshll.u32 %v6084_v31, %v3260_v43  ;;  %v3263_v30 = vshrl.u32 %v3245_v17, %v3261_v42  ;;  %v3266_v36 = vadd.s32 127, %v3265_v52 }
 0x2f1   :  { %vm1478_vm15 = vc.u32 %v6108_v23, %v6110_v28  ;;  %v3278_v63 = vsel %vm6122_vm13, 0, %v3276_v8  ;;  %v1479_v35 = vadd.s32 1, %v6111_v54  ;;  %v3085_v16 = vand.u32 2147483647, %v6055_v60 }
 0x2f2   :  { %v3097_v55 = vsel %vm3096_vm14, %v3095_v34, 0  ;;  %v4222_v38 = vpop.eup %4221  ;;  %v3264_v10 = vor.u32 %v3263_v30, %v3262_v57  ;;  %v3267_v51 = vshll.u32 %v3266_v36, 23  ;;  %v1476_v49 = vmul.u32 %v1469_v18, %v1460_v40 }
 0x2f3   :  { %v3099_v25 = vand.u32 31, %v3097_v55  ;;  %v4224_v0 = vpop.eup %4223  ;;  %vm1620_vm0 = vcmp.lt.s32.totalorder %v1619_v46, 2  ;;  %vm1621_vm1 = vcmp.eq.s32.totalorder %v1619_v46, 0  ;;  %v1625_v31 = vxor.u32 2147483648, %v4222_v38 }
 0x2f4   :  { %v1480_v20 = vsel %vm1478_vm15, %v1479_v35, %v6111_v54  ;;  %v1622_v2 = vxor.u32 2147483648, %v4224_v0  ;;  %vm1624_vm2 = vcmp.eq.s32.totalorder %v1619_v46, 2  ;;  %v3268_v44 = vor.u32 4788187, %v3267_v51 }
 0x2f5   :  { %v1481_v12 = vadd.s32 %v1480_v20, %v1476_v49  ;;  %v1626_v50 = vsel %vm1624_vm2, %v1625_v31, %v4224_v0  ;;  %v3282_v4 = vadd.s32 3, %v3278_v63  ;;  %v3092_v62 = vand.u32 8388607, %v3085_v16 }
 0x2f6   :  { %v3100_v47 = vsub.s32 32, %v3099_v25  ;;  %v1623_v24 = vsel %vm1621_vm1, %v4222_v38, %v1622_v2  ;;  %v3269_v18 = vand.u32 2147483647, %v3268_v44  ;;  %v3271_v58 = vcvt.s32.f32 %v3264_v10 }
 0x2f7   :  { %v1482_v7 = vadd.s32 536870912, %v1481_v12  ;;  %v1627_v6 = vsel %vm1620_vm0, %v1623_v24, %v1626_v50  ;;  %v6141_v39 = vadd.f32 %v6052_v21, %v3974_v19  ;;  %v3098_v48 = vshrl.u32 %v3097_v55, 5  ;;  %v3998_v24 = vpop.f32.mrf.mxu1 }
 0x2f8   :  { %v3103_v37 = vshrl.u32 %v4297_v9, %v3100_v47  ;;  %v3106_v32 = vshrl.u32 %v4298_v11, %v3100_v47  ;;  %v1628_v56 = vsel %vm1617_vm11, nan, %v1627_v6  ;;  %v3272_v33 = vmul.f32 %v3271_v58, %v3269_v18 }
 0x2f9   :  { %v6145_v14 = vshrl.u32 %v1482_v7, 30  ;;  %v3109_v41 = vshrl.u32 %v4299_v13, %v3100_v47  ;;  %3720 = vst [vmem:[#allocation2 + $0x58] sm:$0xff] %v1628_v56  ;;  %v3102_v61 = vshll.u32 %v4296_v5, %v3099_v25  ;;  %v3105_v26 = vshll.u32 %v4297_v9, %v3099_v25 }
 0x2fa   :  { %v3112_v1 = vshrl.u32 %v4300_v15, %v3100_v47  ;;  %v3273_v27 = vxor.u32 2147483648, %v3272_v33  ;;  %v3108_v54 = vshll.u32 %v4298_v11, %v3099_v25  ;;  %v3111_v45 = vshll.u32 %v4299_v13, %v3099_v25 }
 0x2fb   :  { %v1484_v43 = vshll.u32 %v6145_v14, 30  ;;  %v3104_v34 = vor.u32 %v3103_v37, %v3102_v61  ;;  %v3107_v17 = vor.u32 %v3106_v32, %v3105_v26  ;;  %v3114_v42 = vshll.u32 %v4300_v15, %v3099_v25 }
 0x2fc   :  { %v3115_v52 = vshrl.u32 %v4301_v22, %v3100_v47  ;;  %v3274_v8 = vsel %vm3191_vm6, %v3273_v27, %v3272_v33  ;;  %v3110_v40 = vor.u32 %v3109_v41, %v3108_v54  ;;  %v3113_v57 = vor.u32 %v3112_v1, %v3111_v45 }
 0x2fd   :  { %v6158_v46 = vsub.s32 %v1481_v12, %v1484_v43  ;;  %v3277_v30 = vsel %vm6122_vm13, %v5905_v3, %v3274_v8  ;;  %v6163_v36 = vand.u32 3, %v3282_v4  ;;  %v3093_v63 = vor.u32 8388608, %v3092_v62 }
 0x2fe   :  { %v3116_v35 = vor.u32 %v3115_v52, %v3114_v42  ;;  %4225 = vcosq.f32 %v3277_v30  ;;  %v3101_v38 = vshrl.u32 %v4296_v5, %v3100_v47  ;;  %v1736_v10 = vand.u32 2139095040, %v6141_v39 }
 0x2ff   :  { %v1487_v55 = vsub.s32 0, %v6158_v46  ;;  %4227 = vsinq.f32 %v3277_v30  ;;  %vm3117_vm3 = vcmp.lt.s32.totalorder %v3098_v48, 1  ;;  %vm3119_vm4 = vcmp.lt.s32.totalorder %v3098_v48, 3 }
 0x300   :  { %vm3120_vm5 = vcmp.lt.s32.totalorder %v3098_v48, 4  ;;  %v3125_v59 = vsel %vm3117_vm3, %v3104_v34, %v3107_v17  ;;  %v3129_v31 = vsel %vm3117_vm3, %v3107_v17, %v3110_v40  ;;  %v3133_v2 = vshll.u32 %v3093_v63, 8 }
 0x301   :  { %v3832_v51 = vmin.u32 %v1487_v55, %v6158_v46  ;;  %v3122_v49 = vsel %vm3120_vm5, %v3110_v40, 2102212464  ;;  %v3126_v25 = vsel %vm3120_vm5, %v3113_v57, 920167782  ;;  %v3130_v20 = vsel %vm3120_vm5, %v3116_v35, 1326507024 }
 0x302   :  { %v3127_v0 = vsel %vm3119_vm4, %v3110_v40, %v3126_v25  ;;  %v1507_v12 = vsub.s32 4, %v6145_v14  ;;  %vm3118_vm6 = vcmp.lt.s32.totalorder %v3098_v48, 2  ;;  %v3121_v19 = vsel %vm3117_vm3, %v3101_v38, %v3104_v34 }
 0x303   :  { %v1489_v44 = vclz %v3832_v51  ;;  %v3123_v50 = vsel %vm3119_vm4, %v3107_v17, %v3122_v49  ;;  %v3128_v4 = vsel %vm3118_vm6, %v3125_v59, %v3127_v0  ;;  %v3131_v62 = vsel %vm3119_vm4, %v3113_v57, %v3130_v20 }
 0x304   :  { %v1737_v47 = vshrl.u32 %v1736_v10, 23  ;;  %v3132_v58 = vsel %vm3118_vm6, %v3129_v31, %v3131_v62  ;;  %v6173_v7 = vmul.u32.u64.low %v3133_v2, %v3128_v4  ;;  %v6174_v6 = vmul.u32.u64.high %v3133_v2, %v3128_v4, %v6173_v7 }
 0x305   :  { %v3833_v18 = vadd.s32 4294967294, %v1489_v44  ;;  %vm1423_vm7 = vcmp.lt.s32.totalorder %v6001_v29, 0  ;;  %v6177_v37 = vmul.u32.u64.low %v3133_v2, %v3132_v58  ;;  %v6178_v32 = vmul.u32.u64.high %v3133_v2, %v3132_v58, %v6177_v37 }
 0x306   :  { %v3843_v56 = vadd.s32 4294967169, %v1737_v47  ;;  %vm6182_vm8 = vcmp.le.f32.partialorder %v1421_v53, 0.7853982  ;;  %v3124_v41 = vsel %vm3118_vm6, %v3121_v19, %v3123_v50  ;;  %v6187_v48 = vadd.f32 %v6052_v21, %v3998_v24 }
 0x307   :  { %vm3834_vm9 = vcmp.lt.s32.totalorder %v3833_v18, 0  ;;  %vm3284_vm10 = vcmp.lt.s32.totalorder %v6163_v36, 2  ;;  %v1477_v61 = vadd.s32 %v6110_v28, %v6108_v23  ;;  %v1733_v1 = vand.u32 2147483647, %v6141_v39 }
 0x308   :  { %v1492_v26 = vsel %vm3834_vm9, 0, %v3833_v18  ;;  %v1743_v27 = vadd.s32 1, %v3843_v56  ;;  %vm3281_vm12 = vweird.f32 %v5905_v3  ;;  %v1508_v54 = vsel %vm1423_vm7, %v1507_v12, %v6145_v14 }
 0x309   :  { %v1493_v53 = vsub.s32 32, %v1492_v26  ;;  %v1497_v43 = vsub.s32 4294967266, %v1492_v26  ;;  %v3143_v45 = vadd.s32 1, %v6174_v6  ;;  %v1494_v34 = vshll.u32 %v6158_v46, %v1492_v26 }
 0x30a   :  { %v3140_v17 = vmul.u32 %v3133_v2, %v3124_v41  ;;  %vm3142_vm11 = vc.u32 %v6178_v32, %v6173_v7  ;;  %vm1744_vm13 = vcmp.gt.s32.totalorder %v1743_v27, 0  ;;  %v1510_v40 = vsel %vm6182_vm8, 0, %v1508_v54 }
 0x30b   :  { %v1495_v23 = vshrl.u32 %v1477_v61, %v1493_v53  ;;  %v1498_v28 = vadd.s32 127, %v1497_v43  ;;  %v3144_v42 = vsel %vm3142_vm11, %v3143_v45, %v6174_v6  ;;  %v1745_v52 = vsel %vm1744_vm13, %v1743_v27, 0  ;;  %v4226_v8 = vpop.eup %4225 }
 0x30c   :  { %v3145_v57 = vadd.s32 %v3144_v42, %v3140_v17  ;;  %v1740_v14 = vand.u32 8388607, %v1733_v1  ;;  %v1747_v30 = vand.u32 31, %v1745_v52  ;;  %v4228_v63 = vpop.eup %4227  ;;  %vm3285_vm14 = vcmp.eq.s32.totalorder %v6163_v36, 0 }
 0x30d   :  { %v3289_v46 = vxor.u32 2147483648, %v4226_v8  ;;  %v1496_v35 = vor.u32 %v1495_v23, %v1494_v34  ;;  %v1499_v55 = vshll.u32 %v1498_v28, 23  ;;  %v3286_v38 = vxor.u32 2147483648, %v4228_v63 }
 0x30e   :  { %vm3288_vm15 = vcmp.eq.s32.totalorder %v6163_v36, 2  ;;  %v3146_v10 = vadd.s32 536870912, %v3145_v57  ;;  %v1748_v51 = vsub.s32 32, %v1747_v30  ;;  %v6207_v25 = vadd.s32 3, %v1510_v40 }
 0x30f   :  { %v3290_v49 = vsel %vm3288_vm15, %v3289_v46, %v4228_v63  ;;  %v1500_v59 = vor.u32 4788187, %v1499_v55  ;;  %v3397_v0 = vand.u32 2147483647, %v6187_v48  ;;  %v3287_v31 = vsel %vm3285_vm14, %v4226_v8, %v3286_v38 }
 0x310   :  { %v3147_v20 = vshrl.u32 %v3146_v10, 30  ;;  %v1741_v2 = vor.u32 8388608, %v1740_v14  ;;  %v3400_v44 = vand.u32 2139095040, %v6187_v48  ;;  %v3291_v12 = vsel %vm3284_vm10, %v3287_v31, %v3290_v49 }
 0x311   :  { %v1501_v19 = vand.u32 2147483647, %v1500_v59  ;;  %v1503_v50 = vcvt.s32.f32 %v1496_v35  ;;  %v1751_v4 = vshrl.u32 %v4297_v9, %v1748_v51  ;;  %v3292_v62 = vsel %vm3281_vm12, nan, %v3291_v12 }
 0x312   :  { %v6217_v47 = vadd.s32 %v6173_v7, %v6178_v32  ;;  %v3148_v24 = vshll.u32 %v3147_v20, 30  ;;  %v1754_v18 = vshrl.u32 %v4298_v11, %v1748_v51  ;;  %3736 = vst [vmem:[#allocation2 + $0xd8] sm:$0xff] %v3292_v62  ;;  %v1746_v6 = vshrl.u32 %v1745_v52, 5 }
 0x313   :  { %v1504_v58 = vmul.f32 %v1503_v50, %v1501_v19  ;;  %v1750_v37 = vshll.u32 %v4296_v5, %v1747_v30  ;;  %v1757_v36 = vshrl.u32 %v4299_v13, %v1748_v51  ;;  %v1753_v41 = vshll.u32 %v4297_v9, %v1747_v30 }
 0x314   :  { %v6222_v56 = vsub.s32 %v3145_v57, %v3148_v24  ;;  %v1756_v3 = vshll.u32 %v4298_v11, %v1747_v30  ;;  %v1760_v61 = vshrl.u32 %v4300_v15, %v1748_v51  ;;  %v1759_v26 = vshll.u32 %v4299_v13, %v1747_v30 }
 0x315   :  { %v1505_v7 = vxor.u32 2147483648, %v1504_v58  ;;  %v1752_v32 = vor.u32 %v1751_v4, %v1750_v37  ;;  %v1763_v27 = vshrl.u32 %v4301_v22, %v1748_v51  ;;  %vm3087_vm0 = vcmp.lt.s32.totalorder %v6055_v60, 0 }
 0x316   :  { %v3151_v53 = vsub.s32 0, %v6222_v56  ;;  %v1755_v43 = vor.u32 %v1754_v18, %v1753_v41  ;;  %v1758_v54 = vor.u32 %v1757_v36, %v1756_v3  ;;  %v1762_v45 = vshll.u32 %v4300_v15, %v1747_v30 }
 0x317   :  { %v1506_v34 = vsel %vm1423_vm7, %v1505_v7, %v1504_v58  ;;  %v1761_v17 = vor.u32 %v1760_v61, %v1759_v26  ;;  %v1781_v23 = vshll.u32 %v1741_v2, 8  ;;  %v3401_v28 = vshrl.u32 %v3400_v44, 23 }
 0x318   :  { %v1509_v42 = vsel %vm6182_vm8, %v6001_v29, %v1506_v34  ;;  %v3896_v52 = vmin.u32 %v3151_v53, %v6222_v56  ;;  %v1749_v8 = vshrl.u32 %v4296_v5, %v1748_v51  ;;  %v1764_v40 = vor.u32 %v1763_v27, %v1762_v45 }
 0x319   :  { %4229 = vcosq.f32 %v1509_v42  ;;  %v3171_v57 = vsub.s32 4, %v3147_v20  ;;  %vm1765_vm1 = vcmp.lt.s32.totalorder %v1746_v6, 1  ;;  %vm1768_vm2 = vcmp.lt.s32.totalorder %v1746_v6, 4 }
 0x31a   :  { %4231 = vsinq.f32 %v1509_v42  ;;  %v3153_v14 = vclz %v3896_v52  ;;  %v1770_v30 = vsel %vm1768_vm2, %v1758_v54, 2102212464  ;;  %v1773_v63 = vsel %vm1765_vm1, %v1752_v32, %v1755_v43 }
 0x31b   :  { %vm1766_vm3 = vcmp.lt.s32.totalorder %v1746_v6, 2  ;;  %vm1767_vm4 = vcmp.lt.s32.totalorder %v1746_v6, 3  ;;  %v1774_v46 = vsel %vm1768_vm2, %v1761_v17, 920167782  ;;  %v1777_v35 = vsel %vm1765_vm1, %v1755_v43, %v1758_v54 }
 0x31c   :  { %v3897_v55 = vadd.s32 4294967294, %v3153_v14  ;;  %v1769_v33 = vsel %vm1765_vm1, %v1749_v8, %v1752_v32  ;;  %v1775_v38 = vsel %vm1767_vm4, %v1758_v54, %v1774_v46  ;;  %v1778_v10 = vsel %vm1768_vm2, %v1764_v40, 1326507024 }
 0x31d   :  { %v1771_v49 = vsel %vm1767_vm4, %v1755_v43, %v1770_v30  ;;  %v1776_v51 = vsel %vm1766_vm3, %v1773_v63, %v1775_v38  ;;  %v1779_v59 = vsel %vm1767_vm4, %v1761_v17, %v1778_v10  ;;  %v3907_v31 = vadd.s32 4294967169, %v3401_v28 }
 0x31e   :  { %vm3898_vm5 = vcmp.lt.s32.totalorder %v3897_v55, 0  ;;  %v1780_v2 = vsel %vm1766_vm3, %v1777_v35, %v1779_v59  ;;  %v6241_v44 = vmul.u32.u64.low %v1781_v23, %v1776_v51  ;;  %v6242_v12 = vmul.u32.u64.high %v1781_v23, %v1776_v51, %v6241_v44 }
 0x31f   :  { %v3156_v19 = vsel %vm3898_vm5, 0, %v3897_v55  ;;  %v3172_v50 = vsel %vm3087_vm0, %v3171_v57, %v3147_v20  ;;  %v6247_v4 = vmul.u32.u64.low %v1781_v23, %v1780_v2  ;;  %v6248_v62 = vmul.u32.u64.high %v1781_v23, %v1780_v2, %v6247_v4 }
 0x320   :  { %v3157_v24 = vsub.s32 32, %v3156_v19  ;;  %v3161_v18 = vsub.s32 4294967266, %v3156_v19  ;;  %v1772_v58 = vsel %vm1766_vm3, %v1769_v33, %v1771_v49  ;;  %v3407_v37 = vadd.s32 1, %v3907_v31 }
 0x321   :  { %v1515_v36 = vand.u32 3, %v6207_v25  ;;  %vm6254_vm6 = vcmp.le.f32.partialorder %v3085_v16, 0.7853982  ;;  %v3158_v3 = vshll.u32 %v6222_v56, %v3156_v19  ;;  %v1791_v7 = vadd.s32 1, %v6242_v12  ;;  %v282_v19 = vpop.f32.mrf.mxu0 }
 0x322   :  { %v3159_v20 = vshrl.u32 %v6217_v47, %v3157_v24  ;;  %v3162_v61 = vadd.s32 127, %v3161_v18  ;;  %vm3408_vm7 = vcmp.gt.s32.totalorder %v3407_v37, 0  ;;  %v3174_v6 = vsel %vm6254_vm6, 0, %v3172_v50 }
 0x323   :  { %v1788_v32 = vmul.u32 %v1781_v23, %v1772_v58  ;;  %vm1790_vm8 = vc.u32 %v6248_v62, %v6241_v44  ;;  %v3409_v25 = vsel %vm3408_vm7, %v3407_v37, 0  ;;  %v3404_v56 = vand.u32 8388607, %v3397_v0 }
 0x324   :  { %v3160_v16 = vor.u32 %v3159_v20, %v3158_v3  ;;  %v3163_v26 = vshll.u32 %v3162_v61, 23  ;;  %v1792_v27 = vsel %vm1790_vm8, %v1791_v7, %v6242_v12  ;;  %vm1513_vm9 = vweird.f32 %v6001_v29 }
 0x325   :  { %v1793_v47 = vadd.s32 %v1792_v27, %v1788_v32  ;;  %v3411_v53 = vand.u32 31, %v3409_v25  ;;  %vm1516_vm10 = vcmp.lt.s32.totalorder %v1515_v36, 2  ;;  %vm1517_vm12 = vcmp.eq.s32.totalorder %v1515_v36, 0 }
 0x326   :  { %v4230_v43 = vpop.eup %4229  ;;  %vm1520_vm11 = vcmp.eq.s32.totalorder %v1515_v36, 2  ;;  %v3164_v54 = vor.u32 4788187, %v3163_v26  ;;  %v6269_v17 = vadd.s32 3, %v3174_v6  ;;  %v3167_v8 = vcvt.s32.f32 %v3160_v16 }
 0x327   :  { %v4232_v45 = vpop.eup %4231  ;;  %v1521_v34 = vxor.u32 2147483648, %v4230_v43  ;;  %v1794_v23 = vadd.s32 536870912, %v1793_v47  ;;  %v3412_v28 = vsub.s32 32, %v3411_v53  ;;  %v3405_v40 = vor.u32 8388608, %v3404_v56 }
 0x328   :  { %v1518_v42 = vxor.u32 2147483648, %v4232_v45  ;;  %v3165_v52 = vand.u32 2147483647, %v3164_v54  ;;  %v3414_v30 = vshll.u32 %v4296_v5, %v3411_v53  ;;  %v3410_v49 = vshrl.u32 %v3409_v25, 5 }
 0x329   :  { %v1522_v57 = vsel %vm1520_vm11, %v1521_v34, %v4232_v45  ;;  %v1795_v14 = vshrl.u32 %v1794_v23, 30  ;;  %v3415_v63 = vshrl.u32 %v4297_v9, %v3412_v28  ;;  %v3418_v55 = vshrl.u32 %v4298_v11, %v3412_v28 }
 0x32a   :  { %v1519_v46 = vsel %vm1517_vm12, %v4230_v43, %v1518_v42  ;;  %v3168_v35 = vmul.f32 %v3167_v8, %v3165_v52  ;;  %v3421_v33 = vshrl.u32 %v4299_v13, %v3412_v28  ;;  %v3417_v51 = vshll.u32 %v4297_v9, %v3411_v53  ;;  %v362_v8 = vpop.f32.mrf.mxu1 }
 0x32b   :  { %v1523_v38 = vsel %vm1516_vm10, %v1519_v46, %v1522_v57  ;;  %v1796_v10 = vshll.u32 %v1795_v14, 30  ;;  %vm1735_vm13 = vcmp.lt.s32.totalorder %v6141_v39, 0  ;;  %v3416_v2 = vor.u32 %v3415_v63, %v3414_v30 }
 0x32c   :  { %v1524_v59 = vsel %vm1513_vm9, nan, %v1523_v38  ;;  %v3169_v31 = vxor.u32 2147483648, %v3168_v35  ;;  %v3420_v12 = vshll.u32 %v4298_v11, %v3411_v53  ;;  %v3419_v4 = vor.u32 %v3418_v55, %v3417_v51 }
 0x32d   :  { %3719 = vst [vmem:[#allocation2 + $0x50] sm:$0xff] %v1524_v59  ;;  %v6282_v50 = vsub.s32 %v1793_v47, %v1796_v10  ;;  %v3423_v24 = vshll.u32 %v4299_v13, %v3411_v53  ;;  %v3424_v18 = vshrl.u32 %v4300_v15, %v3412_v28  ;;  %v3426_v37 = vshll.u32 %v4300_v15, %v3411_v53 }
 0x32e   :  { %v3170_v58 = vsel %vm3087_vm0, %v3169_v31, %v3168_v35  ;;  %v3422_v29 = vor.u32 %v3421_v33, %v3420_v12  ;;  %v3427_v36 = vshrl.u32 %v4301_v22, %v3412_v28  ;;  %v6295_v7 = vadd.f32 %v6052_v21, %v282_v19 }
 0x32f   :  { %v3173_v3 = vsel %vm6254_vm6, %v6055_v60, %v3170_v58  ;;  %v1799_v20 = vsub.s32 0, %v6282_v50  ;;  %v3425_v61 = vor.u32 %v3424_v18, %v3423_v24  ;;  %v3413_v6 = vshrl.u32 %v4296_v5, %v3412_v28 }
 0x330   :  { %4233 = vcosq.f32 %v3173_v3  ;;  %v3428_v32 = vor.u32 %v3427_v36, %v3426_v37  ;;  %vm3429_vm14 = vcmp.lt.s32.totalorder %v3410_v49, 1  ;;  %v1819_v16 = vsub.s32 4, %v1795_v14 }
 0x331   :  { %4235 = vsinq.f32 %v3173_v3  ;;  %v3844_v25 = vmin.u32 %v1799_v20, %v6282_v50  ;;  %vm3432_vm15 = vcmp.lt.s32.totalorder %v3410_v49, 4  ;;  %v3437_v27 = vsel %vm3429_vm14, %v3416_v2, %v3419_v4 }
 0x332   :  { %v3434_v26 = vsel %vm3432_vm15, %v3422_v29, 2102212464  ;;  %v3438_v41 = vsel %vm3432_vm15, %v3425_v61, 920167782  ;;  %v3445_v56 = vshll.u32 %v3405_v40, 8  ;;  %vm3431_vm0 = vcmp.lt.s32.totalorder %v3410_v49, 3 }
 0x333   :  { %v1801_v47 = vclz %v3844_v25  ;;  %v3433_v53 = vsel %vm3429_vm14, %v3413_v6, %v3416_v2  ;;  %v3441_v43 = vsel %vm3429_vm14, %v3419_v4, %v3422_v29  ;;  %vm3430_vm1 = vcmp.lt.s32.totalorder %v3410_v49, 2 }
 0x334   :  { %v3435_v54 = vsel %vm3431_vm0, %v3419_v4, %v3434_v26  ;;  %v3439_v45 = vsel %vm3431_vm0, %v3422_v29, %v3438_v41  ;;  %v3442_v34 = vsel %vm3432_vm15, %v3428_v32, 1326507024  ;;  %v1820_v28 = vsel %vm1735_vm13, %v1819_v16, %v1795_v14 }
 0x335   :  { %v3845_v23 = vadd.s32 4294967294, %v1801_v47  ;;  %v3440_v42 = vsel %vm3430_vm1, %v3437_v27, %v3439_v45  ;;  %v3443_v52 = vsel %vm3431_vm0, %v3425_v61, %v3442_v34  ;;  %v3436_v57 = vsel %vm3430_vm1, %v3433_v53, %v3435_v54 }
 0x336   :  { %v3444_v30 = vsel %vm3430_vm1, %v3441_v43, %v3443_v52  ;;  %v6301_v63 = vmul.u32.u64.low %v3445_v56, %v3440_v42  ;;  %v6302_v46 = vmul.u32.u64.high %v3445_v56, %v3440_v42, %v6301_v63  ;;  %v1632_v55 = vand.u32 2139095040, %v6295_v7 }
 0x337   :  { %vm3846_vm2 = vcmp.lt.s32.totalorder %v3845_v23, 0  ;;  %v6305_v40 = vmul.u32.u64.low %v3445_v56, %v3444_v30  ;;  %v6306_v35 = vmul.u32.u64.high %v3445_v56, %v3444_v30, %v6305_v40  ;;  %v3179_v33 = vand.u32 3, %v6269_v17 }
 0x338   :  { %vm6312_vm3 = vcmp.le.f32.partialorder %v1733_v1, 0.7853982  ;;  %v1804_v38 = vsel %vm3846_vm2, 0, %v3845_v23  ;;  %v6317_v10 = vadd.f32 %v6052_v21, %v362_v8  ;;  %v1789_v49 = vadd.s32 %v6241_v44, %v6248_v62 }
 0x339   :  { %v1805_v51 = vsub.s32 32, %v1804_v38  ;;  %v1809_v59 = vsub.s32 4294967266, %v1804_v38  ;;  %v1633_v31 = vshrl.u32 %v1632_v55, 23  ;;  %v1822_v2 = vsel %vm6312_vm3, 0, %v1820_v28 }
 0x33a   :  { %v3452_v17 = vmul.u32 %v3445_v56, %v3436_v57  ;;  %v3455_v12 = vadd.s32 1, %v6302_v46  ;;  %v1629_v1 = vand.u32 2147483647, %v6295_v7  ;;  %v1806_v19 = vshll.u32 %v6282_v50, %v1804_v38 }
 0x33b   :  { %v1807_v4 = vshrl.u32 %v1789_v49, %v1805_v51  ;;  %v1810_v24 = vadd.s32 127, %v1809_v59  ;;  %vm3454_vm4 = vc.u32 %v6306_v35, %v6301_v63  ;;  %vm3180_vm5 = vcmp.lt.s32.totalorder %v3179_v33, 2 }
 0x33c   :  { %v3456_v21 = vsel %vm3454_vm4, %v3455_v12, %v6302_v46  ;;  %v3839_v44 = vadd.s32 4294967169, %v1633_v31  ;;  %v3296_v62 = vand.u32 2139095040, %v6317_v10  ;;  %vm3181_vm6 = vcmp.eq.s32.totalorder %v3179_v33, 0 }
 0x33d   :  { %v4234_v18 = vpop.eup %4233  ;;  %v1808_v58 = vor.u32 %v1807_v4, %v1806_v19  ;;  %v1811_v29 = vshll.u32 %v1810_v24, 23  ;;  %v3457_v37 = vadd.s32 %v3456_v21, %v3452_v17  ;;  %vm3184_vm7 = vcmp.eq.s32.totalorder %v3179_v33, 2 }
 0x33e   :  { %v4236_v36 = vpop.eup %4235  ;;  %v3185_v3 = vxor.u32 2147483648, %v4234_v18  ;;  %v1826_v50 = vadd.s32 3, %v1822_v2  ;;  %v1639_v20 = vadd.s32 1, %v3839_v44  ;;  %v1636_v25 = vand.u32 8388607, %v1629_v1 }
 0x33f   :  { %v3182_v61 = vxor.u32 2147483648, %v4236_v36  ;;  %v1812_v6 = vor.u32 4788187, %v1811_v29  ;;  %v3458_v32 = vadd.s32 536870912, %v3457_v37  ;;  %v1815_v26 = vcvt.s32.f32 %v1808_v58 }
 0x340   :  { %v3186_v16 = vsel %vm3184_vm7, %v3185_v3, %v4236_v36  ;;  %vm1640_vm8 = vcmp.gt.s32.totalorder %v1639_v20, 0  ;;  %v3297_v27 = vshrl.u32 %v3296_v62, 23  ;;  %vm3177_vm9 = vweird.f32 %v6055_v60 }
 0x341   :  { %v3183_v41 = vsel %vm3181_vm6, %v4234_v18, %v3182_v61  ;;  %v1813_v56 = vand.u32 2147483647, %v1812_v6  ;;  %v3459_v47 = vshrl.u32 %v3458_v32, 30  ;;  %v1641_v53 = vsel %vm1640_vm8, %v1639_v20, 0 }
 0x342   :  { %v3187_v43 = vsel %vm3180_vm5, %v3183_v41, %v3186_v16  ;;  %v1643_v54 = vand.u32 31, %v1641_v53  ;;  %v6335_v23 = vand.u32 3, %v1826_v50  ;;  %vm3399_vm10 = vcmp.lt.s32.totalorder %v6187_v48, 0 }
 0x343   :  { %v3188_v45 = vsel %vm3177_vm9, nan, %v3187_v43  ;;  %v1816_v34 = vmul.f32 %v1815_v26, %v1813_v56  ;;  %v3460_v28 = vshll.u32 %v3459_v47, 30  ;;  %v1637_v42 = vor.u32 8388608, %v1636_v25 }
 0x344   :  { %3735 = vst [vmem:[#allocation2 + $0xd0] sm:$0xff] %v3188_v45  ;;  %v1644_v52 = vsub.s32 32, %v1643_v54  ;;  %v3293_v8 = vand.u32 2147483647, %v6317_v10  ;;  %v3903_v57 = vadd.s32 4294967169, %v3297_v27  ;;  %v3483_v60 = vsub.s32 4, %v3459_v47 }
 0x345   :  { %v1817_v30 = vxor.u32 2147483648, %v1816_v34  ;;  %v6339_v46 = vsub.s32 %v3457_v37, %v3460_v28  ;;  %v1642_v40 = vshrl.u32 %v1641_v53, 5  ;;  %v1646_v55 = vshll.u32 %v4296_v5, %v1643_v54 }
 0x346   :  { %v1647_v33 = vshrl.u32 %v4297_v9, %v1644_v52  ;;  %v1649_v38 = vshll.u32 %v4297_v9, %v1643_v54  ;;  %v1650_v49 = vshrl.u32 %v4298_v11, %v1644_v52  ;;  %vm6349_vm12 = vcmp.le.f32.partialorder %v3397_v0, 0.7853982 }
 0x347   :  { %v1818_v51 = vsel %vm1735_vm13, %v1817_v30, %v1816_v34  ;;  %v3463_v31 = vsub.s32 0, %v6339_v46  ;;  %v1652_v2 = vshll.u32 %v4298_v11, %v1643_v54  ;;  %v1653_v17 = vshrl.u32 %v4299_v13, %v1644_v52 }
 0x348   :  { %v1821_v12 = vsel %vm6312_vm3, %v6141_v39, %v1818_v51  ;;  %v1648_v19 = vor.u32 %v1647_v33, %v1646_v55  ;;  %v1655_v4 = vshll.u32 %v4299_v13, %v1643_v54  ;;  %v1656_v24 = vshrl.u32 %v4300_v15, %v1644_v52 }
 0x349   :  { %4237 = vcosq.f32 %v1821_v12  ;;  %v3908_v0 = vmin.u32 %v3463_v31, %v6339_v46  ;;  %v1651_v21 = vor.u32 %v1650_v49, %v1649_v38  ;;  %v1654_v44 = vor.u32 %v1653_v17, %v1652_v2 }
 0x34a   :  { %4239 = vsinq.f32 %v1821_v12  ;;  %v1657_v62 = vor.u32 %v1656_v24, %v1655_v4  ;;  %v1658_v18 = vshll.u32 %v4300_v15, %v1643_v54  ;;  %v1659_v58 = vshrl.u32 %v4301_v22, %v1644_v52 }
 0x34b   :  { %v3453_v14 = vadd.s32 %v6301_v63, %v6306_v35  ;;  %v3465_v29 = vclz %v3908_v0  ;;  %v1677_v37 = vshll.u32 %v1637_v42, 8  ;;  %v3303_v36 = vadd.s32 1, %v3903_v57 }
 0x34c   :  { %v3484_v3 = vsel %vm3399_vm10, %v3483_v60, %v3459_v47  ;;  %v1645_v50 = vshrl.u32 %v4296_v5, %v1644_v52  ;;  %v1660_v20 = vor.u32 %v1659_v58, %v1658_v18  ;;  %vm1661_vm11 = vcmp.lt.s32.totalorder %v1642_v40, 1 }
 0x34d   :  { %v3909_v61 = vadd.s32 4294967294, %v3465_v29  ;;  %vm1663_vm13 = vcmp.lt.s32.totalorder %v1642_v40, 3  ;;  %vm1664_vm14 = vcmp.lt.s32.totalorder %v1642_v40, 4  ;;  %v1669_v6 = vsel %vm1661_vm11, %v1648_v19, %v1651_v21 }
 0x34e   :  { %v1666_v32 = vsel %vm1664_vm14, %v1654_v44, 2102212464  ;;  %v1670_v25 = vsel %vm1664_vm14, %v1657_v62, 920167782  ;;  %v1673_v16 = vsel %vm1661_vm11, %v1651_v21, %v1654_v44  ;;  %v1674_v63 = vsel %vm1664_vm14, %v1660_v20, 1326507024 }
 0x34f   :  { %vm3910_vm15 = vcmp.lt.s32.totalorder %v3909_v61, 0  ;;  %vm1662_vm0 = vcmp.lt.s32.totalorder %v1642_v40, 2  ;;  %v1671_v35 = vsel %vm1663_vm13, %v1654_v44, %v1670_v25  ;;  %v1675_v26 = vsel %vm1663_vm13, %v1657_v62, %v1674_v63 }
 0x350   :  { %v3468_v27 = vsel %vm3910_vm15, 0, %v3909_v61  ;;  %v3486_v41 = vsel %vm6349_vm12, 0, %v3484_v3  ;;  %v1672_v56 = vsel %vm1662_vm0, %v1669_v6, %v1671_v35  ;;  %v1676_v47 = vsel %vm1662_vm0, %v1673_v16, %v1675_v26 }
 0x351   :  { %v3469_v53 = vsub.s32 32, %v3468_v27  ;;  %v3473_v43 = vsub.s32 4294967266, %v3468_v27  ;;  %v1665_v54 = vsel %vm1661_vm11, %v1645_v50, %v1648_v19  ;;  %v1667_v45 = vsel %vm1663_vm13, %v1651_v21, %v1666_v32 }
 0x352   :  { %v6379_v34 = vmul.u32.u64.low %v1677_v37, %v1676_v47  ;;  %v6380_v28 = vmul.u32.u64.high %v1677_v37, %v1676_v47, %v6379_v34  ;;  %v6382_v42 = vmul.u32.u64.low %v1677_v37, %v1672_v56  ;;  %v6383_v52 = vmul.u32.u64.high %v1677_v37, %v1672_v56, %v6382_v42  ;;  %v3977_v56 = vpop.f32.mrf.mxu0 }
 0x353   :  { %vm1825_vm1 = vweird.f32 %v6141_v39  ;;  %v3470_v57 = vshll.u32 %v6339_v46, %v3468_v27  ;;  %v3471_v30 = vshrl.u32 %v3453_v14, %v3469_v53  ;;  %v3474_v60 = vadd.s32 127, %v3473_v43 }
 0x354   :  { %vm3304_vm2 = vcmp.gt.s32.totalorder %v3303_v36, 0  ;;  %v3490_v55 = vadd.s32 3, %v3486_v41  ;;  %v1668_v33 = vsel %vm1662_vm0, %v1665_v54, %v1667_v45  ;;  %v3300_v38 = vand.u32 8388607, %v3293_v8 }
 0x355   :  { %v3305_v49 = vsel %vm3304_vm2, %v3303_v36, 0  ;;  %vm1828_vm3 = vcmp.lt.s32.totalorder %v6335_v23, 2  ;;  %v3472_v51 = vor.u32 %v3471_v30, %v3470_v57  ;;  %v3475_v31 = vshll.u32 %v3474_v60, 23 }
 0x356   :  { %v3307_v2 = vand.u32 31, %v3305_v49  ;;  %v4238_v17 = vpop.eup %4237  ;;  %vm1829_vm4 = vcmp.eq.s32.totalorder %v6335_v23, 0  ;;  %vm1832_vm5 = vcmp.eq.s32.totalorder %v6335_v23, 2  ;;  %vm1686_vm6 = vc.u32 %v6380_v28, %v6382_v42 }
 0x357   :  { %v1687_v46 = vadd.s32 1, %v6383_v52  ;;  %v4240_v40 = vpop.eup %4239  ;;  %v1833_v12 = vxor.u32 2147483648, %v4238_v17  ;;  %v3476_v19 = vor.u32 4788187, %v3475_v31  ;;  %v1684_v4 = vmul.u32 %v1677_v37, %v1668_v33 }
 0x358   :  { %v3308_v24 = vsub.s32 32, %v3307_v2  ;;  %v1830_v0 = vxor.u32 2147483648, %v4240_v40  ;;  %v6397_v21 = vand.u32 3, %v3490_v55  ;;  %v3301_v62 = vor.u32 8388608, %v3300_v38  ;;  %v6426_v55 = vld [vmem:[%s6810_s2] ss:$0 sm:$0xff] }
 0x359   :  { %v1688_v44 = vsel %vm1686_vm6, %v1687_v46, %v6383_v52  ;;  %v1834_v18 = vsel %vm1832_vm5, %v1833_v12, %v4240_v40  ;;  %v3477_v58 = vand.u32 2147483647, %v3476_v19  ;;  %v3479_v14 = vcvt.s32.f32 %v3472_v51  ;;  %s4302_s2 = smov [#allocation2]  }
 0x35a   :  { %v1689_v29 = vadd.s32 %v1688_v44, %v1684_v4  ;;  %v1831_v36 = vsel %vm1829_vm4, %v4238_v17, %v1830_v0  ;;  %v6402_v3 = vshrl.u32 %v3305_v49, 5  ;;  %v3311_v50 = vshrl.u32 %v4297_v9, %v3308_v24  ;;  %v4001_v44 = vpop.f32.mrf.mxu1  ;;  %s3746_s5 = sshll.u32 %s4302_s2, 4  ;;  %s3747_s5 = int_to_ptr.vmem [resolvable:$true] %s3746_s5 }
 0x35b   :  { %v3314_v37 = vshrl.u32 %v4298_v11, %v3308_v24  ;;  %v1835_v20 = vsel %vm1828_vm3, %v1831_v36, %v1834_v18  ;;  %v3480_v61 = vmul.f32 %v3479_v14, %v3477_v58  ;;  %v3317_v32 = vshrl.u32 %v4299_v13, %v3308_v24  ;;  %s4274_s6 = scalar_lea.vmem %s3747_s5, 4096  ;;  %p4279_p1 = scmp.lt.s32.totalorder %s3747_s5, %s3747_s5 }
 0x35c   :  { %v1690_v6 = vadd.s32 536870912, %v1689_v29  ;;  %v1836_v25 = vsel %vm1825_vm1, nan, %v1835_v20  ;;  %v3310_v16 = vshll.u32 %v4296_v5, %v3307_v2  ;;  %v3313_v63 = vshll.u32 %v4297_v9, %v3307_v2  ;;  %p4275_p0 = scmp.ne.s32.totalorder %s3747_s5, %s4274_s6  ;;  %p4280_p2 = scmp.lt.s32.totalorder %s4274_s6, %s4274_s6 }
 0x35d   :  { %v3316_v35 = vshll.u32 %v4298_v11, %v3307_v2  ;;  %3722 = vst [vmem:[#allocation2 + $0x68] sm:$0xff] %v1836_v25  ;;  %v3481_v26 = vxor.u32 2147483648, %v3480_v61  ;;  %v3319_v41 = vshll.u32 %v4299_v13, %v3307_v2  ;;  %v3320_v23 = vshrl.u32 %v4300_v15, %v3308_v24 }
 0x35e   :  { %v1691_v27 = vshrl.u32 %v1690_v6, 30  ;;  %v3312_v47 = vor.u32 %v3311_v50, %v3310_v16  ;;  %v3315_v53 = vor.u32 %v3314_v37, %v3313_v63  ;;  %v3322_v43 = vshll.u32 %v4300_v15, %v3307_v2  ;;  %p4281_p3 = por %p4280_p2, %p4279_p1 }
 0x35f   :  { %v3323_v39 = vshrl.u32 %v4301_v22, %v3308_v24  ;;  %v3482_v54 = vsel %vm3399_vm10, %v3481_v26, %v3480_v61  ;;  %v3318_v34 = vor.u32 %v3317_v32, %v3316_v35  ;;  %v3321_v52 = vor.u32 %v3320_v23, %v3319_v41 }
 0x360   :  { %v1692_v45 = vshll.u32 %v1691_v27, 30  ;;  %v3485_v57 = vsel %vm6349_vm12, %v6187_v48, %v3482_v54  ;;  %v3341_v60 = vshll.u32 %v3301_v62, 8  ;;  %v6429_v33 = vadd.f32 %v6426_v55, %v3977_v56  ;;  %p4282_p4 = pnand %p4281_p3, %p4275_p0 }
 0x361   :  { %v3324_v30 = vor.u32 %v3323_v39, %v3322_v43  ;;  %4241 = vcosq.f32 %v3485_v57  ;;  %v3309_v49 = vshrl.u32 %v4296_v5, %v3308_v24  ;;  %vm3325_vm7 = vcmp.lt.s32.totalorder %v6402_v3, 1 }
 0x362   :  { %v6431_v38 = vsub.s32 %v1689_v29, %v1692_v45  ;;  %4243 = vsinq.f32 %v3485_v57  ;;  %vm3326_vm8 = vcmp.lt.s32.totalorder %v6402_v3, 2  ;;  %vm3328_vm9 = vcmp.lt.s32.totalorder %v6402_v3, 4 }
 0x363   :  { %v3333_v59 = vsel %vm3325_vm7, %v3312_v47, %v3315_v53  ;;  %vm3327_vm10 = vcmp.lt.s32.totalorder %v6402_v3, 3  ;;  %v3330_v31 = vsel %vm3328_vm9, %v3318_v34, 2102212464  ;;  %v3334_v2 = vsel %vm3328_vm9, %v3321_v52, 920167782 }
 0x364   :  { %v1695_v51 = vsub.s32 0, %v6431_v38  ;;  %v1715_v17 = vsub.s32 4, %v1691_v27  ;;  %v3335_v46 = vsel %vm3327_vm10, %v3318_v34, %v3334_v2  ;;  %v3337_v40 = vsel %vm3325_vm7, %v3315_v53, %v3318_v34 }
 0x365   :  { %v3338_v12 = vsel %vm3328_vm9, %v3324_v30, 1326507024  ;;  %v3329_v4 = vsel %vm3325_vm7, %v3309_v49, %v3312_v47  ;;  %v3336_v24 = vsel %vm3326_vm8, %v3333_v59, %v3335_v46  ;;  %v3331_v62 = vsel %vm3327_vm10, %v3315_v53, %v3330_v31 }
 0x366   :  { %v3840_v19 = vmin.u32 %v1695_v51, %v6431_v38  ;;  %v3339_v0 = vsel %vm3327_vm10, %v3321_v52, %v3338_v12  ;;  %v6444_v58 = vmul.u32.u64.low %v3341_v60, %v3336_v24  ;;  %v6445_v14 = vmul.u32.u64.high %v3341_v60, %v3336_v24, %v6444_v58 }
 0x367   :  { %v3340_v18 = vsel %vm3326_vm8, %v3337_v40, %v3339_v0  ;;  %vm1631_vm12 = vcmp.lt.s32.totalorder %v6295_v7, 0  ;;  %v6453_v37 = vadd.f32 %v6426_v55, %v4001_v44  ;;  %vm6457_vm11 = vcmp.le.f32.partialorder %v1629_v1, 0.7853982  ;;  %v292_v0 = vpop.f32.mrf.mxu0 }
 0x368   :  { %v1697_v29 = vclz %v3840_v19  ;;  %v6449_v36 = vmul.u32.u64.low %v3341_v60, %v3340_v18  ;;  %v6450_v50 = vmul.u32.u64.high %v3341_v60, %v3340_v18, %v6449_v36  ;;  %v3332_v6 = vsel %vm3326_vm8, %v3329_v4, %v3331_v62 }
 0x369   :  { %v1944_v32 = vand.u32 2139095040, %v6429_v33  ;;  %vm3492_vm13 = vcmp.lt.s32.totalorder %v6397_v21, 2  ;;  %vm3493_vm14 = vcmp.eq.s32.totalorder %v6397_v21, 0  ;;  %v1716_v25 = vsel %vm1631_vm12, %v1715_v17, %v1691_v27 }
 0x36a   :  { %v3841_v61 = vadd.s32 4294967294, %v1697_v29  ;;  %v3351_v16 = vadd.s32 1, %v6445_v14  ;;  %v1941_v1 = vand.u32 2147483647, %v6429_v33  ;;  %vm3489_vm15 = vweird.f32 %v6187_v48 }
 0x36b   :  { %vm3496_vm0 = vcmp.eq.s32.totalorder %v6397_v21, 2  ;;  %v1685_v3 = vadd.s32 %v6382_v42, %v6380_v28  ;;  %v1945_v63 = vshrl.u32 %v1944_v32, 23  ;;  %v3348_v26 = vmul.u32 %v3341_v60, %v3332_v6 }
 0x36c   :  { %vm3842_vm1 = vcmp.lt.s32.totalorder %v3841_v61, 0  ;;  %vm3350_vm2 = vc.u32 %v6450_v50, %v6444_v58  ;;  %v3608_v27 = vand.u32 2139095040, %v6453_v37  ;;  %v1718_v56 = vsel %vm6457_vm11, 0, %v1716_v25 }
 0x36d   :  { %v1700_v35 = vsel %vm3842_vm1, 0, %v3841_v61  ;;  %v3352_v47 = vsel %vm3350_vm2, %v3351_v16, %v6445_v14  ;;  %v3851_v39 = vadd.s32 4294967169, %v1945_v63  ;;  %v1948_v28 = vand.u32 8388607, %v1941_v1 }
 0x36e   :  { %v1701_v41 = vsub.s32 32, %v1700_v35  ;;  %v1705_v23 = vsub.s32 4294967266, %v1700_v35  ;;  %v4242_v53 = vpop.eup %4241  ;;  %v3353_v43 = vadd.s32 %v3352_v47, %v3348_v26  ;;  %v3605_v42 = vand.u32 2147483647, %v6453_v37 }
 0x36f   :  { %v4244_v54 = vpop.eup %4243  ;;  %v3497_v45 = vxor.u32 2147483648, %v4242_v53  ;;  %v1702_v34 = vshll.u32 %v6431_v38, %v1700_v35  ;;  %v1951_v49 = vadd.s32 1, %v3851_v39  ;;  %v3609_v59 = vshrl.u32 %v3608_v27, 23 }
 0x370   :  { %v1703_v52 = vshrl.u32 %v1685_v3, %v1701_v41  ;;  %v1706_v57 = vadd.s32 127, %v1705_v23  ;;  %v3494_v30 = vxor.u32 2147483648, %v4244_v54  ;;  %v3354_v60 = vadd.s32 536870912, %v3353_v43 }
 0x371   :  { %v3498_v51 = vsel %vm3496_vm0, %v3497_v45, %v4244_v54  ;;  %v1722_v17 = vadd.s32 3, %v1718_v56  ;;  %v1949_v12 = vor.u32 8388608, %v1948_v28  ;;  %vm1952_vm3 = vcmp.gt.s32.totalorder %v1951_v49, 0 }
 0x372   :  { %v1704_v31 = vor.u32 %v1703_v52, %v1702_v34  ;;  %v1707_v2 = vshll.u32 %v1706_v57, 23  ;;  %v3495_v46 = vsel %vm3493_vm14, %v4242_v53, %v3494_v30  ;;  %v6488_v40 = vshrl.u32 %v3354_v60, 30 }
 0x373   :  { %v3499_v38 = vsel %vm3492_vm13, %v3495_v46, %v3498_v51  ;;  %v1953_v4 = vsel %vm1952_vm3, %v1951_v49, 0  ;;  %v6494_v24 = vand.u32 8388607, %v3605_v42  ;;  %v3915_v18 = vadd.s32 4294967169, %v3609_v59 }
 0x374   :  { %v1708_v19 = vor.u32 4788187, %v1707_v2  ;;  %v3500_v44 = vsel %vm3489_vm15, nan, %v3499_v38  ;;  %v3356_v62 = vshll.u32 %v6488_v40, 30  ;;  %v1711_v29 = vcvt.s32.f32 %v1704_v31 }
 0x375   :  { %3738 = vst [vmem:[#allocation2 + $0xe8] sm:$0xff] %v3500_v44  ;;  %v1955_v36 = vand.u32 31, %v1953_v4  ;;  %v6499_v61 = vand.u32 3, %v1722_v17  ;;  %v3349_v21 = vadd.s32 %v6444_v58, %v6450_v50  ;;  %v6506_v32 = vadd.f32 %v6426_v55, %v292_v0 }
 0x376   :  { %v1709_v14 = vand.u32 2147483647, %v1708_v19  ;;  %v6503_v6 = vsub.s32 %v3353_v43, %v3356_v62  ;;  %v6508_v16 = vshll.u32 %v1949_v12, 8  ;;  %v3613_v3 = vor.u32 8388608, %v6494_v24 }
 0x377   :  { %v1956_v48 = vsub.s32 32, %v1955_v36  ;;  %v1954_v35 = vshrl.u32 %v1953_v4, 5  ;;  %v1958_v26 = vshll.u32 %v4296_v5, %v1955_v36  ;;  %v3615_v27 = vadd.s32 1, %v3915_v18 }
 0x378   :  { %v1712_v25 = vmul.f32 %v1711_v29, %v1709_v14  ;;  %v3359_v63 = vsub.s32 0, %v6503_v6  ;;  %v1961_v50 = vshll.u32 %v4297_v9, %v1955_v36  ;;  %v1964_v47 = vshll.u32 %v4298_v11, %v1955_v36 }
 0x379   :  { %v1959_v58 = vshrl.u32 %v4297_v9, %v1956_v48  ;;  %v1962_v23 = vshrl.u32 %v4298_v11, %v1956_v48  ;;  %v1965_v53 = vshrl.u32 %v4299_v13, %v1956_v48  ;;  %v1967_v43 = vshll.u32 %v4299_v13, %v1955_v36 }
 0x37a   :  { %v1713_v41 = vxor.u32 2147483648, %v1712_v25  ;;  %v3904_v56 = vmin.u32 %v3359_v63, %v6503_v6  ;;  %v1968_v45 = vshrl.u32 %v4300_v15, %v1956_v48  ;;  %v3379_v57 = vsub.s32 4, %v6488_v40 }
 0x37b   :  { %v1960_v28 = vor.u32 %v1959_v58, %v1958_v26  ;;  %v1963_v54 = vor.u32 %v1962_v23, %v1961_v50  ;;  %vm3616_vm4 = vcmp.gt.s32.totalorder %v3615_v27, 0  ;;  %v1966_v30 = vor.u32 %v1965_v53, %v1964_v47 }
 0x37c   :  { %v1714_v39 = vsel %vm1631_vm12, %v1713_v41, %v1712_v25  ;;  %v3361_v52 = vclz %v3904_v56  ;;  %v1969_v60 = vor.u32 %v1968_v45, %v1967_v43  ;;  %vm1973_vm5 = vcmp.lt.s32.totalorder %v1954_v35, 1 }
 0x37d   :  { %v1717_v34 = vsel %vm6457_vm11, %v6295_v7, %v1714_v39  ;;  %vm3295_vm6 = vcmp.lt.s32.totalorder %v6317_v10, 0  ;;  %v1970_v59 = vshll.u32 %v4300_v15, %v1955_v36  ;;  %v1971_v51 = vshrl.u32 %v4301_v22, %v1956_v48 }
 0x37e   :  { %4245 = vcosq.f32 %v1717_v34  ;;  %v3905_v49 = vadd.s32 4294967294, %v3361_v52  ;;  %v1957_v31 = vshrl.u32 %v4296_v5, %v1956_v48  ;;  %vm1975_vm7 = vcmp.lt.s32.totalorder %v1954_v35, 3 }
 0x37f   :  { %4247 = vsinq.f32 %v1717_v34  ;;  %vm1976_vm8 = vcmp.lt.s32.totalorder %v1954_v35, 4  ;;  %v1981_v20 = vsel %vm1973_vm5, %v1960_v28, %v1963_v54  ;;  %v1972_v2 = vor.u32 %v1971_v51, %v1970_v59 }
 0x380   :  { %vm3906_vm9 = vcmp.lt.s32.totalorder %v3905_v49, 0  ;;  %v1978_v17 = vsel %vm1976_vm8, %v1966_v30, 2102212464  ;;  %v1982_v46 = vsel %vm1976_vm8, %v1969_v60, 920167782  ;;  %v1977_v38 = vsel %vm1973_vm5, %v1957_v31, %v1960_v28 }
 0x381   :  { %v3364_v12 = vsel %vm3906_vm9, 0, %v3905_v49  ;;  %v1979_v19 = vsel %vm1975_vm7, %v1963_v54, %v1978_v17  ;;  %v1983_v4 = vsel %vm1975_vm7, %v1966_v30, %v1982_v46  ;;  %vm1974_vm10 = vcmp.lt.s32.totalorder %v1954_v35, 2 }
 0x382   :  { %v3365_v0 = vsub.s32 32, %v3364_v12  ;;  %v3369_v44 = vsub.s32 4294967266, %v3364_v12  ;;  %v1985_v62 = vsel %vm1973_vm5, %v1963_v54, %v1966_v30  ;;  %v3366_v18 = vshll.u32 %v6503_v6, %v3364_v12 }
 0x383   :  { %v1984_v14 = vsel %vm1974_vm10, %v1981_v20, %v1983_v4  ;;  %v1986_v29 = vsel %vm1976_vm8, %v1972_v2, 1326507024  ;;  %v3617_v36 = vsel %vm3616_vm4, %v3615_v27, 0  ;;  %v1980_v63 = vsel %vm1974_vm10, %v1977_v38, %v1979_v19 }
 0x384   :  { %v3367_v25 = vshrl.u32 %v3349_v21, %v3365_v0  ;;  %v3370_v48 = vadd.s32 127, %v3369_v44  ;;  %v1987_v26 = vsel %vm1975_vm7, %v1969_v60, %v1986_v29  ;;  %vm1725_vm12 = vcmp.eq.s32.totalorder %v6499_v61, 0 }
 0x385   :  { %v1988_v41 = vsel %vm1974_vm10, %v1985_v62, %v1987_v26  ;;  %v6544_v58 = vmul.u32.u64.low %v6508_v16, %v1984_v14  ;;  %v6545_v50 = vmul.u32.u64.high %v6508_v16, %v1984_v14, %v6544_v58  ;;  %v3619_v23 = vand.u32 31, %v3617_v36 }
 0x386   :  { %vm1724_vm11 = vcmp.lt.s32.totalorder %v6499_v61, 2  ;;  %vm6551_vm13 = vcmp.le.f32.partialorder %v3293_v8, 0.7853982  ;;  %v3368_v21 = vor.u32 %v3367_v25, %v3366_v18  ;;  %v3371_v35 = vshll.u32 %v3370_v48, 23 }
 0x387   :  { %v6556_v27 = vmul.u32.u64.low %v6508_v16, %v1988_v41  ;;  %v6557_v56 = vmul.u32.u64.high %v6508_v16, %v1988_v41, %v6556_v27  ;;  %vm1721_vm14 = vweird.f32 %v6295_v7  ;;  %vm1728_vm15 = vcmp.eq.s32.totalorder %v6499_v61, 2 }
 0x388   :  { %v3380_v47 = vsel %vm3295_vm6, %v3379_v57, %v6488_v40  ;;  %v3620_v53 = vsub.s32 32, %v3619_v23  ;;  %v6566_v8 = vshll.u32 %v3613_v3, 8  ;;  %v3372_v43 = vor.u32 4788187, %v3371_v35 }
 0x389   :  { %v1996_v39 = vmul.u32 %v6508_v16, %v1980_v63  ;;  %v6569_v28 = vshrl.u32 %v3617_v36, 5  ;;  %v3622_v54 = vshll.u32 %v4296_v5, %v3619_v23  ;;  %v1999_v45 = vadd.s32 1, %v6545_v50 }
 0x38a   :  { %v3623_v34 = vshrl.u32 %v4297_v9, %v3620_v53  ;;  %v3625_v52 = vshll.u32 %v4297_v9, %v3619_v23  ;;  %v3628_v40 = vshll.u32 %v4298_v11, %v3619_v23  ;;  %v3373_v30 = vand.u32 2147483647, %v3372_v43 }
 0x38b   :  { %v4246_v57 = vpop.eup %4245  ;;  %v3375_v24 = vcvt.s32.f32 %v3368_v21  ;;  %vm1998_vm0 = vc.u32 %v6557_v56, %v6544_v58  ;;  %v3626_v16 = vshrl.u32 %v4298_v11, %v3620_v53  ;;  %v3629_v59 = vshrl.u32 %v4299_v13, %v3620_v53 }
 0x38c   :  { %v4248_v3 = vpop.eup %4247  ;;  %v1729_v60 = vxor.u32 2147483648, %v4246_v57  ;;  %v2000_v49 = vsel %vm1998_vm0, %v1999_v45, %v6545_v50  ;;  %v3631_v51 = vshll.u32 %v4299_v13, %v3619_v23  ;;  %v3634_v17 = vshll.u32 %v4300_v15, %v3619_v23 }
 0x38d   :  { %v1726_v31 = vxor.u32 2147483648, %v4248_v3  ;;  %v3376_v20 = vmul.f32 %v3375_v24, %v3373_v30  ;;  %v2001_v2 = vadd.s32 %v2000_v49, %v1996_v39  ;;  %v3624_v12 = vor.u32 %v3623_v34, %v3622_v54 }
 0x38e   :  { %v1730_v46 = vsel %vm1728_vm15, %v1729_v60, %v4248_v3  ;;  %v3632_v38 = vshrl.u32 %v4300_v15, %v3620_v53  ;;  %v3635_v19 = vshrl.u32 %v4301_v22, %v3620_v53  ;;  %v3627_v62 = vor.u32 %v3626_v16, %v3625_v52 }
 0x38f   :  { %v1727_v4 = vsel %vm1725_vm12, %v4246_v57, %v1726_v31  ;;  %v3377_v0 = vxor.u32 2147483648, %v3376_v20  ;;  %v2002_v44 = vadd.s32 536870912, %v2001_v2  ;;  %v3382_v14 = vsel %vm6551_vm13, 0, %v3380_v47 }
 0x390   :  { %v1731_v18 = vsel %vm1724_vm11, %v1727_v4, %v1730_v46  ;;  %v3630_v29 = vor.u32 %v3629_v59, %v3628_v40  ;;  %v3633_v36 = vor.u32 %v3632_v38, %v3631_v51  ;;  %v3636_v26 = vor.u32 %v3635_v19, %v3634_v17  ;;  %v372_v19 = vpop.f32.mrf.mxu1 }
 0x391   :  { %v1732_v25 = vsel %vm1721_vm14, nan, %v1731_v18  ;;  %v3378_v48 = vsel %vm3295_vm6, %v3377_v0, %v3376_v20  ;;  %v2003_v63 = vshrl.u32 %v2002_v44, 30  ;;  %v3621_v61 = vshrl.u32 %v4296_v5, %v3620_v53 }
 0x392   :  { %3721 = vst [vmem:[#allocation2 + $0x60] sm:$0xff] %v1732_v25  ;;  %v3381_v41 = vsel %vm6551_vm13, %v6317_v10, %v3378_v48  ;;  %vm3637_vm1 = vcmp.lt.s32.totalorder %v6569_v28, 1  ;;  %vm3639_vm2 = vcmp.lt.s32.totalorder %v6569_v28, 3  ;;  %vm3640_vm3 = vcmp.lt.s32.totalorder %v6569_v28, 4 }
 0x393   :  { %4249 = vcosq.f32 %v3381_v41  ;;  %v2004_v50 = vshll.u32 %v2003_v63, 30  ;;  %v3645_v7 = vsel %vm3637_vm1, %v3624_v12, %v3627_v62  ;;  %v3642_v23 = vsel %vm3640_vm3, %v3630_v29, 2102212464 }
 0x394   :  { %4251 = vsinq.f32 %v3381_v41  ;;  %v3646_v21 = vsel %vm3640_vm3, %v3633_v36, 920167782  ;;  %v3649_v6 = vsel %vm3637_vm1, %v3627_v62, %v3630_v29  ;;  %vm3638_vm4 = vcmp.lt.s32.totalorder %v6569_v28, 2 }
 0x395   :  { %v6608_v35 = vsub.s32 %v2001_v2, %v2004_v50  ;;  %v3647_v27 = vsel %vm3639_vm2, %v3630_v29, %v3646_v21  ;;  %v3650_v47 = vsel %vm3640_vm3, %v3636_v26, 1326507024  ;;  %v3386_v53 = vadd.s32 3, %v3382_v14 }
 0x396   :  { %v2027_v43 = vsub.s32 4, %v2003_v63  ;;  %v3648_v39 = vsel %vm3638_vm4, %v3645_v7, %v3647_v27  ;;  %v3651_v54 = vsel %vm3639_vm2, %v3633_v36, %v3650_v47  ;;  %v3641_v34 = vsel %vm3637_vm1, %v3621_v61, %v3624_v12 }
 0x397   :  { %v2007_v45 = vsub.s32 0, %v6608_v35  ;;  %v3643_v52 = vsel %vm3639_vm2, %v3627_v62, %v3642_v23  ;;  %v3652_v40 = vsel %vm3638_vm4, %v3649_v6, %v3651_v54  ;;  %vm1943_vm5 = vcmp.lt.s32.totalorder %v6429_v33, 0 }
 0x398   :  { %v6625_v57 = vmul.u32.u64.low %v6566_v8, %v3652_v40  ;;  %v6626_v30 = vmul.u32.u64.high %v6566_v8, %v3652_v40, %v6625_v57  ;;  %v6629_v24 = vmul.u32.u64.low %v6566_v8, %v3648_v39  ;;  %v6630_v16 = vmul.u32.u64.high %v6566_v8, %v3648_v39, %v6629_v24 }
 0x399   :  { %v3852_v3 = vmin.u32 %v2007_v45, %v6608_v35  ;;  %v3387_v60 = vand.u32 3, %v3386_v53  ;;  %v2028_v49 = vsel %vm1943_vm5, %v2027_v43, %v2003_v63  ;;  %v3644_v59 = vsel %vm3638_vm4, %v3641_v34, %v3643_v52 }
 0x39a   :  { %v1840_v51 = vand.u32 2139095040, %v6506_v32  ;;  %vm6641_vm6 = vcmp.le.f32.partialorder %v1941_v1, 0.7853982  ;;  %vm3662_vm7 = vc.u32 %v6626_v30, %v6629_v24  ;;  %v3663_v2 = vadd.s32 1, %v6630_v16 }
 0x39b   :  { %v2009_v31 = vclz %v3852_v3  ;;  %v2030_v12 = vsel %vm6641_vm6, 0, %v2028_v49  ;;  %v3660_v28 = vmul.u32 %v6566_v8, %v3644_v59  ;;  %v1837_v38 = vand.u32 2147483647, %v6506_v32 }
 0x39c   :  { %v1841_v17 = vshrl.u32 %v1840_v51, 23  ;;  %vm3388_vm8 = vcmp.lt.s32.totalorder %v3387_v60, 2  ;;  %vm3389_vm9 = vcmp.eq.s32.totalorder %v3387_v60, 0  ;;  %v3664_v1 = vsel %vm3662_vm7, %v3663_v2, %v6630_v16 }
 0x39d   :  { %v3853_v46 = vadd.s32 4294967294, %v2009_v31  ;;  %vm3392_vm10 = vcmp.eq.s32.totalorder %v3387_v60, 2  ;;  %v1997_v0 = vadd.s32 %v6544_v58, %v6557_v56  ;;  %v3665_v44 = vadd.s32 %v3664_v1, %v3660_v28 }
 0x39e   :  { %v3847_v4 = vadd.s32 4294967169, %v1841_v17  ;;  %v2034_v14 = vadd.s32 3, %v2030_v12  ;;  %v6655_v8 = vadd.f32 %v6426_v55, %v372_v19  ;;  %v1844_v26 = vand.u32 8388607, %v1837_v38 }
 0x39f   :  { %vm3854_vm12 = vcmp.lt.s32.totalorder %v3853_v46, 0  ;;  %v3666_v58 = vadd.s32 536870912, %v3665_v44  ;;  %vm3385_vm13 = vweird.f32 %v6317_v10  ;;  %v3661_v52 = vadd.s32 %v6629_v24, %v6626_v30 }
 0x3a0   :  { %v4250_v62 = vpop.eup %4249  ;;  %v2012_v18 = vsel %vm3854_vm12, 0, %v3853_v46  ;;  %v1847_v29 = vadd.s32 1, %v3847_v4  ;;  %v3504_v27 = vand.u32 2139095040, %v6655_v8  ;;  %v6668_v34 = vand.u32 3, %v2034_v14 }
 0x3a1   :  { %v4252_v36 = vpop.eup %4251  ;;  %v3393_v25 = vxor.u32 2147483648, %v4250_v62  ;;  %v2013_v48 = vsub.s32 32, %v2012_v18  ;;  %v2017_v63 = vsub.s32 4294967266, %v2012_v18  ;;  %v2014_v61 = vshll.u32 %v6608_v35, %v2012_v18 }
 0x3a2   :  { %v3390_v41 = vxor.u32 2147483648, %v4252_v36  ;;  %vm1848_vm11 = vcmp.gt.s32.totalorder %v1847_v29, 0  ;;  %v6662_v21 = vshrl.u32 %v3666_v58, 30  ;;  %v1845_v57 = vor.u32 8388608, %v1844_v26 }
 0x3a3   :  { %v3394_v56 = vsel %vm3392_vm10, %v3393_v25, %v4252_v36  ;;  %v2015_v50 = vshrl.u32 %v1997_v0, %v2013_v48  ;;  %v2018_v7 = vadd.s32 127, %v2017_v63  ;;  %v1849_v23 = vsel %vm1848_vm11, %v1847_v29, 0 }
 0x3a4   :  { %v3391_v55 = vsel %vm3389_vm9, %v4250_v62, %v3390_v41  ;;  %v1851_v6 = vand.u32 31, %v1849_v23  ;;  %v3668_v39 = vshll.u32 %v6662_v21, 30  ;;  %v3505_v10 = vshrl.u32 %v3504_v27, 23 }
 0x3a5   :  { %v3395_v47 = vsel %vm3388_vm8, %v3391_v55, %v3394_v56  ;;  %v2016_v53 = vor.u32 %v2015_v50, %v2014_v61  ;;  %v2019_v35 = vshll.u32 %v2018_v7, 23  ;;  %v1850_v17 = vshrl.u32 %v1849_v23, 5 }
 0x3a6   :  { %v3396_v43 = vsel %vm3385_vm13, nan, %v3395_v47  ;;  %v1852_v54 = vsub.s32 32, %v1851_v6  ;;  %v6671_v40 = vsub.s32 %v3665_v44, %v3668_v39  ;;  %v1854_v49 = vshll.u32 %v4296_v5, %v1851_v6 }
 0x3a7   :  { %3737 = vst [vmem:[#allocation2 + $0xe0] sm:$0xff] %v3396_v43  ;;  %v2020_v45 = vor.u32 4788187, %v2019_v35  ;;  %v2023_v60 = vcvt.s32.f32 %v2016_v53  ;;  %v1857_v31 = vshll.u32 %v4297_v9, %v1851_v6  ;;  %v1860_v2 = vshll.u32 %v4298_v11, %v1851_v6 }
 0x3a8   :  { %v1855_v16 = vshrl.u32 %v4297_v9, %v1852_v54  ;;  %v1858_v59 = vshrl.u32 %v4298_v11, %v1852_v54  ;;  %v3671_v51 = vsub.s32 0, %v6671_v40  ;;  %v1861_v30 = vshrl.u32 %v4299_v13, %v1852_v54 }
 0x3a9   :  { %v2021_v3 = vand.u32 2147483647, %v2020_v45  ;;  %v1863_v46 = vshll.u32 %v4299_v13, %v1851_v6  ;;  %v1864_v12 = vshrl.u32 %v4300_v15, %v1852_v54  ;;  %v1866_v62 = vshll.u32 %v4300_v15, %v1851_v6 }
 0x3aa   :  { %v3916_v28 = vmin.u32 %v3671_v51, %v6671_v40  ;;  %v1856_v19 = vor.u32 %v1855_v16, %v1854_v49  ;;  %v1859_v1 = vor.u32 %v1858_v59, %v1857_v31  ;;  %v1862_v4 = vor.u32 %v1861_v30, %v1860_v2 }
 0x3ab   :  { %v2024_v24 = vmul.f32 %v2023_v60, %v2021_v3  ;;  %v1865_v44 = vor.u32 %v1864_v12, %v1863_v46  ;;  %v1867_v18 = vshrl.u32 %v4301_v22, %v1852_v54  ;;  %v3691_v29 = vsub.s32 4, %v6662_v21 }
 0x3ac   :  { %v3673_v14 = vclz %v3916_v28  ;;  %v1885_v36 = vshll.u32 %v1845_v57, 8  ;;  %v3911_v25 = vadd.s32 4294967169, %v3505_v10  ;;  %v1853_v63 = vshrl.u32 %v4296_v5, %v1852_v54 }
 0x3ad   :  { %v2025_v0 = vxor.u32 2147483648, %v2024_v24  ;;  %v1868_v26 = vor.u32 %v1867_v18, %v1866_v62  ;;  %vm1869_vm14 = vcmp.lt.s32.totalorder %v1850_v17, 1  ;;  %vm1871_vm15 = vcmp.lt.s32.totalorder %v1850_v17, 3 }
 0x3ae   :  { %v3917_v61 = vadd.s32 4294967294, %v3673_v14  ;;  %vm1872_vm0 = vcmp.lt.s32.totalorder %v1850_v17, 4  ;;  %v1877_v56 = vsel %vm1869_vm14, %v1856_v19, %v1859_v1  ;;  %vm1870_vm2 = vcmp.lt.s32.totalorder %v1850_v17, 2 }
 0x3af   :  { %v2026_v48 = vsel %vm1943_vm5, %v2025_v0, %v2024_v24  ;;  %v1874_v58 = vsel %vm1872_vm0, %v1862_v4, 2102212464  ;;  %v1878_v50 = vsel %vm1872_vm0, %v1865_v44, 920167782  ;;  %v1873_v55 = vsel %vm1869_vm14, %v1853_v63, %v1856_v19 }
 0x3b0   :  { %v2029_v41 = vsel %vm6641_vm6, %v6429_v33, %v2026_v48  ;;  %vm3918_vm1 = vcmp.lt.s32.totalorder %v3917_v61, 0  ;;  %v1879_v7 = vsel %vm1871_vm15, %v1862_v4, %v1878_v50  ;;  %v1881_v6 = vsel %vm1869_vm14, %v1859_v1, %v1862_v4 }
 0x3b1   :  { %4253 = vcosq.f32 %v2029_v41  ;;  %v3676_v23 = vsel %vm3918_vm1, 0, %v3917_v61  ;;  %v1880_v20 = vsel %vm1870_vm2, %v1877_v56, %v1879_v7  ;;  %v1875_v53 = vsel %vm1871_vm15, %v1859_v1, %v1874_v58 }
 0x3b2   :  { %4255 = vsinq.f32 %v2029_v41  ;;  %v3677_v27 = vsub.s32 32, %v3676_v23  ;;  %v3681_v47 = vsub.s32 4294967266, %v3676_v23  ;;  %v1882_v35 = vsel %vm1872_vm0, %v1868_v26, 1326507024 }
 0x3b3   :  { %v3678_v43 = vshll.u32 %v6671_v40, %v3676_v23  ;;  %v1883_v39 = vsel %vm1871_vm15, %v1865_v44, %v1882_v35  ;;  %v6703_v54 = vmul.u32.u64.low %v1885_v36, %v1880_v20  ;;  %v6704_v45 = vmul.u32.u64.high %v1885_v36, %v1880_v20, %v6703_v54 }
 0x3b4   :  { %v3679_v57 = vshrl.u32 %v3661_v52, %v3677_v27  ;;  %v3682_v16 = vadd.s32 127, %v3681_v47  ;;  %v1884_v10 = vsel %vm1870_vm2, %v1881_v6, %v1883_v39  ;;  %v3511_v3 = vadd.s32 1, %v3911_v25 }
 0x3b5   :  { %vm3607_vm3 = vcmp.lt.s32.totalorder %v6453_v37, 0  ;;  %v6709_v60 = vmul.u32.u64.low %v1885_v36, %v1884_v10  ;;  %v6710_v49 = vmul.u32.u64.high %v1885_v36, %v1884_v10, %v6709_v60  ;;  %v1876_v40 = vsel %vm1870_vm2, %v1873_v55, %v1875_v53 }
 0x3b6   :  { %v3680_v59 = vor.u32 %v3679_v57, %v3678_v43  ;;  %v3683_v51 = vshll.u32 %v3682_v16, 23  ;;  %vm3512_vm4 = vcmp.gt.s32.totalorder %v3511_v3, 0  ;;  %vm6715_vm5 = vcmp.le.f32.partialorder %v3605_v42, 0.7853982 }
 0x3b7   :  { %v1895_v52 = vadd.s32 1, %v6704_v45  ;;  %v3501_v2 = vand.u32 2147483647, %v6655_v8  ;;  %v3513_v30 = vsel %vm3512_vm4, %v3511_v3, 0  ;;  %vm2036_vm6 = vcmp.lt.s32.totalorder %v6668_v34, 2 }
 0x3b8   :  { %v3684_v24 = vor.u32 4788187, %v3683_v51  ;;  %v3692_v17 = vsel %vm3607_vm3, %v3691_v29, %v6662_v21  ;;  %v3515_v46 = vand.u32 31, %v3513_v30  ;;  %vm2033_vm7 = vweird.f32 %v6429_v33 }
 0x3b9   :  { %vm2037_vm8 = vcmp.eq.s32.totalorder %v6668_v34, 0  ;;  %vm2040_vm9 = vcmp.eq.s32.totalorder %v6668_v34, 2  ;;  %v1892_v42 = vmul.u32 %v1885_v36, %v1876_v40  ;;  %vm1894_vm10 = vc.u32 %v6710_v49, %v6703_v54 }
 0x3ba   :  { %v3685_v12 = vand.u32 2147483647, %v3684_v24  ;;  %v3687_v28 = vcvt.s32.f32 %v3680_v59  ;;  %v1896_v19 = vsel %vm1894_vm10, %v1895_v52, %v6704_v45  ;;  %v3516_v1 = vsub.s32 32, %v3515_v46 }
 0x3bb   :  { %v3694_v4 = vsel %vm6715_vm5, 0, %v3692_v17  ;;  %v1897_v21 = vadd.s32 %v1896_v19, %v1892_v42  ;;  %v3508_v0 = vand.u32 8388607, %v3501_v2  ;;  %v6735_v44 = vshrl.u32 %v3513_v30, 5 }
 0x3bc   :  { %v3688_v18 = vmul.f32 %v3687_v28, %v3685_v12  ;;  %v3518_v14 = vshll.u32 %v4296_v5, %v3515_v46  ;;  %v3519_v29 = vshrl.u32 %v4297_v9, %v3516_v1  ;;  %v3521_v36 = vshll.u32 %v4297_v9, %v3515_v46 }
 0x3bd   :  { %v1898_v63 = vadd.s32 536870912, %v1897_v21  ;;  %v3522_v26 = vshrl.u32 %v4298_v11, %v3516_v1  ;;  %v3524_v41 = vshll.u32 %v4298_v11, %v3515_v46  ;;  %v3527_v56 = vshll.u32 %v4299_v13, %v3515_v46 }
 0x3be   :  { %v4254_v62 = vpop.eup %4253  ;;  %v3689_v58 = vxor.u32 2147483648, %v3688_v18  ;;  %v3528_v50 = vshrl.u32 %v4300_v15, %v3516_v1  ;;  %v3520_v55 = vor.u32 %v3519_v29, %v3518_v14  ;;  %v3525_v9 = vshrl.u32 %v4299_v13, %v3516_v1 }
 0x3bf   :  { %v4256_v25 = vpop.eup %4255  ;;  %v2041_v48 = vxor.u32 2147483648, %v4254_v62  ;;  %v6746_v23 = vshrl.u32 %v1898_v63, 30  ;;  %v3530_v6 = vshll.u32 %v4300_v15, %v3515_v46  ;;  %v3531_v27 = vshrl.u32 %v4301_v22, %v3516_v1 }
 0x3c0   :  { %v2038_v61 = vxor.u32 2147483648, %v4256_v25  ;;  %v3690_v11 = vsel %vm3607_vm3, %v3689_v58, %v3688_v18  ;;  %v3523_v13 = vor.u32 %v3522_v26, %v3521_v36  ;;  %v3529_v39 = vor.u32 %v3528_v50, %v3527_v56 }
 0x3c1   :  { %v2042_v7 = vsel %vm2040_vm9, %v2041_v48, %v4256_v25  ;;  %v3693_v53 = vsel %vm6715_vm5, %v6453_v37, %v3690_v11  ;;  %v1900_v35 = vshll.u32 %v6746_v23, 30  ;;  %v3532_v45 = vor.u32 %v3531_v27, %v3530_v6 }
 0x3c2   :  { %v2039_v20 = vsel %vm2037_vm8, %v4254_v62, %v2038_v61  ;;  %4257 = vcosq.f32 %v3693_v53  ;;  %v3526_v22 = vor.u32 %v3525_v9, %v3524_v41  ;;  %v3698_v57 = vadd.s32 3, %v3694_v4 }
 0x3c3   :  { %v2043_v47 = vsel %vm2036_vm6, %v2039_v20, %v2042_v7  ;;  %4259 = vsinq.f32 %v3693_v53  ;;  %v1901_v15 = vsub.s32 %v1897_v21, %v1900_v35  ;;  %v3509_v34 = vor.u32 8388608, %v3508_v0 }
 0x3c4   :  { %v2044_v43 = vsel %vm2033_vm7, nan, %v2043_v47  ;;  %vm3533_vm12 = vcmp.lt.s32.totalorder %v6735_v44, 1  ;;  %v3517_v10 = vshrl.u32 %v4296_v5, %v3516_v1  ;;  %vm3536_vm11 = vcmp.lt.s32.totalorder %v6735_v44, 4 }
 0x3c5   :  { %3724 = vst [vmem:[#allocation2 + $0x78] sm:$0xff] %v2044_v43  ;;  %v1903_v16 = vsub.s32 0, %v1901_v15  ;;  %v3541_v33 = vsel %vm3533_vm12, %v3520_v55, %v3523_v13  ;;  %vm3534_vm13 = vcmp.lt.s32.totalorder %v6735_v44, 2  ;;  %vm3535_vm14 = vcmp.lt.s32.totalorder %v6735_v44, 3 }
 0x3c6   :  { %v3542_v3 = vsel %vm3536_vm11, %v3529_v39, 920167782  ;;  %v3546_v60 = vsel %vm3536_vm11, %v3532_v45, 1326507024  ;;  %v3538_v51 = vsel %vm3536_vm11, %v3526_v22, 2102212464  ;;  %v3545_v31 = vsel %vm3533_vm12, %v3523_v13, %v3526_v22 }
 0x3c7   :  { %v3848_v59 = vmin.u32 %v1903_v16, %v1901_v15  ;;  %v3543_v40 = vsel %vm3535_vm14, %v3526_v22, %v3542_v3  ;;  %v3547_v52 = vsel %vm3535_vm14, %v3529_v39, %v3546_v60  ;;  %v3549_v30 = vshll.u32 %v3509_v34, 8 }
 0x3c8   :  { %v3544_v5 = vsel %vm3534_vm13, %v3541_v33, %v3543_v40  ;;  %v3537_v17 = vsel %vm3533_vm12, %v3517_v10, %v3520_v55  ;;  %v3539_v46 = vsel %vm3535_vm14, %v3523_v13, %v3538_v51  ;;  %v3548_v42 = vsel %vm3534_vm13, %v3545_v31, %v3547_v52 }
 0x3c9   :  { %v1905_v24 = vclz %v3848_v59  ;;  %v6778_v12 = vmul.u32.u64.low %v3549_v30, %v3544_v5  ;;  %v6779_v28 = vmul.u32.u64.high %v3549_v30, %v3544_v5, %v6778_v12  ;;  %v3699_v19 = vand.u32 3, %v3698_v57 }
 0x3ca   :  { %v6781_v4 = vmul.u32.u64.low %v3549_v30, %v3548_v42  ;;  %v6782_v21 = vmul.u32.u64.high %v3549_v30, %v3548_v42, %v6781_v4  ;;  %v3540_v0 = vsel %vm3534_vm13, %v3537_v17, %v3539_v46  ;;  %v1893_v29 = vadd.s32 %v6703_v54, %v6710_v49 }
 0x3cb   :  { %v3849_v1 = vadd.s32 4294967294, %v1905_v24  ;;  %v3559_v18 = vadd.s32 1, %v6779_v28  ;;  %vm3704_vm0 = vcmp.eq.s32.totalorder %v3699_v19, 2  ;;  %v3556_v41 = vmul.u32 %v3549_v30, %v3540_v0 }
 0x3cc   :  { %vm3558_vm1 = vc.u32 %v6782_v21, %v6778_v12  ;;  %vm3701_vm2 = vcmp.eq.s32.totalorder %v3699_v19, 0  ;;  %vm3700_vm3 = vcmp.lt.s32.totalorder %v3699_v19, 2  ;;  %vm3697_vm4 = vweird.f32 %v6453_v37 }
 0x3cd   :  { %vm3850_vm15 = vcmp.lt.s32.totalorder %v3849_v1, 0  ;;  %v3560_v56 = vsel %vm3558_vm1, %v3559_v18, %v6779_v28  ;;  %vm1839_vm5 = vcmp.lt.s32.totalorder %v6506_v32, 0  ;;  %v1923_v45 = vsub.s32 4, %v6746_v23 }
 0x3ce   :  { %v1908_v62 = vsel %vm3850_vm15, 0, %v3849_v1  ;;  %v3561_v7 = vadd.s32 %v3560_v56, %v3556_v41  ;;  %vm1838_vm6 = vcmp.le.f32.partialorder %v1837_v38, 0.7853982  ;;  %v3557_v59 = vadd.s32 %v6778_v12, %v6782_v21 }
 0x3cf   :  { %v4258_v14 = vpop.eup %4257  ;;  %v1909_v36 = vsub.s32 32, %v1908_v62  ;;  %v1913_v25 = vsub.s32 4294967266, %v1908_v62  ;;  %v1910_v26 = vshll.u32 %v1901_v15, %v1908_v62  ;;  %v1924_v34 = vsel %vm1839_vm5, %v1923_v45, %v6746_v23 }
 0x3d0   :  { %v4260_v48 = vpop.eup %4259  ;;  %v3705_v63 = vxor.u32 2147483648, %v4258_v14  ;;  %v3562_v20 = vadd.s32 536870912, %v3561_v7  ;;  %v1926_v33 = vsel %vm1838_vm6, 0, %v1924_v34  ;;  %vm1929_vm12 = vweird.f32 %v6506_v32 }
 0x3d1   :  { %v3702_v61 = vxor.u32 2147483648, %v4260_v48  ;;  %v1911_v58 = vshrl.u32 %v1893_v29, %v1909_v36  ;;  %v1914_v44 = vadd.s32 127, %v1913_v25  ;;  %v1930_v60 = vadd.s32 3, %v1926_v33 }
 0x3d2   :  { %v3706_v50 = vsel %vm3704_vm0, %v3705_v63, %v4260_v48  ;;  %v3563_v27 = vshrl.u32 %v3562_v20, 30  ;;  %vm3503_vm11 = vcmp.lt.s32.totalorder %v6655_v8, 0  ;;  %vm3502_vm13 = vcmp.le.f32.partialorder %v3501_v2, 0.7853982 }
 0x3d3   :  { %v3703_v55 = vsel %vm3701_vm2, %v4258_v14, %v3702_v61  ;;  %v1912_v9 = vor.u32 %v1911_v58, %v1910_v26  ;;  %v1915_v54 = vshll.u32 %v1914_v44, 23  ;;  %v1931_v52 = vand.u32 3, %v1930_v60 }
 0x3d4   :  { %v3707_v49 = vsel %vm3700_vm3, %v3703_v55, %v3706_v50  ;;  %v3564_v35 = vshll.u32 %v3563_v27, 30  ;;  %v3587_v14 = vsub.s32 4, %v3563_v27  ;;  %vm3593_vm1 = vweird.f32 %v6655_v8 }
 0x3d5   :  { %v3708_v11 = vsel %vm3697_vm4, nan, %v3707_v49  ;;  %v1916_v6 = vor.u32 4788187, %v1915_v54  ;;  %v1919_v53 = vcvt.s32.f32 %v1912_v9  ;;  %vm1936_vm8 = vcmp.eq.s32.totalorder %v1931_v52, 2 }
 0x3d6   :  { %3740 = vst [vmem:[#allocation2 + $0xf8] sm:$0xff] %v3708_v11  ;;  %v3565_v43 = vsub.s32 %v3561_v7, %v3564_v35  ;;  %vm1933_vm9 = vcmp.eq.s32.totalorder %v1931_v52, 0  ;;  %vm1932_vm10 = vcmp.lt.s32.totalorder %v1931_v52, 2  ;;  %v3588_v25 = vsel %vm3503_vm11, %v3587_v14, %v3563_v27 }
 0x3d7   :  { %v1917_v47 = vand.u32 2147483647, %v1916_v6  ;;  %v3590_v48 = vsel %vm3502_vm13, 0, %v3588_v25 }
 0x3d8   :  { %v3567_v15 = vsub.s32 0, %v3565_v43  ;;  %v3594_v63 = vadd.s32 3, %v3590_v48 }
 0x3d9   :  { %v1920_v13 = vmul.f32 %v1919_v53, %v1917_v47 }
 0x3da   :  { %v3912_v57 = vmin.u32 %v3567_v15, %v3565_v43  ;;  %v3595_v26 = vand.u32 3, %v3594_v63 }
 0x3db   :  { %v1921_v39 = vxor.u32 2147483648, %v1920_v13 }
 0x3dc   :  { %v3569_v16 = vclz %v3912_v57  ;;  %vm3600_vm14 = vcmp.eq.s32.totalorder %v3595_v26, 2  ;;  %vm3597_vm15 = vcmp.eq.s32.totalorder %v3595_v26, 0  ;;  %vm3596_vm0 = vcmp.lt.s32.totalorder %v3595_v26, 2 }
 0x3dd   :  { %v1922_v37 = vsel %vm1839_vm5, %v1921_v39, %v1920_v13 }
 0x3de   :  { %v1925_v22 = vsel %vm1838_vm6, %v6506_v32, %v1922_v37  ;;  %v3913_v10 = vadd.s32 4294967294, %v3569_v16 }
 0x3df   :  { %4261 = vcosq.f32 %v1925_v22 }
 0x3e0   :  { %4263 = vsinq.f32 %v1925_v22  ;;  %vm3914_vm7 = vcmp.lt.s32.totalorder %v3913_v10, 0 }
 0x3e1   :  { %v3572_v3 = vsel %vm3914_vm7, 0, %v3913_v10 }
 0x3e2   :  { %v3573_v51 = vsub.s32 32, %v3572_v3  ;;  %v3577_v40 = vsub.s32 4294967266, %v3572_v3  ;;  %v3574_v31 = vshll.u32 %v3565_v43, %v3572_v3 }
 0x3e4   :  { %v3575_v38 = vshrl.u32 %v3557_v59, %v3573_v51  ;;  %v3578_v5 = vadd.s32 127, %v3577_v40 }
 0x3e6   :  { %v3576_v30 = vor.u32 %v3575_v38, %v3574_v31  ;;  %v3579_v24 = vshll.u32 %v3578_v5, 23 }
 0x3e8   :  { %v3580_v46 = vor.u32 4788187, %v3579_v24  ;;  %v3583_v1 = vcvt.s32.f32 %v3576_v30 }
 0x3ea   :  { %v3581_v19 = vand.u32 2147483647, %v3580_v46 }
 0x3ec   :  { %v4262_v17 = vpop.eup %4261  ;;  %v3584_v21 = vmul.f32 %v3583_v1, %v3581_v19 }
 0x3ed   :  { %v4264_v23 = vpop.eup %4263  ;;  %v1937_v42 = vxor.u32 2147483648, %v4262_v17 }
 0x3ee   :  { %v1934_v28 = vxor.u32 2147483648, %v4264_v23  ;;  %v3585_v18 = vxor.u32 2147483648, %v3584_v21 }
 0x3ef   :  { %v1938_v4 = vsel %vm1936_vm8, %v1937_v42, %v4264_v23 }
 0x3f0   :  { %v1935_v12 = vsel %vm1933_vm9, %v4262_v17, %v1934_v28  ;;  %v3586_v29 = vsel %vm3503_vm11, %v3585_v18, %v3584_v21 }
 0x3f1   :  { %v1939_v0 = vsel %vm1932_vm10, %v1935_v12, %v1938_v4  ;;  %v3589_v36 = vsel %vm3502_vm13, %v6655_v8, %v3586_v29 }
 0x3f2   :  { %v1940_v62 = vsel %vm1929_vm12, nan, %v1939_v0  ;;  %4265 = vcosq.f32 %v3589_v36 }
 0x3f3   :  { %3723 = vst [vmem:[#allocation2 + $0x70] sm:$0xff] %v1940_v62  ;;  %4267 = vsinq.f32 %v3589_v36 }
 0x3ff   :  { %v4266_v32 = vpop.eup %4265 }
 0x400   :  { %v4268_v41 = vpop.eup %4267  ;;  %v3601_v61 = vxor.u32 2147483648, %v4266_v32 }
 0x401   :  { %v3598_v58 = vxor.u32 2147483648, %v4268_v41 }
 0x402   :  { %v3602_v44 = vsel %vm3600_vm14, %v3601_v61, %v4268_v41 }
 0x403   :  { %v3599_v2 = vsel %vm3597_vm15, %v4266_v32, %v3598_v58 }
 0x404   :  { %v3603_v56 = vsel %vm3596_vm0, %v3599_v2, %v3602_v44 }
 0x405   :  { %v3604_v50 = vsel %vm3593_vm1, nan, %v3603_v56 }
 0x406   :  { %3739 = vst [vmem:[#allocation2 + $0xf0] sm:$0xff] %v3604_v50 }
 0x407   :  { %4285 = shalt.err (!%p4282_p4)
}
 0x408   :  { %s4303_s7 = smov 128   ;;  %s4304_s8 = smov 8  }
 0x409   :  { %3752 = dma.vmem_to_hbm [thread:$0]  %s3747_s5, 4096, %s6811_s3, [#allocation3], %s4303_s7, %s4303_s7, %s4304_s8  }
 0x40a   :  { %4294 = dma.done.wait [#allocation3], 4096  }
 0x40b   :  { %4295 = vsyncadd [#allocation3], 4294963200 }
 0x40c   :  { %3756 = vsyncpa [#allocation3], 1 }

</bundles_post_ra>
